<compile_context>
chip_gen: v6e
topology: v6e:2x2x1
jax: 0.10.0
libtpu: 0.0.40
codegen_flags: <defaults>
</compile_context>

<pallas_src>
import functools

import numpy as np
import jax
import jax.numpy as jnp
from jax.experimental import pallas as pl
from jax.experimental.pallas import tpu as pltpu


# --------------------------- static weight re-layout --------------------------

def _banded_conv_mats(w, in_w, parity):
    """Rewrite an OIHW 5x5 conv weight as 5 banded GEMM matrices (one per kernel
    row dy) mapping a (W_in*C_in)-wide input row slab to the even (parity=0) or
    odd (parity=1) output columns, packed (w_out_half, c_out)."""
    out_c, in_c, kh, kw = w.shape
    out_w = in_w - kh + 1
    half = out_w // 2
    r = jnp.arange(in_w * in_c)
    wpos, ci = r // in_c, r % in_c
    c = jnp.arange(half * out_c)
    co = c % out_c
    ow = 2 * (c // out_c) + parity
    dx = wpos[:, None] - ow[None, :]
    valid = (dx >= 0) & (dx < kw)
    dxc = jnp.clip(dx, 0, kw - 1)
    mats = []
    for dy in range(kh):
        vals = w[co[None, :], ci[:, None], dy, dxc]
        mats.append(jnp.where(valid, vals, 0.0))
    return jnp.stack(mats).astype(jnp.float32)      # (kh, in_w*in_c, half*out_c)


def preprocess_params(params):
    """One-time static re-layout of the PyTorch-format parameters."""
    hid1 = params["fc1_w"].shape[0]
    # fc1 columns: PyTorch flattens the (16, 5, 5) activation in (c, h, w)
    # order; the kernel produces it in (h, w, c) order.
    j = jnp.arange(16 * 5 * 5)
    h, w, c = j // 80, (j % 80) // 16, j % 16
    src = c * 25 + h * 5 + w
    wf1 = params["fc1_w"][:, src].T.reshape(5, 80, hid1)
    return {
        "w1e": _banded_conv_mats(params["conv1_w"], 32, 0),   # (5, 96, 84)
        "w1o": _banded_conv_mats(params["conv1_w"], 32, 1),   # (5, 96, 84)
        "b1t": jnp.tile(params["conv1_b"], 14)[None, :],      # (1, 84)
        "w2e": _banded_conv_mats(params["conv2_w"], 14, 0),   # (5, 84, 80)
        "w2o": _banded_conv_mats(params["conv2_w"], 14, 1),   # (5, 84, 80)
        "b2t": jnp.tile(params["conv2_b"], 5)[None, :],       # (1, 80)
        "wf1": wf1,                                           # (5, 80, 120)
        "bf1": params["fc1_b"][None, :],
        "wf2": params["fc2_w"].T,                             # (120, 84)
        "bf2": params["fc2_b"][None, :],
        "wf3": params["fc3_w"].T,                             # (84, 10)
        "bf3": params["fc3_b"][None, :],
    }


# ----------------- batch-size-dependent selection matrices (trace-time) -------

def _pool_perm(batch, out_h, stride_rows):
    """(B*2*out_h, B*stride_rows - 4) 0/1 matrix.  First half of the rows picks
    the even source rows bi*stride_rows + 2h, second half the odd ones, so the
    2x1 height max-pool is one GEMM + a max of two contiguous row halves."""
    n = batch * out_h
    m = np.zeros((2 * n, batch * stride_rows - 4), np.float32)
    for i in range(n):
        bi, h = divmod(i, out_h)
        m[i, bi * stride_rows + 2 * h] = 1.0
        m[n + i, bi * stride_rows + 2 * h + 1] = 1.0
    return jnp.asarray(m)


def _fc_regroup_perm(batch):
    """(B*5, B*5) permutation: row h*B + bi <- row bi*5 + h, so fc1 can be a sum
    over the 5 pooled rows with contiguous batch-major slices per row."""
    q = np.zeros((batch * 5, batch * 5), np.float32)
    for bi in range(batch):
        for h in range(5):
            q[h * batch + bi, bi * 5 + h] = 1.0
    return jnp.asarray(q)


# --------------------------- fused Pallas kernel ------------------------------

def _fused_cnn_kernel(x_ref, w1e_ref, w1o_ref, b1_ref, p1_ref,
                      w2e_ref, w2o_ref, b2_ref, p2_ref, q_ref,
                      wf1_ref, bf1_ref, wf2_ref, bf2_ref, wf3_ref, bf3_ref,
                      out_ref, *, batch):
    dot = functools.partial(jnp.dot, preferred_element_type=jnp.float32)
    B = batch

    x = x_ref[...]                                        # (B*32, 96) rows=(b,h)
    # ---- conv1: 10 batch-wide banded GEMMs, shift-add over kernel rows dy ---
    c1e = [dot(x, w1e_ref[dy]) for dy in range(5)]        # each (B*32, 84)
    c1o = [dot(x, w1o_ref[dy]) for dy in range(5)]
    n1 = B * 32 - 4
    pe = c1e[0][0:n1, :]
    po = c1o[0][0:n1, :]
    for dy in range(1, 5):
        pe = pe + c1e[dy][dy:dy + n1, :]
        po = po + c1o[dy][dy:dy + n1, :]
    b1t = b1_ref[...]
    ae = jnp.maximum(pe + b1t, 0.0)                       # even output columns
    ao = jnp.maximum(po + b1t, 0.0)                       # odd output columns
    # ---- fused 2x2 max-pool: width = even/odd max, height = row-pair GEMM ---
    wm = jnp.maximum(ae, ao)                              # (B*32-4, 84)
    rp = dot(p1_ref[...], wm)                             # (B*28, 84): [even;odd]
    h1 = B * 14
    a1 = jnp.maximum(rp[0:h1, :], rp[h1:2 * h1, :])       # (B*14, 84) = (b*h, w*6+c)

    # ---- conv2 + ReLU + pool, same batch-wide scheme -------------------------
    c2e = [dot(a1, w2e_ref[dy]) for dy in range(5)]       # each (B*14, 80)
    c2o = [dot(a1, w2o_ref[dy]) for dy in range(5)]
    n2 = B * 14 - 4
    qe = c2e[0][0:n2, :]
    qo = c2o[0][0:n2, :]
    for dy in range(1, 5):
        qe = qe + c2e[dy][dy:dy + n2, :]
        qo = qo + c2o[dy][dy:dy + n2, :]
    b2t = b2_ref[...]
    ae2 = jnp.maximum(qe + b2t, 0.0)
    ao2 = jnp.maximum(qo + b2t, 0.0)
    wm2 = jnp.maximum(ae2, ao2)                           # (B*14-4, 80)
    rp2 = dot(p2_ref[...], wm2)                           # (B*10, 80)
    h2 = B * 5
    a2 = jnp.maximum(rp2[0:h2, :], rp2[h2:2 * h2, :])     # (B*5, 80) = (b*h, w*16+c)

    # ---- fc1 as a sum over the 5 pooled rows (no in-kernel flatten) ---------
    a2p = dot(q_ref[...], a2)                             # rows regrouped (h, b)
    y = dot(a2p[0:B, :], wf1_ref[0])
    for h in range(1, 5):
        y = y + dot(a2p[h * B:(h + 1) * B, :], wf1_ref[h])
    y = jnp.maximum(y + bf1_ref[...], 0.0)                       # (B, 120)
    y = jnp.maximum(dot(y, wf2_ref[...]) + bf2_ref[...], 0.0)    # (B, 84)
    y = dot(y, wf3_ref[...]) + bf3_ref[...]                      # (B, 10)
    out_ref[...] = y.astype(out_ref.dtype)


def simple_cnn_forward(prep, x_nchw):
    B, C, H, W = x_nchw.shape
    assert (C, H, W) == (3, 32, 32)
    # Layout plumbing only: NCHW -> (B*H, W*C) row slab (lane dim = 96).
    x2 = jnp.transpose(x_nchw, (0, 2, 3, 1)).reshape(B * H, W * C)
    p1 = _pool_perm(B, 14, 32)                 # (B*28, B*32-4)
    p2 = _pool_perm(B, 5, 14)                  # (B*10, B*14-4)
    q = _fc_regroup_perm(B)                    # (B*5,  B*5)
    vmem = pl.BlockSpec(memory_space=pltpu.MemorySpace.VMEM)
    return pl.pallas_call(
        functools.partial(_fused_cnn_kernel, batch=B),
        out_shape=jax.ShapeDtypeStruct((B, 10), jnp.float32),
        in_specs=[vmem] * 16,
        out_specs=vmem,
    )(x2, prep["w1e"], prep["w1o"], prep["b1t"], p1,
      prep["w2e"], prep["w2o"], prep["b2t"], p2, q,
      prep["wf1"], prep["bf1"], prep["wf2"], prep["bf2"],
      prep["wf3"], prep["bf3"])


# --------------------------- params + pure-JAX reference ----------------------

def init_params(key, input_dim=400, hidden_dims=(120, 84), output_dim=10):
    ks = jax.random.split(key, 10)

    def w(k, shape, fan_in):
        return jax.random.normal(k, shape, jnp.float32) / jnp.sqrt(fan_in)

    return {
        "conv1_w": w(ks[0], (6, 3, 5, 5), 3 * 25),
        "conv1_b": w(ks[1], (6,), 3 * 25),
        "conv2_w": w(ks[2], (16, 6, 5, 5), 6 * 25),
        "conv2_b": w(ks[3], (16,), 6 * 25),
        "fc1_w": w(ks[4], (hidden_dims[0], input_dim), input_dim),
        "fc1_b": w(ks[5], (hidden_dims[0],), input_dim),
        "fc2_w": w(ks[6], (hidden_dims[1], hidden_dims[0]), hidden_dims[0]),
        "fc2_b": w(ks[7], (hidden_dims[1],), hidden_dims[0]),
        "fc3_w": w(ks[8], (output_dim, hidden_dims[1]), hidden_dims[1]),
        "fc3_b": w(ks[9], (output_dim,), hidden_dims[1]),
    }


def _reference_forward(params, x_nchw):
    dn = ("NCHW", "OIHW", "NCHW")
    hp = jax.lax.Precision.HIGHEST

    def conv(x, w, b):
        y = jax.lax.conv_general_dilated(x, w, (1, 1), "VALID",
                                         dimension_numbers=dn, precision=hp)
        return jnp.maximum(y + b[None, :, None, None], 0.0)

    def pool(x):
        return jax.lax.reduce_window(x, -jnp.inf, jax.lax.max,
                                     (1, 1, 2, 2), (1, 1, 2, 2), "VALID")

    x = pool(conv(x_nchw, params["conv1_w"], params["conv1_b"]))
    x = pool(conv(x, params["conv2_w"], params["conv2_b"]))
    x = x.reshape(x.shape[0], -1)
    x = jnp.maximum(jnp.matmul(x, params["fc1_w"].T, precision=hp) + params["fc1_b"], 0.0)
    x = jnp.maximum(jnp.matmul(x, params["fc2_w"].T, precision=hp) + params["fc2_b"], 0.0)
    return jnp.matmul(x, params["fc3_w"].T, precision=hp) + params["fc3_b"]


if __name__ == "__main__":
    key = jax.random.PRNGKey(0)
    pkey, xkey = jax.random.split(key)
    params = init_params(pkey, input_dim=16 * 5 * 5, hidden_dims=(120, 84), output_dim=10)

    # batch=2, 3x32x32 NCHW input: the conv/pool stack yields exactly the
    # 16*5*5 = 400 features that the module's view(-1, 16*5*5) assumes.
    x = jax.random.normal(xkey, (2, 3, 32, 32), jnp.float32)

    prep = preprocess_params(params)            # one-time static weight re-layout
    fwd = jax.jit(simple_cnn_forward)
    out = jax.block_until_ready(fwd(prep, x))
    assert out.shape == (2, 10) and out.dtype == jnp.float32

    ref = jax.block_until_ready(_reference_forward(params, x))
    assert jnp.allclose(out, ref, rtol=1e-2, atol=1e-2), "mismatch vs JAX reference"

    print("KERNEL_OK")
</pallas_src>

<mosaic_0001>
module attributes {stable_mosaic.version = 11 : i64} {
  func.func @_fused_cnn_kernel(%arg0: memref<64x96xf32, #tpu.memory_space<vmem>>, %arg1: memref<5x96x84xf32, #tpu.memory_space<vmem>>, %arg2: memref<5x96x84xf32, #tpu.memory_space<vmem>>, %arg3: memref<1x84xf32, #tpu.memory_space<vmem>>, %arg4: memref<56x60xf32, #tpu.memory_space<vmem>>, %arg5: memref<5x84x80xf32, #tpu.memory_space<vmem>>, %arg6: memref<5x84x80xf32, #tpu.memory_space<vmem>>, %arg7: memref<1x80xf32, #tpu.memory_space<vmem>>, %arg8: memref<20x24xf32, #tpu.memory_space<vmem>>, %arg9: memref<10x10xf32, #tpu.memory_space<vmem>>, %arg10: memref<5x80x120xf32, #tpu.memory_space<vmem>>, %arg11: memref<1x120xf32, #tpu.memory_space<vmem>>, %arg12: memref<120x84xf32, #tpu.memory_space<vmem>>, %arg13: memref<1x84xf32, #tpu.memory_space<vmem>>, %arg14: memref<84x10xf32, #tpu.memory_space<vmem>>, %arg15: memref<1x10xf32, #tpu.memory_space<vmem>>, %arg16: memref<2x10xf32, #tpu.memory_space<vmem>>) attributes {dimension_semantics = [], scalar_prefetch = 0 : i64, scratch_operands = 0 : i64, tpu.core_type = #tpu.core_type<tc>} {
    %c0 = arith.constant 0 : index
    %c0_0 = arith.constant 0 : index
    %0 = vector.load %arg0[%c0, %c0_0] : memref<64x96xf32, #tpu.memory_space<vmem>>, vector<64x96xf32>
    %c0_1 = arith.constant 0 : index
    %c0_2 = arith.constant 0 : index
    %c0_3 = arith.constant 0 : index
    %1 = vector.load %arg1[%c0_1, %c0_2, %c0_3] : memref<5x96x84xf32, #tpu.memory_space<vmem>>, vector<1x96x84xf32>
    %2 = vector.shape_cast %1 : vector<1x96x84xf32> to vector<96x84xf32>
    %cst = arith.constant dense<0.000000e+00> : vector<64x84xf32>
    %3 = tpu.matmul %0, %2, %cst {dimension_numbers = #tpu.dot_dimension_numbers<[1], [0], [0], [1], [0, 0, 1, 1], [], []>} : vector<64x96xf32>, vector<96x84xf32>, vector<64x84xf32> -> vector<64x84xf32>
    %c1 = arith.constant 1 : index
    %c0_4 = arith.constant 0 : index
    %c0_5 = arith.constant 0 : index
    %4 = vector.load %arg1[%c1, %c0_4, %c0_5] : memref<5x96x84xf32, #tpu.memory_space<vmem>>, vector<1x96x84xf32>
    %5 = vector.shape_cast %4 : vector<1x96x84xf32> to vector<96x84xf32>
    %cst_6 = arith.constant dense<0.000000e+00> : vector<64x84xf32>
    %6 = tpu.matmul %0, %5, %cst_6 {dimension_numbers = #tpu.dot_dimension_numbers<[1], [0], [0], [1], [0, 0, 1, 1], [], []>} : vector<64x96xf32>, vector<96x84xf32>, vector<64x84xf32> -> vector<64x84xf32>
    %c2 = arith.constant 2 : index
    %c0_7 = arith.constant 0 : index
    %c0_8 = arith.constant 0 : index
    %7 = vector.load %arg1[%c2, %c0_7, %c0_8] : memref<5x96x84xf32, #tpu.memory_space<vmem>>, vector<1x96x84xf32>
    %8 = vector.shape_cast %7 : vector<1x96x84xf32> to vector<96x84xf32>
    %cst_9 = arith.constant dense<0.000000e+00> : vector<64x84xf32>
    %9 = tpu.matmul %0, %8, %cst_9 {dimension_numbers = #tpu.dot_dimension_numbers<[1], [0], [0], [1], [0, 0, 1, 1], [], []>} : vector<64x96xf32>, vector<96x84xf32>, vector<64x84xf32> -> vector<64x84xf32>
    %c3 = arith.constant 3 : index
    %c0_10 = arith.constant 0 : index
    %c0_11 = arith.constant 0 : index
    %10 = vector.load %arg1[%c3, %c0_10, %c0_11] : memref<5x96x84xf32, #tpu.memory_space<vmem>>, vector<1x96x84xf32>
    %11 = vector.shape_cast %10 : vector<1x96x84xf32> to vector<96x84xf32>
    %cst_12 = arith.constant dense<0.000000e+00> : vector<64x84xf32>
    %12 = tpu.matmul %0, %11, %cst_12 {dimension_numbers = #tpu.dot_dimension_numbers<[1], [0], [0], [1], [0, 0, 1, 1], [], []>} : vector<64x96xf32>, vector<96x84xf32>, vector<64x84xf32> -> vector<64x84xf32>
    %c4 = arith.constant 4 : index
    %c0_13 = arith.constant 0 : index
    %c0_14 = arith.constant 0 : index
    %13 = vector.load %arg1[%c4, %c0_13, %c0_14] : memref<5x96x84xf32, #tpu.memory_space<vmem>>, vector<1x96x84xf32>
    %14 = vector.shape_cast %13 : vector<1x96x84xf32> to vector<96x84xf32>
    %cst_15 = arith.constant dense<0.000000e+00> : vector<64x84xf32>
    %15 = tpu.matmul %0, %14, %cst_15 {dimension_numbers = #tpu.dot_dimension_numbers<[1], [0], [0], [1], [0, 0, 1, 1], [], []>} : vector<64x96xf32>, vector<96x84xf32>, vector<64x84xf32> -> vector<64x84xf32>
    %c0_16 = arith.constant 0 : index
    %c0_17 = arith.constant 0 : index
    %c0_18 = arith.constant 0 : index
    %16 = vector.load %arg2[%c0_16, %c0_17, %c0_18] : memref<5x96x84xf32, #tpu.memory_space<vmem>>, vector<1x96x84xf32>
    %17 = vector.shape_cast %16 : vector<1x96x84xf32> to vector<96x84xf32>
    %cst_19 = arith.constant dense<0.000000e+00> : vector<64x84xf32>
    %18 = tpu.matmul %0, %17, %cst_19 {dimension_numbers = #tpu.dot_dimension_numbers<[1], [0], [0], [1], [0, 0, 1, 1], [], []>} : vector<64x96xf32>, vector<96x84xf32>, vector<64x84xf32> -> vector<64x84xf32>
    %c1_20 = arith.constant 1 : index
    %c0_21 = arith.constant 0 : index
    %c0_22 = arith.constant 0 : index
    %19 = vector.load %arg2[%c1_20, %c0_21, %c0_22] : memref<5x96x84xf32, #tpu.memory_space<vmem>>, vector<1x96x84xf32>
    %20 = vector.shape_cast %19 : vector<1x96x84xf32> to vector<96x84xf32>
    %cst_23 = arith.constant dense<0.000000e+00> : vector<64x84xf32>
    %21 = tpu.matmul %0, %20, %cst_23 {dimension_numbers = #tpu.dot_dimension_numbers<[1], [0], [0], [1], [0, 0, 1, 1], [], []>} : vector<64x96xf32>, vector<96x84xf32>, vector<64x84xf32> -> vector<64x84xf32>
    %c2_24 = arith.constant 2 : index
    %c0_25 = arith.constant 0 : index
    %c0_26 = arith.constant 0 : index
    %22 = vector.load %arg2[%c2_24, %c0_25, %c0_26] : memref<5x96x84xf32, #tpu.memory_space<vmem>>, vector<1x96x84xf32>
    %23 = vector.shape_cast %22 : vector<1x96x84xf32> to vector<96x84xf32>
    %cst_27 = arith.constant dense<0.000000e+00> : vector<64x84xf32>
    %24 = tpu.matmul %0, %23, %cst_27 {dimension_numbers = #tpu.dot_dimension_numbers<[1], [0], [0], [1], [0, 0, 1, 1], [], []>} : vector<64x96xf32>, vector<96x84xf32>, vector<64x84xf32> -> vector<64x84xf32>
    %c3_28 = arith.constant 3 : index
    %c0_29 = arith.constant 0 : index
    %c0_30 = arith.constant 0 : index
    %25 = vector.load %arg2[%c3_28, %c0_29, %c0_30] : memref<5x96x84xf32, #tpu.memory_space<vmem>>, vector<1x96x84xf32>
    %26 = vector.shape_cast %25 : vector<1x96x84xf32> to vector<96x84xf32>
    %cst_31 = arith.constant dense<0.000000e+00> : vector<64x84xf32>
    %27 = tpu.matmul %0, %26, %cst_31 {dimension_numbers = #tpu.dot_dimension_numbers<[1], [0], [0], [1], [0, 0, 1, 1], [], []>} : vector<64x96xf32>, vector<96x84xf32>, vector<64x84xf32> -> vector<64x84xf32>
    %c4_32 = arith.constant 4 : index
    %c0_33 = arith.constant 0 : index
    %c0_34 = arith.constant 0 : index
    %28 = vector.load %arg2[%c4_32, %c0_33, %c0_34] : memref<5x96x84xf32, #tpu.memory_space<vmem>>, vector<1x96x84xf32>
    %29 = vector.shape_cast %28 : vector<1x96x84xf32> to vector<96x84xf32>
    %cst_35 = arith.constant dense<0.000000e+00> : vector<64x84xf32>
    %30 = tpu.matmul %0, %29, %cst_35 {dimension_numbers = #tpu.dot_dimension_numbers<[1], [0], [0], [1], [0, 0, 1, 1], [], []>} : vector<64x96xf32>, vector<96x84xf32>, vector<64x84xf32> -> vector<64x84xf32>
    %31 = vector.extract_strided_slice %3 {offsets = [0, 0], sizes = [60, 84], strides = [1, 1]} : vector<64x84xf32> to vector<60x84xf32>
    %32 = vector.extract_strided_slice %18 {offsets = [0, 0], sizes = [60, 84], strides = [1, 1]} : vector<64x84xf32> to vector<60x84xf32>
    %33 = vector.extract_strided_slice %6 {offsets = [1, 0], sizes = [60, 84], strides = [1, 1]} : vector<64x84xf32> to vector<60x84xf32>
    %34 = arith.addf %31, %33 : vector<60x84xf32>
    %35 = vector.extract_strided_slice %21 {offsets = [1, 0], sizes = [60, 84], strides = [1, 1]} : vector<64x84xf32> to vector<60x84xf32>
    %36 = arith.addf %32, %35 : vector<60x84xf32>
    %37 = vector.extract_strided_slice %9 {offsets = [2, 0], sizes = [60, 84], strides = [1, 1]} : vector<64x84xf32> to vector<60x84xf32>
    %38 = arith.addf %34, %37 : vector<60x84xf32>
    %39 = vector.extract_strided_slice %24 {offsets = [2, 0], sizes = [60, 84], strides = [1, 1]} : vector<64x84xf32> to vector<60x84xf32>
    %40 = arith.addf %36, %39 : vector<60x84xf32>
    %41 = vector.extract_strided_slice %12 {offsets = [3, 0], sizes = [60, 84], strides = [1, 1]} : vector<64x84xf32> to vector<60x84xf32>
    %42 = arith.addf %38, %41 : vector<60x84xf32>
    %43 = vector.extract_strided_slice %27 {offsets = [3, 0], sizes = [60, 84], strides = [1, 1]} : vector<64x84xf32> to vector<60x84xf32>
    %44 = arith.addf %40, %43 : vector<60x84xf32>
    %45 = vector.extract_strided_slice %15 {offsets = [4, 0], sizes = [60, 84], strides = [1, 1]} : vector<64x84xf32> to vector<60x84xf32>
    %46 = arith.addf %42, %45 : vector<60x84xf32>
    %47 = vector.extract_strided_slice %30 {offsets = [4, 0], sizes = [60, 84], strides = [1, 1]} : vector<64x84xf32> to vector<60x84xf32>
    %48 = arith.addf %44, %47 : vector<60x84xf32>
    %c0_36 = arith.constant 0 : index
    %c0_37 = arith.constant 0 : index
    %49 = vector.load %arg3[%c0_36, %c0_37] : memref<1x84xf32, #tpu.memory_space<vmem>>, vector<1x84xf32>
    %50 = vector.broadcast %49 : vector<1x84xf32> to vector<60x84xf32>
    %51 = arith.addf %46, %50 : vector<60x84xf32>
    %cst_38 = arith.constant 0.000000e+00 : f32
    %52 = vector.broadcast %cst_38 : f32 to vector<60x84xf32>
    %53 = arith.maximumf %51, %52 : vector<60x84xf32>
    %54 = vector.broadcast %49 : vector<1x84xf32> to vector<60x84xf32>
    %55 = arith.addf %48, %54 : vector<60x84xf32>
    %cst_39 = arith.constant 0.000000e+00 : f32
    %56 = vector.broadcast %cst_39 : f32 to vector<60x84xf32>
    %57 = arith.maximumf %55, %56 : vector<60x84xf32>
    %58 = arith.maximumf %53, %57 : vector<60x84xf32>
    %c0_40 = arith.constant 0 : index
    %c0_41 = arith.constant 0 : index
    %59 = vector.load %arg4[%c0_40, %c0_41] : memref<56x60xf32, #tpu.memory_space<vmem>>, vector<56x60xf32>
    %cst_42 = arith.constant dense<0.000000e+00> : vector<56x84xf32>
    %60 = tpu.matmul %59, %58, %cst_42 {dimension_numbers = #tpu.dot_dimension_numbers<[1], [0], [0], [1], [0, 0, 1, 1], [], []>} : vector<56x60xf32>, vector<60x84xf32>, vector<56x84xf32> -> vector<56x84xf32>
    %61 = vector.extract_strided_slice %60 {offsets = [0, 0], sizes = [28, 84], strides = [1, 1]} : vector<56x84xf32> to vector<28x84xf32>
    %62 = vector.extract_strided_slice %60 {offsets = [28, 0], sizes = [28, 84], strides = [1, 1]} : vector<56x84xf32> to vector<28x84xf32>
    %63 = arith.maximumf %61, %62 : vector<28x84xf32>
    %c0_43 = arith.constant 0 : index
    %c0_44 = arith.constant 0 : index
    %c0_45 = arith.constant 0 : index
    %64 = vector.load %arg5[%c0_43, %c0_44, %c0_45] : memref<5x84x80xf32, #tpu.memory_space<vmem>>, vector<1x84x80xf32>
    %65 = vector.shape_cast %64 : vector<1x84x80xf32> to vector<84x80xf32>
    %cst_46 = arith.constant dense<0.000000e+00> : vector<28x80xf32>
    %66 = tpu.matmul %63, %65, %cst_46 {dimension_numbers = #tpu.dot_dimension_numbers<[1], [0], [0], [1], [0, 0, 1, 1], [], []>} : vector<28x84xf32>, vector<84x80xf32>, vector<28x80xf32> -> vector<28x80xf32>
    %c1_47 = arith.constant 1 : index
    %c0_48 = arith.constant 0 : index
    %c0_49 = arith.constant 0 : index
    %67 = vector.load %arg5[%c1_47, %c0_48, %c0_49] : memref<5x84x80xf32, #tpu.memory_space<vmem>>, vector<1x84x80xf32>
    %68 = vector.shape_cast %67 : vector<1x84x80xf32> to vector<84x80xf32>
    %cst_50 = arith.constant dense<0.000000e+00> : vector<28x80xf32>
    %69 = tpu.matmul %63, %68, %cst_50 {dimension_numbers = #tpu.dot_dimension_numbers<[1], [0], [0], [1], [0, 0, 1, 1], [], []>} : vector<28x84xf32>, vector<84x80xf32>, vector<28x80xf32> -> vector<28x80xf32>
    %c2_51 = arith.constant 2 : index
    %c0_52 = arith.constant 0 : index
    %c0_53 = arith.constant 0 : index
    %70 = vector.load %arg5[%c2_51, %c0_52, %c0_53] : memref<5x84x80xf32, #tpu.memory_space<vmem>>, vector<1x84x80xf32>
    %71 = vector.shape_cast %70 : vector<1x84x80xf32> to vector<84x80xf32>
    %cst_54 = arith.constant dense<0.000000e+00> : vector<28x80xf32>
    %72 = tpu.matmul %63, %71, %cst_54 {dimension_numbers = #tpu.dot_dimension_numbers<[1], [0], [0], [1], [0, 0, 1, 1], [], []>} : vector<28x84xf32>, vector<84x80xf32>, vector<28x80xf32> -> vector<28x80xf32>
    %c3_55 = arith.constant 3 : index
    %c0_56 = arith.constant 0 : index
    %c0_57 = arith.constant 0 : index
    %73 = vector.load %arg5[%c3_55, %c0_56, %c0_57] : memref<5x84x80xf32, #tpu.memory_space<vmem>>, vector<1x84x80xf32>
    %74 = vector.shape_cast %73 : vector<1x84x80xf32> to vector<84x80xf32>
    %cst_58 = arith.constant dense<0.000000e+00> : vector<28x80xf32>
    %75 = tpu.matmul %63, %74, %cst_58 {dimension_numbers = #tpu.dot_dimension_numbers<[1], [0], [0], [1], [0, 0, 1, 1], [], []>} : vector<28x84xf32>, vector<84x80xf32>, vector<28x80xf32> -> vector<28x80xf32>
    %c4_59 = arith.constant 4 : index
    %c0_60 = arith.constant 0 : index
    %c0_61 = arith.constant 0 : index
    %76 = vector.load %arg5[%c4_59, %c0_60, %c0_61] : memref<5x84x80xf32, #tpu.memory_space<vmem>>, vector<1x84x80xf32>
    %77 = vector.shape_cast %76 : vector<1x84x80xf32> to vector<84x80xf32>
    %cst_62 = arith.constant dense<0.000000e+00> : vector<28x80xf32>
    %78 = tpu.matmul %63, %77, %cst_62 {dimension_numbers = #tpu.dot_dimension_numbers<[1], [0], [0], [1], [0, 0, 1, 1], [], []>} : vector<28x84xf32>, vector<84x80xf32>, vector<28x80xf32> -> vector<28x80xf32>
    %c0_63 = arith.constant 0 : index
    %c0_64 = arith.constant 0 : index
    %c0_65 = arith.constant 0 : index
    %79 = vector.load %arg6[%c0_63, %c0_64, %c0_65] : memref<5x84x80xf32, #tpu.memory_space<vmem>>, vector<1x84x80xf32>
    %80 = vector.shape_cast %79 : vector<1x84x80xf32> to vector<84x80xf32>
    %cst_66 = arith.constant dense<0.000000e+00> : vector<28x80xf32>
    %81 = tpu.matmul %63, %80, %cst_66 {dimension_numbers = #tpu.dot_dimension_numbers<[1], [0], [0], [1], [0, 0, 1, 1], [], []>} : vector<28x84xf32>, vector<84x80xf32>, vector<28x80xf32> -> vector<28x80xf32>
    %c1_67 = arith.constant 1 : index
    %c0_68 = arith.constant 0 : index
    %c0_69 = arith.constant 0 : index
    %82 = vector.load %arg6[%c1_67, %c0_68, %c0_69] : memref<5x84x80xf32, #tpu.memory_space<vmem>>, vector<1x84x80xf32>
    %83 = vector.shape_cast %82 : vector<1x84x80xf32> to vector<84x80xf32>
    %cst_70 = arith.constant dense<0.000000e+00> : vector<28x80xf32>
    %84 = tpu.matmul %63, %83, %cst_70 {dimension_numbers = #tpu.dot_dimension_numbers<[1], [0], [0], [1], [0, 0, 1, 1], [], []>} : vector<28x84xf32>, vector<84x80xf32>, vector<28x80xf32> -> vector<28x80xf32>
    %c2_71 = arith.constant 2 : index
    %c0_72 = arith.constant 0 : index
    %c0_73 = arith.constant 0 : index
    %85 = vector.load %arg6[%c2_71, %c0_72, %c0_73] : memref<5x84x80xf32, #tpu.memory_space<vmem>>, vector<1x84x80xf32>
    %86 = vector.shape_cast %85 : vector<1x84x80xf32> to vector<84x80xf32>
    %cst_74 = arith.constant dense<0.000000e+00> : vector<28x80xf32>
    %87 = tpu.matmul %63, %86, %cst_74 {dimension_numbers = #tpu.dot_dimension_numbers<[1], [0], [0], [1], [0, 0, 1, 1], [], []>} : vector<28x84xf32>, vector<84x80xf32>, vector<28x80xf32> -> vector<28x80xf32>
    %c3_75 = arith.constant 3 : index
    %c0_76 = arith.constant 0 : index
    %c0_77 = arith.constant 0 : index
    %88 = vector.load %arg6[%c3_75, %c0_76, %c0_77] : memref<5x84x80xf32, #tpu.memory_space<vmem>>, vector<1x84x80xf32>
    %89 = vector.shape_cast %88 : vector<1x84x80xf32> to vector<84x80xf32>
    %cst_78 = arith.constant dense<0.000000e+00> : vector<28x80xf32>
    %90 = tpu.matmul %63, %89, %cst_78 {dimension_numbers = #tpu.dot_dimension_numbers<[1], [0], [0], [1], [0, 0, 1, 1], [], []>} : vector<28x84xf32>, vector<84x80xf32>, vector<28x80xf32> -> vector<28x80xf32>
    %c4_79 = arith.constant 4 : index
    %c0_80 = arith.constant 0 : index
    %c0_81 = arith.constant 0 : index
    %91 = vector.load %arg6[%c4_79, %c0_80, %c0_81] : memref<5x84x80xf32, #tpu.memory_space<vmem>>, vector<1x84x80xf32>
    %92 = vector.shape_cast %91 : vector<1x84x80xf32> to vector<84x80xf32>
    %cst_82 = arith.constant dense<0.000000e+00> : vector<28x80xf32>
    %93 = tpu.matmul %63, %92, %cst_82 {dimension_numbers = #tpu.dot_dimension_numbers<[1], [0], [0], [1], [0, 0, 1, 1], [], []>} : vector<28x84xf32>, vector<84x80xf32>, vector<28x80xf32> -> vector<28x80xf32>
    %94 = vector.extract_strided_slice %66 {offsets = [0, 0], sizes = [24, 80], strides = [1, 1]} : vector<28x80xf32> to vector<24x80xf32>
    %95 = vector.extract_strided_slice %81 {offsets = [0, 0], sizes = [24, 80], strides = [1, 1]} : vector<28x80xf32> to vector<24x80xf32>
    %96 = vector.extract_strided_slice %69 {offsets = [1, 0], sizes = [24, 80], strides = [1, 1]} : vector<28x80xf32> to vector<24x80xf32>
    %97 = arith.addf %94, %96 : vector<24x80xf32>
    %98 = vector.extract_strided_slice %84 {offsets = [1, 0], sizes = [24, 80], strides = [1, 1]} : vector<28x80xf32> to vector<24x80xf32>
    %99 = arith.addf %95, %98 : vector<24x80xf32>
    %100 = vector.extract_strided_slice %72 {offsets = [2, 0], sizes = [24, 80], strides = [1, 1]} : vector<28x80xf32> to vector<24x80xf32>
    %101 = arith.addf %97, %100 : vector<24x80xf32>
    %102 = vector.extract_strided_slice %87 {offsets = [2, 0], sizes = [24, 80], strides = [1, 1]} : vector<28x80xf32> to vector<24x80xf32>
    %103 = arith.addf %99, %102 : vector<24x80xf32>
    %104 = vector.extract_strided_slice %75 {offsets = [3, 0], sizes = [24, 80], strides = [1, 1]} : vector<28x80xf32> to vector<24x80xf32>
    %105 = arith.addf %101, %104 : vector<24x80xf32>
    %106 = vector.extract_strided_slice %90 {offsets = [3, 0], sizes = [24, 80], strides = [1, 1]} : vector<28x80xf32> to vector<24x80xf32>
    %107 = arith.addf %103, %106 : vector<24x80xf32>
    %108 = vector.extract_strided_slice %78 {offsets = [4, 0], sizes = [24, 80], strides = [1, 1]} : vector<28x80xf32> to vector<24x80xf32>
    %109 = arith.addf %105, %108 : vector<24x80xf32>
    %110 = vector.extract_strided_slice %93 {offsets = [4, 0], sizes = [24, 80], strides = [1, 1]} : vector<28x80xf32> to vector<24x80xf32>
    %111 = arith.addf %107, %110 : vector<24x80xf32>
    %c0_83 = arith.constant 0 : index
    %c0_84 = arith.constant 0 : index
    %112 = vector.load %arg7[%c0_83, %c0_84] : memref<1x80xf32, #tpu.memory_space<vmem>>, vector<1x80xf32>
    %113 = vector.broadcast %112 : vector<1x80xf32> to vector<24x80xf32>
    %114 = arith.addf %109, %113 : vector<24x80xf32>
    %cst_85 = arith.constant 0.000000e+00 : f32
    %115 = vector.broadcast %cst_85 : f32 to vector<24x80xf32>
    %116 = arith.maximumf %114, %115 : vector<24x80xf32>
    %117 = vector.broadcast %112 : vector<1x80xf32> to vector<24x80xf32>
    %118 = arith.addf %111, %117 : vector<24x80xf32>
    %cst_86 = arith.constant 0.000000e+00 : f32
    %119 = vector.broadcast %cst_86 : f32 to vector<24x80xf32>
    %120 = arith.maximumf %118, %119 : vector<24x80xf32>
    %121 = arith.maximumf %116, %120 : vector<24x80xf32>
    %c0_87 = arith.constant 0 : index
    %c0_88 = arith.constant 0 : index
    %122 = vector.load %arg8[%c0_87, %c0_88] : memref<20x24xf32, #tpu.memory_space<vmem>>, vector<20x24xf32>
    %cst_89 = arith.constant dense<0.000000e+00> : vector<20x80xf32>
    %123 = tpu.matmul %122, %121, %cst_89 {dimension_numbers = #tpu.dot_dimension_numbers<[1], [0], [0], [1], [0, 0, 1, 1], [], []>} : vector<20x24xf32>, vector<24x80xf32>, vector<20x80xf32> -> vector<20x80xf32>
    %124 = vector.extract_strided_slice %123 {offsets = [0, 0], sizes = [10, 80], strides = [1, 1]} : vector<20x80xf32> to vector<10x80xf32>
    %125 = vector.extract_strided_slice %123 {offsets = [10, 0], sizes = [10, 80], strides = [1, 1]} : vector<20x80xf32> to vector<10x80xf32>
    %126 = arith.maximumf %124, %125 : vector<10x80xf32>
    %c0_90 = arith.constant 0 : index
    %c0_91 = arith.constant 0 : index
    %127 = vector.load %arg9[%c0_90, %c0_91] : memref<10x10xf32, #tpu.memory_space<vmem>>, vector<10x10xf32>
    %cst_92 = arith.constant dense<0.000000e+00> : vector<10x80xf32>
    %128 = tpu.matmul %127, %126, %cst_92 {dimension_numbers = #tpu.dot_dimension_numbers<[1], [0], [0], [1], [0, 0, 1, 1], [], []>} : vector<10x10xf32>, vector<10x80xf32>, vector<10x80xf32> -> vector<10x80xf32>
    %129 = vector.extract_strided_slice %128 {offsets = [0, 0], sizes = [2, 80], strides = [1, 1]} : vector<10x80xf32> to vector<2x80xf32>
    %c0_93 = arith.constant 0 : index
    %c0_94 = arith.constant 0 : index
    %c0_95 = arith.constant 0 : index
    %130 = vector.load %arg10[%c0_93, %c0_94, %c0_95] : memref<5x80x120xf32, #tpu.memory_space<vmem>>, vector<1x80x120xf32>
    %131 = vector.shape_cast %130 : vector<1x80x120xf32> to vector<80x120xf32>
    %cst_96 = arith.constant dense<0.000000e+00> : vector<2x120xf32>
    %132 = tpu.matmul %129, %131, %cst_96 {dimension_numbers = #tpu.dot_dimension_numbers<[1], [0], [0], [1], [0, 0, 1, 1], [], []>} : vector<2x80xf32>, vector<80x120xf32>, vector<2x120xf32> -> vector<2x120xf32>
    %133 = vector.extract_strided_slice %128 {offsets = [2, 0], sizes = [2, 80], strides = [1, 1]} : vector<10x80xf32> to vector<2x80xf32>
    %c1_97 = arith.constant 1 : index
    %c0_98 = arith.constant 0 : index
    %c0_99 = arith.constant 0 : index
    %134 = vector.load %arg10[%c1_97, %c0_98, %c0_99] : memref<5x80x120xf32, #tpu.memory_space<vmem>>, vector<1x80x120xf32>
    %135 = vector.shape_cast %134 : vector<1x80x120xf32> to vector<80x120xf32>
    %cst_100 = arith.constant dense<0.000000e+00> : vector<2x120xf32>
    %136 = tpu.matmul %133, %135, %cst_100 {dimension_numbers = #tpu.dot_dimension_numbers<[1], [0], [0], [1], [0, 0, 1, 1], [], []>} : vector<2x80xf32>, vector<80x120xf32>, vector<2x120xf32> -> vector<2x120xf32>
    %137 = arith.addf %132, %136 : vector<2x120xf32>
    %138 = vector.extract_strided_slice %128 {offsets = [4, 0], sizes = [2, 80], strides = [1, 1]} : vector<10x80xf32> to vector<2x80xf32>
    %c2_101 = arith.constant 2 : index
    %c0_102 = arith.constant 0 : index
    %c0_103 = arith.constant 0 : index
    %139 = vector.load %arg10[%c2_101, %c0_102, %c0_103] : memref<5x80x120xf32, #tpu.memory_space<vmem>>, vector<1x80x120xf32>
    %140 = vector.shape_cast %139 : vector<1x80x120xf32> to vector<80x120xf32>
    %cst_104 = arith.constant dense<0.000000e+00> : vector<2x120xf32>
    %141 = tpu.matmul %138, %140, %cst_104 {dimension_numbers = #tpu.dot_dimension_numbers<[1], [0], [0], [1], [0, 0, 1, 1], [], []>} : vector<2x80xf32>, vector<80x120xf32>, vector<2x120xf32> -> vector<2x120xf32>
    %142 = arith.addf %137, %141 : vector<2x120xf32>
    %143 = vector.extract_strided_slice %128 {offsets = [6, 0], sizes = [2, 80], strides = [1, 1]} : vector<10x80xf32> to vector<2x80xf32>
    %c3_105 = arith.constant 3 : index
    %c0_106 = arith.constant 0 : index
    %c0_107 = arith.constant 0 : index
    %144 = vector.load %arg10[%c3_105, %c0_106, %c0_107] : memref<5x80x120xf32, #tpu.memory_space<vmem>>, vector<1x80x120xf32>
    %145 = vector.shape_cast %144 : vector<1x80x120xf32> to vector<80x120xf32>
    %cst_108 = arith.constant dense<0.000000e+00> : vector<2x120xf32>
    %146 = tpu.matmul %143, %145, %cst_108 {dimension_numbers = #tpu.dot_dimension_numbers<[1], [0], [0], [1], [0, 0, 1, 1], [], []>} : vector<2x80xf32>, vector<80x120xf32>, vector<2x120xf32> -> vector<2x120xf32>
    %147 = arith.addf %142, %146 : vector<2x120xf32>
    %148 = vector.extract_strided_slice %128 {offsets = [8, 0], sizes = [2, 80], strides = [1, 1]} : vector<10x80xf32> to vector<2x80xf32>
    %c4_109 = arith.constant 4 : index
    %c0_110 = arith.constant 0 : index
    %c0_111 = arith.constant 0 : index
    %149 = vector.load %arg10[%c4_109, %c0_110, %c0_111] : memref<5x80x120xf32, #tpu.memory_space<vmem>>, vector<1x80x120xf32>
    %150 = vector.shape_cast %149 : vector<1x80x120xf32> to vector<80x120xf32>
    %cst_112 = arith.constant dense<0.000000e+00> : vector<2x120xf32>
    %151 = tpu.matmul %148, %150, %cst_112 {dimension_numbers = #tpu.dot_dimension_numbers<[1], [0], [0], [1], [0, 0, 1, 1], [], []>} : vector<2x80xf32>, vector<80x120xf32>, vector<2x120xf32> -> vector<2x120xf32>
    %152 = arith.addf %147, %151 : vector<2x120xf32>
    %c0_113 = arith.constant 0 : index
    %c0_114 = arith.constant 0 : index
    %153 = vector.load %arg11[%c0_113, %c0_114] : memref<1x120xf32, #tpu.memory_space<vmem>>, vector<1x120xf32>
    %154 = vector.broadcast %153 : vector<1x120xf32> to vector<2x120xf32>
    %155 = arith.addf %152, %154 : vector<2x120xf32>
    %cst_115 = arith.constant 0.000000e+00 : f32
    %156 = vector.broadcast %cst_115 : f32 to vector<2x120xf32>
    %157 = arith.maximumf %155, %156 : vector<2x120xf32>
    %c0_116 = arith.constant 0 : index
    %c0_117 = arith.constant 0 : index
    %158 = vector.load %arg12[%c0_116, %c0_117] : memref<120x84xf32, #tpu.memory_space<vmem>>, vector<120x84xf32>
    %cst_118 = arith.constant dense<0.000000e+00> : vector<2x84xf32>
    %159 = tpu.matmul %157, %158, %cst_118 {dimension_numbers = #tpu.dot_dimension_numbers<[1], [0], [0], [1], [0, 0, 1, 1], [], []>} : vector<2x120xf32>, vector<120x84xf32>, vector<2x84xf32> -> vector<2x84xf32>
    %c0_119 = arith.constant 0 : index
    %c0_120 = arith.constant 0 : index
    %160 = vector.load %arg13[%c0_119, %c0_120] : memref<1x84xf32, #tpu.memory_space<vmem>>, vector<1x84xf32>
    %161 = vector.broadcast %160 : vector<1x84xf32> to vector<2x84xf32>
    %162 = arith.addf %159, %161 : vector<2x84xf32>
    %cst_121 = arith.constant 0.000000e+00 : f32
    %163 = vector.broadcast %cst_121 : f32 to vector<2x84xf32>
    %164 = arith.maximumf %162, %163 : vector<2x84xf32>
    %c0_122 = arith.constant 0 : index
    %c0_123 = arith.constant 0 : index
    %165 = vector.load %arg14[%c0_122, %c0_123] : memref<84x10xf32, #tpu.memory_space<vmem>>, vector<84x10xf32>
    %cst_124 = arith.constant dense<0.000000e+00> : vector<2x10xf32>
    %166 = tpu.matmul %164, %165, %cst_124 {dimension_numbers = #tpu.dot_dimension_numbers<[1], [0], [0], [1], [0, 0, 1, 1], [], []>} : vector<2x84xf32>, vector<84x10xf32>, vector<2x10xf32> -> vector<2x10xf32>
    %c0_125 = arith.constant 0 : index
    %c0_126 = arith.constant 0 : index
    %167 = vector.load %arg15[%c0_125, %c0_126] : memref<1x10xf32, #tpu.memory_space<vmem>>, vector<1x10xf32>
    %168 = vector.broadcast %167 : vector<1x10xf32> to vector<2x10xf32>
    %169 = arith.addf %166, %168 : vector<2x10xf32>
    %c0_127 = arith.constant 0 : index
    %c0_128 = arith.constant 0 : index
    %170 = vector.load %arg16[%c0_127, %c0_128] : memref<2x10xf32, #tpu.memory_space<vmem>>, vector<2x10xf32>
    tpu.vector_store %arg16[%c0_127, %c0_128], %169 {strides = array<i32>} : memref<2x10xf32, #tpu.memory_space<vmem>>, vector<2x10xf32>,
    return
  }
}

</mosaic_0001>

<bundles_post_ra>
// kernel: simple_cnn_forward.1
= control target key start
LH: loop header
LB: loop body
LE: loop exit
PB: predicated region body
PF: predicated region fallthrough
CT: control target
= control target key end

     0   :  { %s7321_s0 = inlined_call_operand.vmem [shape: f32[64,96], index: 0, kind: input, shape index: {}]   ;;  %s7322_s1 = inlined_call_operand.vmem [shape: f32[5,96,84], index: 1, kind: input, shape index: {}]   ;;  %s7323_s2 = inlined_call_operand.vmem [shape: f32[5,96,84], index: 2, kind: input, shape index: {}]   ;;  %s7324_s3 = inlined_call_operand.vmem [shape: f32[1,84], index: 3, kind: input, shape index: {}]   ;;  %s7325_s4 = inlined_call_operand.vmem [shape: f32[56,60], index: 4, kind: input, shape index: {}]   ;;  %s7326_s5 = inlined_call_operand.vmem [shape: f32[5,84,80], index: 5, kind: input, shape index: {}]   ;;  %s7327_s6 = inlined_call_operand.vmem [shape: f32[5,84,80], index: 6, kind: input, shape index: {}]   ;;  %s7328_s7 = inlined_call_operand.vmem [shape: f32[1,80], index: 7, kind: input, shape index: {}]   ;;  %s7329_s8 = inlined_call_operand.vmem [shape: f32[20,24], index: 8, kind: input, shape index: {}]   ;;  %s7330_s9 = inlined_call_operand.vmem [shape: f32[10,10], index: 9, kind: input, shape index: {}]   ;;  %s7331_s10 = inlined_call_operand.vmem [shape: f32[5,80,120], index: 10, kind: input, shape index: {}]   ;;  %s7332_s11 = inlined_call_operand.vmem [shape: f32[1,120], index: 11, kind: input, shape index: {}]   ;;  %s7333_s12 = inlined_call_operand.vmem [shape: f32[120,84], index: 12, kind: input, shape index: {}]   ;;  %s7334_s13 = inlined_call_operand.vmem [shape: f32[1,84], index: 13, kind: input, shape index: {}]   ;;  %s7335_s14 = inlined_call_operand.vmem [shape: f32[84,10], index: 14, kind: input, shape index: {}]   ;;  %s7336_s15 = inlined_call_operand.vmem [shape: f32[1,10], index: 15, kind: input, shape index: {}]   ;;  %s7337_s16 = inlined_call_operand.hbm [shape: f32[2,10], index: 16, kind: output, shape index: {}]  }
   0x1   :  { %7339 = sst [smem:[#allocation5_spill]] %s7321_s0 }
   0x2   :  { %v73_v0 = vld [vmem:[%s7322_s1 + $0x58] sm:$0xff]  ;;  %v72_v2 = vld [vmem:[%s7322_s1 + $0x50] sm:$0xff]  ;;  %v71_v4 = vld [vmem:[%s7322_s1 + $0x48] sm:$0xff]  ;;  %s7340_s26 = sld [smem:[#allocation5_spill]]  ;;  %vm74_vm0 = vcmask 785408  }
   0x3   :  { %v3794_v1 = vld [vmem:[%s7322_s1 + $0xb8] sm:$0xff]  ;;  %4614 = vmatprep.subr.mxu0 %v73_v0  ;;  %v3793_v3 = vld [vmem:[%s7322_s1 + $0xb0] sm:$0xff]  ;;  %v3792_v5 = vld [vmem:[%s7322_s1 + $0xa8] sm:$0xff] }
   0x4   :  { %4650 = vmatprep.subr.mxu1 %v3794_v1  ;;  %4615 = vmatpush3.msra.mxu0 %v73_v0  ;;  %v70_v6 = vld [vmem:[%s7322_s1 + $0x40] sm:$0xff]  ;;  %v69_v8 = vld [vmem:[%s7322_s1 + $0x38] sm:$0xff]  ;;  %v68_v10 = vld [vmem:[%s7322_s1 + $0x30] sm:$0xff] }
   0x5   :  { %4651 = vmatpush3.msra.mxu1 %v3794_v1  ;;  %4616 = vmatprep.subr.mxu0 %v72_v2  ;;  %v3791_v7 = vld [vmem:[%s7322_s1 + $0xa0] sm:$0xff]  ;;  %v3790_v9 = vld [vmem:[%s7322_s1 + $0x98] sm:$0xff]  ;;  %v3789_v11 = vld [vmem:[%s7322_s1 + $0x90] sm:$0xff] }
   0x6   :  { %4652 = vmatprep.subr.mxu1 %v3793_v3  ;;  %4617 = vmatpush3.msra.mxu0 %v72_v2  ;;  %v67_v12 = vld [vmem:[%s7322_s1 + $0x28] sm:$0xff]  ;;  %v66_v14 = vld [vmem:[%s7322_s1 + $0x20] sm:$0xff]  ;;  %v65_v16 = vld [vmem:[%s7322_s1 + $0x18] sm:$0xff] }
   0x7   :  { %4653 = vmatpush3.msra.mxu1 %v3793_v3  ;;  %4618 = vmatprep.subr.mxu0 %v71_v4  ;;  %v3788_v13 = vld [vmem:[%s7322_s1 + $0x88] sm:$0xff]  ;;  %v3787_v15 = vld [vmem:[%s7322_s1 + $0x80] sm:$0xff]  ;;  %v3786_v17 = vld [vmem:[%s7322_s1 + $0x78] sm:$0xff] }
   0x8   :  { %4654 = vmatprep.subr.mxu1 %v3792_v5  ;;  %4619 = vmatpush3.msra.mxu0 %v71_v4  ;;  %v64_v18 = vld [vmem:[%s7322_s1 + $0x10] sm:$0xff]  ;;  %v63_v20 = vld [vmem:[%s7322_s1 + $0x8] sm:$0xff]  ;;  %v62_v22 = vld [vmem:[%s7322_s1] sm:$0xff] }
   0x9   :  { %4655 = vmatpush3.msra.mxu1 %v3792_v5  ;;  %4620 = vmatprep.subr.mxu0 %v70_v6  ;;  %v3785_v19 = vld [vmem:[%s7322_s1 + $0x70] sm:$0xff]  ;;  %v3784_v21 = vld [vmem:[%s7322_s1 + $0x68] sm:$0xff]  ;;  %v3783_v23 = vld [vmem:[%s7322_s1 + $0x60] sm:$0xff] }
   0xa   :  { %4656 = vmatprep.subr.mxu1 %v3791_v7  ;;  %4621 = vmatpush3.msra.mxu0 %v70_v6  ;;  %v5674_v24 = vld [vmem:[%s7340_s26] sm:$0xff]  ;;  %v5679_v25 = vld [vmem:[%s7340_s26 + $0x8] sm:$0xff]  ;;  %v3814_v26 = vld [vmem:[%s7322_s1 + $0x118] sm:$0xff] }
   0xb   :  { %4657 = vmatpush3.msra.mxu1 %v3791_v7  ;;  %4622 = vmatprep.subr.mxu0 %v69_v8  ;;  %v3834_v27 = vld [vmem:[%s7322_s1 + $0x178] sm:$0xff]  ;;  %v3813_v28 = vld [vmem:[%s7322_s1 + $0x110] sm:$0xff]  ;;  %v3812_v31 = vld [vmem:[%s7322_s1 + $0x108] sm:$0xff] }
   0xc   :  { %4658 = vmatprep.subr.mxu1 %v3790_v9  ;;  %4623 = vmatpush3.msra.mxu0 %v69_v8  ;;  %v3833_v29 = vld [vmem:[%s7322_s1 + $0x170] sm:$0xff]  ;;  %v5712_v32 = vld [vmem:[%s7340_s26 + $0x18] sm:$0xff]  ;;  %v3832_v33 = vld [vmem:[%s7322_s1 + $0x168] sm:$0xff] }
   0xd   :  { %4659 = vmatpush3.msra.mxu1 %v3790_v9  ;;  %4624 = vmatprep.subr.mxu0 %v68_v10  ;;  %v5704_v30 = vld [vmem:[%s7340_s26 + $0x10] sm:$0xff]  ;;  %v3811_v34 = vld [vmem:[%s7322_s1 + $0x100] sm:$0xff]  ;;  %v3810_v37 = vld [vmem:[%s7322_s1 + $0xf8] sm:$0xff] }
   0xe   :  { %4660 = vmatprep.subr.mxu1 %v3789_v11  ;;  %4625 = vmatpush3.msra.mxu0 %v68_v10  ;;  %v3831_v35 = vld [vmem:[%s7322_s1 + $0x160] sm:$0xff]  ;;  %v5738_v38 = vld [vmem:[%s7340_s26 + $0x28] sm:$0xff]  ;;  %v3830_v39 = vld [vmem:[%s7322_s1 + $0x158] sm:$0xff] }
   0xf   :  { %4661 = vmatpush3.msra.mxu1 %v3789_v11  ;;  %4626 = vmatprep.subr.mxu0 %v67_v12  ;;  %v5730_v36 = vld [vmem:[%s7340_s26 + $0x20] sm:$0xff]  ;;  %v3809_v40 = vld [vmem:[%s7322_s1 + $0xf0] sm:$0xff]  ;;  %v3808_v43 = vld [vmem:[%s7322_s1 + $0xe8] sm:$0xff] }
  0x10   :  { %4662 = vmatprep.subr.mxu1 %v3788_v13  ;;  %4627 = vmatpush3.msra.mxu0 %v67_v12  ;;  %v3829_v41 = vld [vmem:[%s7322_s1 + $0x150] sm:$0xff]  ;;  %v5768_v44 = vld [vmem:[%s7340_s26 + $0x38] sm:$0xff]  ;;  %v3828_v45 = vld [vmem:[%s7322_s1 + $0x148] sm:$0xff] }
  0x11   :  { %4663 = vmatpush3.msra.mxu1 %v3788_v13  ;;  %4628 = vmatprep.subr.mxu0 %v66_v14  ;;  %v5756_v42 = vld [vmem:[%s7340_s26 + $0x30] sm:$0xff]  ;;  %v3807_v46 = vld [vmem:[%s7322_s1 + $0xe0] sm:$0xff] }
  0x12   :  { %4664 = vmatprep.subr.mxu1 %v3787_v15  ;;  %4629 = vmatpush3.msra.mxu0 %v66_v14 }
  0x13   :  { %4665 = vmatpush3.msra.mxu1 %v3787_v15  ;;  %4630 = vmatprep.subr.mxu0 %v65_v16 }
  0x14   :  { %4666 = vmatprep.subr.mxu1 %v3786_v17  ;;  %4631 = vmatpush3.msra.mxu0 %v65_v16 }
  0x15   :  { %4667 = vmatpush3.msra.mxu1 %v3786_v17  ;;  %4632 = vmatprep.subr.mxu0 %v64_v18 }
  0x16   :  { %4668 = vmatprep.subr.mxu1 %v3785_v19  ;;  %4633 = vmatpush3.msra.mxu0 %v64_v18 }
  0x17   :  { %4669 = vmatpush3.msra.mxu1 %v3785_v19  ;;  %4634 = vmatprep.subr.mxu0 %v63_v20 }
  0x18   :  { %4670 = vmatprep.subr.mxu1 %v3784_v21  ;;  %4635 = vmatpush3.msra.mxu0 %v63_v20 }
  0x19   :  { %4671 = vmatpush3.msra.mxu1 %v3784_v21  ;;  %4636 = vmatprep.subr.mxu0 %v62_v22 }
  0x1a   :  { %4672 = vmatprep.subr.mxu1 %v3783_v23  ;;  %4637 = vmatpush3.msra.mxu0 %v62_v22 }
  0x1b   :  { %4638 = vmatprep.mubr.msk.f32.mxu0 %vm74_vm0, %v5674_v24  ;;  %4673 = vmatpush3.msra.mxu1 %v3783_v23 }
  0x1c   :  { %4674 = vmatprep.mubr.msk.f32.mxu1 %vm74_vm0, %v5674_v24  ;;  %4639 = vmatmul.mubr.msk.f32.vlgmr.msra.gmra.mxu0 %vm74_vm0, %v5679_v25 }
  0x1d   :  { %4675 = vmatmul.mubr.msk.f32.vlgmr.msra.gmra.mxu1 %vm74_vm0, %v5679_v25  ;;  %4686 = vmatprep.subr.mxu0 %v3814_v26 }
  0x1e   :  { %4722 = vmatprep.subr.mxu1 %v3834_v27  ;;  %4687 = vmatpush3.msra.mxu0 %v3814_v26 }
  0x1f   :  { %4723 = vmatpush3.msra.mxu1 %v3834_v27  ;;  %4688 = vmatprep.subr.mxu0 %v3813_v28 }
  0x20   :  { %4724 = vmatprep.subr.mxu1 %v3833_v29  ;;  %4677 = vmatprep.mubr.msk.f32.mxu1 %vm74_vm0, %v5704_v30 }
  0x21   :  { %4689 = vmatpush3.msra.mxu0 %v3813_v28  ;;  %4725 = vmatpush3.msra.mxu1 %v3833_v29 }
  0x22   :  { %4690 = vmatprep.subr.mxu0 %v3812_v31  ;;  %4678 = vmatmul.mubr.msk.f32.gmra.mxu1 %vm74_vm0, %v5712_v32 }
  0x23   :  { %4726 = vmatprep.subr.mxu1 %v3832_v33  ;;  %4691 = vmatpush3.msra.mxu0 %v3812_v31 }
  0x24   :  { %4727 = vmatpush3.msra.mxu1 %v3832_v33  ;;  %4692 = vmatprep.subr.mxu0 %v3811_v34 }
  0x25   :  { %4728 = vmatprep.subr.mxu1 %v3831_v35  ;;  %4680 = vmatprep.mubr.msk.f32.mxu1 %vm74_vm0, %v5730_v36 }
  0x26   :  { %4693 = vmatpush3.msra.mxu0 %v3811_v34  ;;  %4729 = vmatpush3.msra.mxu1 %v3831_v35 }
  0x27   :  { %4694 = vmatprep.subr.mxu0 %v3810_v37  ;;  %4681 = vmatmul.mubr.msk.f32.gmra.mxu1 %vm74_vm0, %v5738_v38 }
  0x28   :  { %4730 = vmatprep.subr.mxu1 %v3830_v39  ;;  %4695 = vmatpush3.msra.mxu0 %v3810_v37 }
  0x29   :  { %4731 = vmatpush3.msra.mxu1 %v3830_v39  ;;  %4641 = vmatprep.mubr.msk.f32.mxu0 %vm74_vm0, %v5704_v30 }
  0x2a   :  { %4696 = vmatprep.subr.mxu0 %v3809_v40  ;;  %4732 = vmatprep.subr.mxu1 %v3829_v41 }
  0x2b   :  { %4642 = vmatmul.mubr.msk.f32.gmra.mxu0 %vm74_vm0, %v5712_v32  ;;  %4683 = vmatprep.mubr.msk.f32.mxu1 %vm74_vm0, %v5756_v42 }
  0x2c   :  { %4697 = vmatpush3.msra.mxu0 %v3809_v40  ;;  %4733 = vmatpush3.msra.mxu1 %v3829_v41 }
  0x2d   :  { %4698 = vmatprep.subr.mxu0 %v3808_v43 }
  0x2e   :  { %21 = vsyncpa [#allocation3], 0  ;;  %4684 = vmatmul.mubr.msk.f32.gmra.mxu1 %vm74_vm0, %v5768_v44  ;;  %4734 = vmatprep.subr.mxu1 %v3828_v45  ;;  %v3827_v47 = vld [vmem:[%s7322_s1 + $0x140] sm:$0xff]  ;;  %v3806_v48 = vld [vmem:[%s7322_s1 + $0xd8] sm:$0xff]  ;;  %vm1273_vm1 = vcmask 1046528   ;;  %vm1352_vm2 = vcmask 1045504  }
  0x2f   :  { %4699 = vmatpush3.msra.mxu0 %v3808_v43  ;;  %4735 = vmatpush3.msra.mxu1 %v3828_v45  ;;  %v3826_v49 = vld [vmem:[%s7322_s1 + $0x138] sm:$0xff]  ;;  %v3805_v50 = vld [vmem:[%s7322_s1 + $0xd0] sm:$0xff]  ;;  %v3804_v52 = vld [vmem:[%s7322_s1 + $0xc8] sm:$0xff]  ;;  %vm1431_vm3 = vcmask 1044480   ;;  %vm5512_vm4 = vmmov 0   ;;  %vm1510_vm5 = vcmask 1043456  }
  0x30   :  { %4644 = vmatprep.mubr.msk.f32.mxu0 %vm74_vm0, %v5730_v36  ;;  %4700 = vmatprep.subr.mxu0 %v3807_v46  ;;  %v3825_v51 = vld [vmem:[%s7322_s1 + $0x130] sm:$0xff]  ;;  %v3824_v53 = vld [vmem:[%s7322_s1 + $0x128] sm:$0xff]  ;;  %v3803_v54 = vld [vmem:[%s7322_s1 + $0xc0] sm:$0xff]  ;;  %vm1635_vm6 = vcmask 490496   ;;  %vm1790_vm7 = vcmask 687104   ;;  %vm2949_vm8 = vcmask 195584  }
  0x31   :  { %4736 = vmatprep.subr.mxu1 %v3827_v47  ;;  %4645 = vmatmul.mubr.msk.f32.gmra.mxu0 %vm74_vm0, %v5738_v38  ;;  %v3823_v55 = vld [vmem:[%s7322_s1 + $0x120] sm:$0xff]  ;;  %v3854_v56 = vld [vmem:[%s7322_s1 + $0x1d8] sm:$0xff]  ;;  %v3853_v58 = vld [vmem:[%s7322_s1 + $0x1d0] sm:$0xff]  ;;  %vm3050_vm9 = vcmask 80896   ;;  %vm3057_vm10 = vcmask 1041408   ;;  %vm3159_vm11 = vcmask 654336  }
  0x32   :  { %4701 = vmatpush3.msra.mxu0 %v3807_v46  ;;  %4737 = vmatpush3.msra.mxu1 %v3827_v47  ;;  %v687_v57 = vld [vmem:[%s7323_s2 + $0x58] sm:$0xff]  ;;  %v686_v59 = vld [vmem:[%s7323_s2 + $0x50] sm:$0xff]  ;;  %v3852_v60 = vld [vmem:[%s7322_s1 + $0x1c8] sm:$0xff]  ;;  %vm3590_vm12 = vcmask 982016   ;;  %vm3759_vm13 = vcmask 74752  }
  0x33   :  { %4702 = vmatprep.subr.mxu0 %v3806_v48  ;;  %4738 = vmatprep.subr.mxu1 %v3826_v49  ;;  %v685_v61 = vld [vmem:[%s7323_s2 + $0x48] sm:$0xff]  ;;  %v3851_v62 = vld [vmem:[%s7322_s1 + $0x1c0] sm:$0xff]  ;;  %v3850_v0 = vld [vmem:[%s7322_s1 + $0x1b8] sm:$0xff] }
  0x34   :  { %4703 = vmatpush3.msra.mxu0 %v3806_v48  ;;  %4739 = vmatpush3.msra.mxu1 %v3826_v49  ;;  %v684_v63 = vld [vmem:[%s7323_s2 + $0x40] sm:$0xff]  ;;  %v683_v1 = vld [vmem:[%s7323_s2 + $0x38] sm:$0xff]  ;;  %v3849_v2 = vld [vmem:[%s7322_s1 + $0x1b0] sm:$0xff] }
  0x35   :  { %4647 = vmatprep.mubr.msk.f32.mxu0 %vm74_vm0, %v5756_v42  ;;  %4704 = vmatprep.subr.mxu0 %v3805_v50  ;;  %v682_v3 = vld [vmem:[%s7323_s2 + $0x30] sm:$0xff]  ;;  %v3848_v4 = vld [vmem:[%s7322_s1 + $0x1a8] sm:$0xff]  ;;  %v3847_v6 = vld [vmem:[%s7322_s1 + $0x1a0] sm:$0xff] }
  0x36   :  { %4740 = vmatprep.subr.mxu1 %v3825_v51  ;;  %4648 = vmatmul.mubr.msk.f32.gmra.mxu0 %vm74_vm0, %v5768_v44  ;;  %v681_v5 = vld [vmem:[%s7323_s2 + $0x28] sm:$0xff]  ;;  %v680_v7 = vld [vmem:[%s7323_s2 + $0x20] sm:$0xff]  ;;  %v3846_v8 = vld [vmem:[%s7322_s1 + $0x198] sm:$0xff] }
  0x37   :  { %4705 = vmatpush3.msra.mxu0 %v3805_v50  ;;  %4741 = vmatpush3.msra.mxu1 %v3825_v51  ;;  %v679_v9 = vld [vmem:[%s7323_s2 + $0x18] sm:$0xff]  ;;  %v3845_v10 = vld [vmem:[%s7322_s1 + $0x190] sm:$0xff]  ;;  %v3844_v12 = vld [vmem:[%s7322_s1 + $0x188] sm:$0xff] }
  0x38   :  { %4706 = vmatprep.subr.mxu0 %v3804_v52  ;;  %4742 = vmatprep.subr.mxu1 %v3824_v53  ;;  %v678_v11 = vld [vmem:[%s7323_s2 + $0x10] sm:$0xff]  ;;  %v677_v13 = vld [vmem:[%s7323_s2 + $0x8] sm:$0xff]  ;;  %v3843_v14 = vld [vmem:[%s7322_s1 + $0x180] sm:$0xff] }
  0x39   :  { %4707 = vmatpush3.msra.mxu0 %v3804_v52  ;;  %4743 = vmatpush3.msra.mxu1 %v3824_v53  ;;  %v676_v15 = vld [vmem:[%s7323_s2] sm:$0xff]  ;;  %v3882_v16 = vld [vmem:[%s7323_s2 + $0xb8] sm:$0xff]  ;;  %v3881_v18 = vld [vmem:[%s7323_s2 + $0xb0] sm:$0xff] }
  0x3a   :  { %4708 = vmatprep.subr.mxu0 %v3803_v54  ;;  %4744 = vmatprep.subr.mxu1 %v3823_v55  ;;  %v3902_v17 = vld [vmem:[%s7323_s2 + $0x118] sm:$0xff]  ;;  %v3901_v19 = vld [vmem:[%s7323_s2 + $0x110] sm:$0xff]  ;;  %v3880_v20 = vld [vmem:[%s7323_s2 + $0xa8] sm:$0xff] }
  0x3b   :  { %4709 = vmatpush3.msra.mxu0 %v3803_v54  ;;  %4710 = vmatprep.mubr.msk.f32.mxu0 %vm74_vm0, %v5674_v24  ;;  %v3900_v21 = vld [vmem:[%s7323_s2 + $0x108] sm:$0xff]  ;;  %v3879_v22 = vld [vmem:[%s7323_s2 + $0xa0] sm:$0xff]  ;;  %v3878_v26 = vld [vmem:[%s7323_s2 + $0x98] sm:$0xff] }
  0x3c   :  { %4745 = vmatpush3.msra.mxu1 %v3823_v55  ;;  %4746 = vmatprep.mubr.msk.f32.mxu1 %vm74_vm0, %v5674_v24  ;;  %v3899_v23 = vld [vmem:[%s7323_s2 + $0x100] sm:$0xff]  ;;  %v3898_v27 = vld [vmem:[%s7323_s2 + $0xf8] sm:$0xff]  ;;  %v3877_v28 = vld [vmem:[%s7323_s2 + $0x90] sm:$0xff] }
  0x3d   :  { %4711 = vmatmul.mubr.msk.f32.vlgmr.msra.gmra.mxu0 %vm74_vm0, %v5679_v25  ;;  %4747 = vmatmul.mubr.msk.f32.vlgmr.msra.gmra.mxu1 %vm74_vm0, %v5679_v25  ;;  %v3897_v29 = vld [vmem:[%s7323_s2 + $0xf0] sm:$0xff]  ;;  %v3876_v31 = vld [vmem:[%s7323_s2 + $0x88] sm:$0xff]  ;;  %v3875_v34 = vld [vmem:[%s7323_s2 + $0x80] sm:$0xff] }
  0x3e   :  { %4758 = vmatprep.subr.mxu0 %v3854_v56  ;;  %4794 = vmatprep.subr.mxu1 %v687_v57  ;;  %v3896_v33 = vld [vmem:[%s7323_s2 + $0xe8] sm:$0xff]  ;;  %v3895_v35 = vld [vmem:[%s7323_s2 + $0xe0] sm:$0xff]  ;;  %v3874_v37 = vld [vmem:[%s7323_s2 + $0x78] sm:$0xff] }
  0x3f   :  { %4759 = vmatpush3.msra.mxu0 %v3854_v56  ;;  %4795 = vmatpush3.msra.mxu1 %v687_v57  ;;  %v3894_v39 = vld [vmem:[%s7323_s2 + $0xd8] sm:$0xff]  ;;  %v3873_v40 = vld [vmem:[%s7323_s2 + $0x70] sm:$0xff]  ;;  %v3872_v43 = vld [vmem:[%s7323_s2 + $0x68] sm:$0xff] }
  0x40   :  { %4760 = vmatprep.subr.mxu0 %v3853_v58  ;;  %4796 = vmatprep.subr.mxu1 %v686_v59  ;;  %v3893_v41 = vld [vmem:[%s7323_s2 + $0xd0] sm:$0xff]  ;;  %v3892_v45 = vld [vmem:[%s7323_s2 + $0xc8] sm:$0xff]  ;;  %v3871_v46 = vld [vmem:[%s7323_s2 + $0x60] sm:$0xff] }
  0x41   :  { %4713 = vmatprep.mubr.msk.f32.mxu0 %vm74_vm0, %v5704_v30  ;;  %4749 = vmatprep.mubr.msk.f32.mxu1 %vm74_vm0, %v5704_v30  ;;  %v3891_v47 = vld [vmem:[%s7323_s2 + $0xc0] sm:$0xff]  ;;  %v3922_v48 = vld [vmem:[%s7323_s2 + $0x178] sm:$0xff]  ;;  %v3921_v50 = vld [vmem:[%s7323_s2 + $0x170] sm:$0xff] }
  0x42   :  { %4761 = vmatpush3.msra.mxu0 %v3853_v58  ;;  %4797 = vmatpush3.msra.mxu1 %v686_v59  ;;  %v3942_v49 = vld [vmem:[%s7323_s2 + $0x1d8] sm:$0xff]  ;;  %v3941_v51 = vld [vmem:[%s7323_s2 + $0x1d0] sm:$0xff]  ;;  %v3920_v52 = vld [vmem:[%s7323_s2 + $0x168] sm:$0xff] }
  0x43   :  { %4714 = vmatmul.mubr.msk.f32.gmra.mxu0 %vm74_vm0, %v5712_v32  ;;  %4750 = vmatmul.mubr.msk.f32.gmra.mxu1 %vm74_vm0, %v5712_v32  ;;  %v3940_v53 = vld [vmem:[%s7323_s2 + $0x1c8] sm:$0xff]  ;;  %v3919_v54 = vld [vmem:[%s7323_s2 + $0x160] sm:$0xff]  ;;  %v3918_v56 = vld [vmem:[%s7323_s2 + $0x158] sm:$0xff] }
  0x44   :  { %4762 = vmatprep.subr.mxu0 %v3852_v60  ;;  %4798 = vmatprep.subr.mxu1 %v685_v61  ;;  %v3939_v55 = vld [vmem:[%s7323_s2 + $0x1c0] sm:$0xff]  ;;  %v3938_v57 = vld [vmem:[%s7323_s2 + $0x1b8] sm:$0xff]  ;;  %v3917_v58 = vld [vmem:[%s7323_s2 + $0x150] sm:$0xff] }
  0x45   :  { %4763 = vmatpush3.msra.mxu0 %v3852_v60  ;;  %4799 = vmatpush3.msra.mxu1 %v685_v61  ;;  %v3937_v59 = vld [vmem:[%s7323_s2 + $0x1b0] sm:$0xff]  ;;  %v3916_v60 = vld [vmem:[%s7323_s2 + $0x148] sm:$0xff] }
  0x46   :  { %4764 = vmatprep.subr.mxu0 %v3851_v62  ;;  %4800 = vmatprep.subr.mxu1 %v684_v63  ;;  %v3936_v61 = vld [vmem:[%s7323_s2 + $0x1a8] sm:$0xff] }
  0x47   :  { %4716 = vmatprep.mubr.msk.f32.mxu0 %vm74_vm0, %v5730_v36  ;;  %4765 = vmatpush3.msra.mxu0 %v3851_v62  ;;  %v3915_v62 = vld [vmem:[%s7323_s2 + $0x140] sm:$0xff] }
  0x48   :  { %4801 = vmatpush3.msra.mxu1 %v684_v63  ;;  %4717 = vmatmul.mubr.msk.f32.gmra.mxu0 %vm74_vm0, %v5738_v38  ;;  %v3935_v63 = vld [vmem:[%s7323_s2 + $0x1a0] sm:$0xff] }
  0x49   :  { %4766 = vmatprep.subr.mxu0 %v3850_v0  ;;  %4802 = vmatprep.subr.mxu1 %v683_v1 }
  0x4a   :  { %4752 = vmatprep.mubr.msk.f32.mxu1 %vm74_vm0, %v5730_v36  ;;  %4767 = vmatpush3.msra.mxu0 %v3850_v0  ;;  %v3914_v0 = vld [vmem:[%s7323_s2 + $0x138] sm:$0xff] }
  0x4b   :  { %4803 = vmatpush3.msra.mxu1 %v683_v1  ;;  %4768 = vmatprep.subr.mxu0 %v3849_v2  ;;  %v3934_v1 = vld [vmem:[%s7323_s2 + $0x198] sm:$0xff] }
  0x4c   :  { %4753 = vmatmul.mubr.msk.f32.gmra.mxu1 %vm74_vm0, %v5738_v38  ;;  %4804 = vmatprep.subr.mxu1 %v682_v3 }
  0x4d   :  { %4719 = vmatprep.mubr.msk.f32.mxu0 %vm74_vm0, %v5756_v42  ;;  %4769 = vmatpush3.msra.mxu0 %v3849_v2  ;;  %v3913_v2 = vld [vmem:[%s7323_s2 + $0x130] sm:$0xff] }
  0x4e   :  { %4805 = vmatpush3.msra.mxu1 %v682_v3  ;;  %4720 = vmatmul.mubr.msk.f32.gmra.mxu0 %vm74_vm0, %v5768_v44  ;;  %v3933_v3 = vld [vmem:[%s7323_s2 + $0x190] sm:$0xff] }
  0x4f   :  { %4770 = vmatprep.subr.mxu0 %v3848_v4  ;;  %4806 = vmatprep.subr.mxu1 %v681_v5 }
  0x50   :  { %4755 = vmatprep.mubr.msk.f32.mxu1 %vm74_vm0, %v5756_v42  ;;  %4771 = vmatpush3.msra.mxu0 %v3848_v4  ;;  %v3912_v4 = vld [vmem:[%s7323_s2 + $0x128] sm:$0xff] }
  0x51   :  { %4807 = vmatpush3.msra.mxu1 %v681_v5  ;;  %4772 = vmatprep.subr.mxu0 %v3847_v6  ;;  %v3932_v5 = vld [vmem:[%s7323_s2 + $0x188] sm:$0xff] }
  0x52   :  { %4756 = vmatmul.mubr.msk.f32.gmra.mxu1 %vm74_vm0, %v5768_v44  ;;  %4808 = vmatprep.subr.mxu1 %v680_v7 }
  0x53   :  { %4773 = vmatpush3.msra.mxu0 %v3847_v6  ;;  %4809 = vmatpush3.msra.mxu1 %v680_v7  ;;  %v3911_v6 = vld [vmem:[%s7323_s2 + $0x120] sm:$0xff] }
  0x54   :  { %4774 = vmatprep.subr.mxu0 %v3846_v8  ;;  %4810 = vmatprep.subr.mxu1 %v679_v9  ;;  %v3931_v7 = vld [vmem:[%s7323_s2 + $0x180] sm:$0xff] }
  0x55   :  { %4775 = vmatpush3.msra.mxu0 %v3846_v8  ;;  %4811 = vmatpush3.msra.mxu1 %v679_v9 }
  0x56   :  { %4776 = vmatprep.subr.mxu0 %v3845_v10  ;;  %4812 = vmatprep.subr.mxu1 %v678_v11 }
  0x57   :  { %4777 = vmatpush3.msra.mxu0 %v3845_v10  ;;  %4813 = vmatpush3.msra.mxu1 %v678_v11 }
  0x58   :  { %4778 = vmatprep.subr.mxu0 %v3844_v12  ;;  %4814 = vmatprep.subr.mxu1 %v677_v13 }
  0x59   :  { %4779 = vmatpush3.msra.mxu0 %v3844_v12  ;;  %4815 = vmatpush3.msra.mxu1 %v677_v13 }
  0x5a   :  { %4780 = vmatprep.subr.mxu0 %v3843_v14  ;;  %4816 = vmatprep.subr.mxu1 %v676_v15 }
  0x5b   :  { %4781 = vmatpush3.msra.mxu0 %v3843_v14  ;;  %4782 = vmatprep.mubr.msk.f32.mxu0 %vm74_vm0, %v5674_v24 }
  0x5c   :  { %4817 = vmatpush3.msra.mxu1 %v676_v15  ;;  %4783 = vmatmul.mubr.msk.f32.vlgmr.msra.gmra.mxu0 %vm74_vm0, %v5679_v25 }
  0x5d   :  { %4818 = vmatprep.mubr.msk.f32.mxu1 %vm74_vm0, %v5674_v24  ;;  %4830 = vmatprep.subr.mxu0 %v3882_v16 }
  0x5e   :  { %4866 = vmatprep.subr.mxu1 %v3902_v17  ;;  %4819 = vmatmul.mubr.msk.f32.vlgmr.msra.gmra.mxu1 %vm74_vm0, %v5679_v25 }
  0x5f   :  { %4831 = vmatpush3.msra.mxu0 %v3882_v16  ;;  %4867 = vmatpush3.msra.mxu1 %v3902_v17 }
  0x60   :  { %4832 = vmatprep.subr.mxu0 %v3881_v18  ;;  %4868 = vmatprep.subr.mxu1 %v3901_v19 }
  0x61   :  { %4785 = vmatprep.mubr.msk.f32.mxu0 %vm74_vm0, %v5704_v30  ;;  %4833 = vmatpush3.msra.mxu0 %v3881_v18 }
  0x62   :  { %4869 = vmatpush3.msra.mxu1 %v3901_v19  ;;  %4786 = vmatmul.mubr.msk.f32.gmra.mxu0 %vm74_vm0, %v5712_v32 }
  0x63   :  { %4834 = vmatprep.subr.mxu0 %v3880_v20  ;;  %4870 = vmatprep.subr.mxu1 %v3900_v21 }
  0x64   :  { %4835 = vmatpush3.msra.mxu0 %v3880_v20  ;;  %4871 = vmatpush3.msra.mxu1 %v3900_v21 }
  0x65   :  { %4836 = vmatprep.subr.mxu0 %v3879_v22  ;;  %4872 = vmatprep.subr.mxu1 %v3899_v23 }
  0x66   :  { %4788 = vmatprep.mubr.msk.f32.mxu0 %vm74_vm0, %v5730_v36  ;;  %4837 = vmatpush3.msra.mxu0 %v3879_v22 }
  0x67   :  { %4873 = vmatpush3.msra.mxu1 %v3899_v23  ;;  %4789 = vmatmul.mubr.msk.f32.gmra.mxu0 %vm74_vm0, %v5738_v38 }
  0x68   :  { %4838 = vmatprep.subr.mxu0 %v3878_v26  ;;  %4874 = vmatprep.subr.mxu1 %v3898_v27 }
  0x69   :  { %4839 = vmatpush3.msra.mxu0 %v3878_v26  ;;  %4875 = vmatpush3.msra.mxu1 %v3898_v27 }
  0x6a   :  { %4840 = vmatprep.subr.mxu0 %v3877_v28  ;;  %4876 = vmatprep.subr.mxu1 %v3897_v29 }
  0x6b   :  { %4791 = vmatprep.mubr.msk.f32.mxu0 %vm74_vm0, %v5756_v42  ;;  %4821 = vmatprep.mubr.msk.f32.mxu1 %vm74_vm0, %v5704_v30 }
  0x6c   :  { %4841 = vmatpush3.msra.mxu0 %v3877_v28  ;;  %4877 = vmatpush3.msra.mxu1 %v3897_v29 }
  0x6d   :  { %4792 = vmatmul.mubr.msk.f32.gmra.mxu0 %vm74_vm0, %v5768_v44  ;;  %4822 = vmatmul.mubr.msk.f32.gmra.mxu1 %vm74_vm0, %v5712_v32 }
  0x6e   :  { %4842 = vmatprep.subr.mxu0 %v3876_v31  ;;  %4878 = vmatprep.subr.mxu1 %v3896_v33 }
  0x6f   :  { %4843 = vmatpush3.msra.mxu0 %v3876_v31  ;;  %4879 = vmatpush3.msra.mxu1 %v3896_v33 }
  0x70   :  { %4844 = vmatprep.subr.mxu0 %v3875_v34  ;;  %4880 = vmatprep.subr.mxu1 %v3895_v35 }
  0x71   :  { %4824 = vmatprep.mubr.msk.f32.mxu1 %vm74_vm0, %v5730_v36  ;;  %4845 = vmatpush3.msra.mxu0 %v3875_v34 }
  0x72   :  { %4881 = vmatpush3.msra.mxu1 %v3895_v35  ;;  %4846 = vmatprep.subr.mxu0 %v3874_v37 }
  0x73   :  { %4825 = vmatmul.mubr.msk.f32.gmra.mxu1 %vm74_vm0, %v5738_v38  ;;  %4882 = vmatprep.subr.mxu1 %v3894_v39 }
  0x74   :  { %4847 = vmatpush3.msra.mxu0 %v3874_v37  ;;  %4883 = vmatpush3.msra.mxu1 %v3894_v39 }
  0x75   :  { %4848 = vmatprep.subr.mxu0 %v3873_v40  ;;  %4884 = vmatprep.subr.mxu1 %v3893_v41 }
  0x76   :  { %4827 = vmatprep.mubr.msk.f32.mxu1 %vm74_vm0, %v5756_v42  ;;  %4849 = vmatpush3.msra.mxu0 %v3873_v40  ;;  %v5511_v40 = vmov 0.0  }
  0x77   :  { %4885 = vmatpush3.msra.mxu1 %v3893_v41  ;;  %4850 = vmatprep.subr.mxu0 %v3872_v43 }
  0x78   :  { %4828 = vmatmul.mubr.msk.f32.gmra.mxu1 %vm74_vm0, %v5768_v44  ;;  %4886 = vmatprep.subr.mxu1 %v3892_v45 }
  0x79   :  { %4851 = vmatpush3.msra.mxu0 %v3872_v43  ;;  %4887 = vmatpush3.msra.mxu1 %v3892_v45 }
  0x7a   :  { %4852 = vmatprep.subr.mxu0 %v3871_v46  ;;  %4888 = vmatprep.subr.mxu1 %v3891_v47 }
  0x7b   :  { %4853 = vmatpush3.msra.mxu0 %v3871_v46  ;;  %4854 = vmatprep.mubr.msk.f32.mxu0 %vm74_vm0, %v5674_v24 }
  0x7c   :  { %4889 = vmatpush3.msra.mxu1 %v3891_v47  ;;  %4890 = vmatprep.mubr.msk.f32.mxu1 %vm74_vm0, %v5674_v24 }
  0x7d   :  { %4855 = vmatmul.mubr.msk.f32.vlgmr.msra.gmra.mxu0 %vm74_vm0, %v5679_v25  ;;  %4891 = vmatmul.mubr.msk.f32.vlgmr.msra.gmra.mxu1 %vm74_vm0, %v5679_v25 }
  0x7e   :  { %4902 = vmatprep.subr.mxu0 %v3922_v48  ;;  %4938 = vmatprep.subr.mxu1 %v3942_v49 }
  0x7f   :  { %4903 = vmatpush3.msra.mxu0 %v3922_v48  ;;  %4939 = vmatpush3.msra.mxu1 %v3942_v49 }
  0x80   :  { %4904 = vmatprep.subr.mxu0 %v3921_v50  ;;  %4940 = vmatprep.subr.mxu1 %v3941_v51 }
  0x81   :  { %4857 = vmatprep.mubr.msk.f32.mxu0 %vm74_vm0, %v5704_v30  ;;  %4893 = vmatprep.mubr.msk.f32.mxu1 %vm74_vm0, %v5704_v30 }
  0x82   :  { %4905 = vmatpush3.msra.mxu0 %v3921_v50  ;;  %4941 = vmatpush3.msra.mxu1 %v3941_v51 }
  0x83   :  { %4858 = vmatmul.mubr.msk.f32.gmra.mxu0 %vm74_vm0, %v5712_v32  ;;  %4894 = vmatmul.mubr.msk.f32.gmra.mxu1 %vm74_vm0, %v5712_v32 }
  0x84   :  { %4906 = vmatprep.subr.mxu0 %v3920_v52  ;;  %4942 = vmatprep.subr.mxu1 %v3940_v53 }
  0x85   :  { %4907 = vmatpush3.msra.mxu0 %v3920_v52  ;;  %4943 = vmatpush3.msra.mxu1 %v3940_v53 }
  0x86   :  { %4908 = vmatprep.subr.mxu0 %v3919_v54  ;;  %4944 = vmatprep.subr.mxu1 %v3939_v55 }
  0x87   :  { %4860 = vmatprep.mubr.msk.f32.mxu0 %vm74_vm0, %v5730_v36  ;;  %4909 = vmatpush3.msra.mxu0 %v3919_v54 }
  0x88   :  { %4945 = vmatpush3.msra.mxu1 %v3939_v55  ;;  %4861 = vmatmul.mubr.msk.f32.gmra.mxu0 %vm74_vm0, %v5738_v38 }
  0x89   :  { %4910 = vmatprep.subr.mxu0 %v3918_v56  ;;  %4946 = vmatprep.subr.mxu1 %v3938_v57 }
  0x8a   :  { %4896 = vmatprep.mubr.msk.f32.mxu1 %vm74_vm0, %v5730_v36  ;;  %4911 = vmatpush3.msra.mxu0 %v3918_v56 }
  0x8b   :  { %4947 = vmatpush3.msra.mxu1 %v3938_v57  ;;  %4912 = vmatprep.subr.mxu0 %v3917_v58 }
  0x8c   :  { %4897 = vmatmul.mubr.msk.f32.gmra.mxu1 %vm74_vm0, %v5738_v38  ;;  %4948 = vmatprep.subr.mxu1 %v3937_v59 }
  0x8d   :  { %4863 = vmatprep.mubr.msk.f32.mxu0 %vm74_vm0, %v5756_v42  ;;  %4913 = vmatpush3.msra.mxu0 %v3917_v58 }
  0x8e   :  { %4949 = vmatpush3.msra.mxu1 %v3937_v59  ;;  %4864 = vmatmul.mubr.msk.f32.gmra.mxu0 %vm74_vm0, %v5768_v44 }
  0x8f   :  { %4914 = vmatprep.subr.mxu0 %v3916_v60  ;;  %4950 = vmatprep.subr.mxu1 %v3936_v61 }
  0x90   :  { %4899 = vmatprep.mubr.msk.f32.mxu1 %vm74_vm0, %v5756_v42  ;;  %4915 = vmatpush3.msra.mxu0 %v3916_v60 }
  0x91   :  { %4951 = vmatpush3.msra.mxu1 %v3936_v61  ;;  %4916 = vmatprep.subr.mxu0 %v3915_v62 }
  0x92   :  { %4900 = vmatmul.mubr.msk.f32.gmra.mxu1 %vm74_vm0, %v5768_v44  ;;  %4952 = vmatprep.subr.mxu1 %v3935_v63 }
  0x93   :  { %4917 = vmatpush3.msra.mxu0 %v3915_v62  ;;  %4953 = vmatpush3.msra.mxu1 %v3935_v63 }
  0x94   :  { %4918 = vmatprep.subr.mxu0 %v3914_v0  ;;  %4954 = vmatprep.subr.mxu1 %v3934_v1 }
  0x95   :  { %4919 = vmatpush3.msra.mxu0 %v3914_v0  ;;  %4955 = vmatpush3.msra.mxu1 %v3934_v1 }
  0x96   :  { %4920 = vmatprep.subr.mxu0 %v3913_v2  ;;  %4956 = vmatprep.subr.mxu1 %v3933_v3 }
  0x97   :  { %4921 = vmatpush3.msra.mxu0 %v3913_v2  ;;  %4957 = vmatpush3.msra.mxu1 %v3933_v3 }
  0x98   :  { %4922 = vmatprep.subr.mxu0 %v3912_v4  ;;  %4958 = vmatprep.subr.mxu1 %v3932_v5 }
  0x99   :  { %4923 = vmatpush3.msra.mxu0 %v3912_v4  ;;  %4959 = vmatpush3.msra.mxu1 %v3932_v5 }
  0x9a   :  { %4924 = vmatprep.subr.mxu0 %v3911_v6  ;;  %4960 = vmatprep.subr.mxu1 %v3931_v7 }
  0x9b   :  { %4925 = vmatpush3.msra.mxu0 %v3911_v6  ;;  %4926 = vmatprep.mubr.msk.f32.mxu0 %vm74_vm0, %v5674_v24 }
  0x9c   :  { %4961 = vmatpush3.msra.mxu1 %v3931_v7  ;;  %4962 = vmatprep.mubr.msk.f32.mxu1 %vm74_vm0, %v5674_v24 }
  0x9d   :  { %4927 = vmatmul.mubr.msk.f32.vlgmr.msra.gmra.mxu0 %vm74_vm0, %v5679_v25  ;;  %4963 = vmatmul.mubr.msk.f32.vlgmr.msra.gmra.mxu1 %vm74_vm0, %v5679_v25 }
  0x9e   :  { %4929 = vmatprep.mubr.msk.f32.mxu0 %vm74_vm0, %v5704_v30  ;;  %4965 = vmatprep.mubr.msk.f32.mxu1 %vm74_vm0, %v5704_v30 }
  0x9f   :  { %4974 = vmatprep.subr.mxu0 %v5511_v40 }
  0xa1   :  { %4930 = vmatmul.mubr.msk.f32.gmra.mxu0 %vm74_vm0, %v5712_v32  ;;  %4966 = vmatmul.mubr.msk.f32.gmra.mxu1 %vm74_vm0, %v5712_v32 }
  0xa2   :  { %4932 = vmatprep.mubr.msk.f32.mxu0 %vm74_vm0, %v5730_v36  ;;  %4968 = vmatprep.mubr.msk.f32.mxu1 %vm74_vm0, %v5730_v36 }
  0xa5   :  { %4933 = vmatmul.mubr.msk.f32.gmra.mxu0 %vm74_vm0, %v5738_v38  ;;  %4969 = vmatmul.mubr.msk.f32.gmra.mxu1 %vm74_vm0, %v5738_v38 }
  0xa6   :  { %4935 = vmatprep.mubr.msk.f32.mxu0 %vm74_vm0, %v5756_v42  ;;  %4971 = vmatprep.mubr.msk.f32.mxu1 %vm74_vm0, %v5756_v42 }
  0xa9   :  { %4936 = vmatmul.mubr.msk.f32.gmra.mxu0 %vm74_vm0, %v5768_v44  ;;  %4972 = vmatmul.mubr.msk.f32.gmra.mxu1 %vm74_vm0, %v5768_v44 }
  0xaa   :  { %4990 = vmatprep.mubr.msk.f32.mxu0 %vm5512_vm4, %v5511_v40 }
  0xdc   :  { %v4640_v25 = vpop.f32.mrf.mxu0 }
  0xdd   :  { %v4676_v24 = vpop.f32.mrf.mxu1 }
  0xde   :  { %v1275_v30 = vrot.slane %v4676_v24, 1  ;;  %v165_v8 = vpop.f32.mrf.mxu0 }
  0xdf   :  { %v283_v32 = vpop.f32.mrf.mxu1 }
  0xe0   :  { %v1274_v36 = vrot.slane %v283_v32, 1 }
  0xe2   :  { %v1276_v38 = vsel %vm1273_vm1, %v1274_v36, %v1275_v30  ;;  %v4679_v10 = vpop.f32.mrf.mxu1 }
  0xe3   :  { %v1297_v9 = vadd.f32 %v1276_v38, %v165_v8  ;;  %v1279_v11 = vrot.slane %v4679_v10, 1 }
  0xe4   :  { %v293_v12 = vpop.f32.mrf.mxu1 }
  0xe5   :  { %v1277_v42 = vrot.slane %v293_v12, 1 }
  0xe7   :  { %v1278_v13 = vsel %vm1273_vm1, %v1275_v30, %v1277_v42  ;;  %v4682_v14 = vpop.f32.mrf.mxu1  ;;  %v1280_v15 = vsel %vm1273_vm1, %v1277_v42, %v1279_v11 }
  0xe8   :  { %v1298_v44 = vadd.f32 %v4640_v25, %v1278_v13  ;;  %v1283_v16 = vrot.slane %v4682_v14, 1 }
  0xe9   :  { %v303_v17 = vpop.f32.mrf.mxu1 }
  0xea   :  { %v1281_v18 = vrot.slane %v303_v17, 1 }
  0xeb   :  { %v4643_v19 = vpop.f32.mrf.mxu0 }
  0xec   :  { %v1282_v20 = vsel %vm1273_vm1, %v1279_v11, %v1281_v18  ;;  %v1284_v22 = vsel %vm1273_vm1, %v1281_v18, %v1283_v16 }
  0xed   :  { %v175_v21 = vpop.f32.mrf.mxu0  ;;  %v6164_v23 = vadd.f32 %v4643_v19, %v1282_v20 }
  0xee   :  { %v6166_v26 = vpop.f32.mrf.mxu1  ;;  %v6168_v27 = vadd.f32 %v1280_v15, %v175_v21 }
  0xf0   :  { %v6170_v28 = vpop.f32.mrf.mxu1 }
  0xf1   :  { %v1285_v29 = vrot.slane %v6170_v28, 1  ;;  %v4646_v31 = vpop.f32.mrf.mxu0 }
  0xf3   :  { %v1286_v33 = vsel %vm1273_vm1, %v1283_v16, %v1285_v29  ;;  %v185_v34 = vpop.f32.mrf.mxu0 }
  0xf4   :  { %v6176_v35 = vadd.f32 %v4646_v31, %v1286_v33  ;;  %v6178_v37 = vadd.f32 %v1284_v22, %v185_v34  ;;  %v1287_v33 = vrot.slane %v6166_v26, 1 }
  0xf6   :  { %v6180_v39 = vpop.f32.mrf.mxu0 }
  0xf8   :  { %v6183_v41 = vpop.f32.mrf.mxu0 }
  0xfd   :  { %v4712_v43 = vpop.f32.mrf.mxu0  ;;  %v4748_v45 = vpop.f32.mrf.mxu1 }
  0xfe   :  { %v1354_v46 = vrot.slane %v4712_v43, 2  ;;  %v1433_v47 = vrot.slane %v4748_v45, 3 }
  0xff   :  { %v401_v48 = vpop.f32.mrf.mxu0  ;;  %v519_v49 = vpop.f32.mrf.mxu1 }
 0x100   :  { %v1353_v50 = vrot.slane %v401_v48, 2  ;;  %v1432_v51 = vrot.slane %v519_v49, 3 }
 0x102   :  { %v1355_v52 = vsel %vm1352_vm2, %v1353_v50, %v1354_v46  ;;  %v1434_v53 = vsel %vm1431_vm3, %v1432_v51, %v1433_v47  ;;  %v1304_v50 = vadd.f32 %v6180_v39, %v1287_v33  ;;  %v1288_v51 = vsel %vm1273_vm1, %v1285_v29, %v1287_v33 }
 0x103   :  { %v1376_v54 = vadd.f32 %v1355_v52, %v1297_v9  ;;  %v4715_v55 = vpop.f32.mrf.mxu0  ;;  %v6187_v56 = vpop.f32.mrf.mxu1 }
 0x104   :  { %v1358_v34 = vrot.slane %v4715_v55, 2  ;;  %v1437_v52 = vrot.slane %v6187_v56, 3 }
 0x105   :  { %v6189_v57 = vadd.f32 %v1434_v53, %v1376_v54  ;;  %v411_v58 = vpop.f32.mrf.mxu0  ;;  %v6191_v59 = vpop.f32.mrf.mxu1 }
 0x106   :  { %v1356_v60 = vrot.slane %v411_v58, 2  ;;  %v1435_v61 = vrot.slane %v6191_v59, 3 }
 0x108   :  { %v1357_v62 = vsel %vm1352_vm2, %v1354_v46, %v1356_v60  ;;  %v1436_v0 = vsel %vm1431_vm3, %v1433_v47, %v1435_v61  ;;  %v4718_v2 = vpop.f32.mrf.mxu0  ;;  %v1359_v53 = vsel %vm1352_vm2, %v1356_v60, %v1358_v34  ;;  %v1303_v60 = vadd.f32 %v1288_v51, %v6183_v41 }
 0x109   :  { %v1377_v63 = vadd.f32 %v1357_v62, %v1298_v44  ;;  %v1362_v46 = vrot.slane %v4718_v2, 2  ;;  %v1378_v2 = vadd.f32 %v1359_v53, %v6168_v27 }
 0x10a   :  { %v421_v3 = vpop.f32.mrf.mxu0 }
 0x10b   :  { %v6200_v1 = vadd.f32 %v1436_v0, %v1377_v63  ;;  %v1360_v43 = vrot.slane %v421_v3, 2  ;;  %v1438_v3 = vsel %vm1431_vm3, %v1435_v61, %v1437_v52 }
 0x10c   :  { %v6202_v4 = vpop.f32.mrf.mxu1  ;;  %v1457_v51 = vadd.f32 %v1438_v3, %v1378_v2 }
 0x10d   :  { %v1361_v26 = vsel %vm1352_vm2, %v1358_v34, %v1360_v43  ;;  %v1441_v54 = vrot.slane %v6202_v4, 3  ;;  %v1363_v63 = vsel %vm1352_vm2, %v1360_v43, %v1362_v46 }
 0x10e   :  { %v4721_v5 = vpop.f32.mrf.mxu0  ;;  %v539_v6 = vpop.f32.mrf.mxu1  ;;  %v1379_v4 = vadd.f32 %v1361_v26, %v6164_v23 }
 0x10f   :  { %v1366_v47 = vrot.slane %v4721_v5, 2  ;;  %v1439_v55 = vrot.slane %v539_v6, 3  ;;  %v1380_v5 = vadd.f32 %v1363_v63, %v6178_v37 }
 0x110   :  { %v431_v7 = vpop.f32.mrf.mxu0 }
 0x111   :  { %v1364_v48 = vrot.slane %v431_v7, 2  ;;  %v1383_v39 = vadd.f32 %v1366_v47, %v1304_v50  ;;  %v1440_v6 = vsel %vm1431_vm3, %v1437_v52, %v1439_v55  ;;  %v1442_v7 = vsel %vm1431_vm3, %v1439_v55, %v1441_v54 }
 0x112   :  { %v6204_v24 = vpop.f32.mrf.mxu1  ;;  %v1459_v53 = vadd.f32 %v1442_v7, %v1380_v5 }
 0x113   :  { %v1445_v28 = vrot.slane %v6204_v24, 3  ;;  %v1365_v29 = vsel %vm1352_vm2, %v1362_v46, %v1364_v48  ;;  %v1367_v56 = vsel %vm1352_vm2, %v1364_v48, %v1366_v47 }
 0x114   :  { %v549_v30 = vpop.f32.mrf.mxu1  ;;  %v1381_v41 = vadd.f32 %v1365_v29, %v6176_v35  ;;  %v1382_v27 = vadd.f32 %v1367_v56, %v1303_v60 }
 0x115   :  { %v1443_v0 = vrot.slane %v549_v30, 3  ;;  %v1462_v34 = vadd.f32 %v1445_v28, %v1383_v39 }
 0x117   :  { %v1444_v61 = vsel %vm1431_vm3, %v1441_v54, %v1443_v0  ;;  %v1446_v23 = vsel %vm1431_vm3, %v1443_v0, %v1445_v28 }
 0x118   :  { %v1461_v26 = vadd.f32 %v1446_v23, %v1382_v27 }
 0x11c   :  { %v6206_v25 = vpop.f32.mrf.mxu0 }
 0x11d   :  { %v1512_v37 = vrot.slane %v6206_v25, 4  ;;  %v1458_v25 = vadd.f32 %v1440_v6, %v1379_v4 }
 0x11e   :  { %v6208_v32 = vpop.f32.mrf.mxu0  ;;  %v6210_v36 = vpop.f32.mrf.mxu1 }
 0x11f   :  { %v1511_v43 = vrot.slane %v6208_v32, 4  ;;  %v1460_v32 = vadd.f32 %v1444_v61, %v1381_v41 }
 0x120   :  { %v6214_v38 = vpop.f32.mrf.mxu1 }
 0x122   :  { %v6212_v8 = vpop.f32.mrf.mxu0 }
 0x123   :  { %v1516_v46 = vrot.slane %v6212_v8, 4  ;;  %v6299_v8 = vsel %vm1510_vm5, %v1511_v43, %v1512_v37 }
 0x124   :  { %v6216_v9 = vpop.f32.mrf.mxu0 }
 0x127   :  { %v6222_v12 = vpop.f32.mrf.mxu0 }
 0x128   :  { %v1520_v47 = vrot.slane %v6222_v12, 4 }
 0x129   :  { %v6226_v13 = vpop.f32.mrf.mxu0 }
 0x12a   :  { %v1518_v35 = vrot.slane %v6226_v13, 4 }
 0x12c   :  { %v1519_v54 = vsel %vm1510_vm5, %v1516_v46, %v1518_v35  ;;  %v1521_v55 = vsel %vm1510_vm5, %v1518_v35, %v1520_v47 }
 0x12d   :  { %v6218_v10 = vpop.f32.mrf.mxu1  ;;  %v6230_v15 = vpop.f32.mrf.mxu0  ;;  %v6322_v5 = vadd.f32 %v1519_v54, %v1458_v25  ;;  %v6329_v27 = vadd.f32 %v1521_v55, %v1459_v53 }
 0x12e   :  { %v1524_v24 = vrot.slane %v6230_v15, 4  ;;  %v1514_v15 = vrot.slane %v6216_v9, 4  ;;  %v6304_v9 = vld [vmem:[%s7324_s3] ss:$0 sm:$0xff]  ;;  %s5513_s3 = smov [#allocation2]  }
 0x12f   :  { %v6220_v11 = vpop.f32.mrf.mxu1  ;;  %v6234_v16 = vpop.f32.mrf.mxu0 }
 0x130   :  { %v1522_v59 = vrot.slane %v6234_v16, 4  ;;  %v1541_v48 = vadd.f32 %v1524_v24, %v1462_v34  ;;  %v6307_v12 = vsel %vm1510_vm5, %v1512_v37, %v1514_v15  ;;  %v1517_v13 = vsel %vm1510_vm5, %v1514_v15, %v1516_v46 }
 0x131   :  { %v6320_v4 = vadd.f32 %v1517_v13, %v1457_v51 }
 0x132   :  { %v1523_v52 = vsel %vm1510_vm5, %v1520_v47, %v1522_v59  ;;  %v6313_v63 = vadd.f32 %v6304_v9, %v1541_v48  ;;  %v1525_v39 = vsel %vm1510_vm5, %v1522_v59, %v1524_v24 }
 0x133   :  { %v6224_v42 = vpop.f32.mrf.mxu1  ;;  %v1539_v28 = vadd.f32 %v1523_v52, %v1460_v32  ;;  %v1540_v34 = vadd.f32 %v1525_v39, %v1461_v26 }
 0x135   :  { %v6228_v14 = vpop.f32.mrf.mxu1  ;;  %v6335_v59 = vadd.f32 %v6304_v9, %v1539_v28 }
 0x138   :  { %v6232_v44 = vpop.f32.mrf.mxu1 }
 0x13a   :  { %v6236_v17 = vpop.f32.mrf.mxu1 }
 0x13d   :  { %v6238_v18 = vpop.f32.mrf.mxu0  ;;  %v6240_v19 = vpop.f32.mrf.mxu1 }
 0x13e   :  { %v1314_v0 = vrot.slane %v6238_v18, 1  ;;  %v1393_v18 = vrot.slane %v6240_v19, 2 }
 0x13f   :  { %v6242_v20 = vpop.f32.mrf.mxu0  ;;  %v6244_v21 = vpop.f32.mrf.mxu1 }
 0x140   :  { %v1313_v60 = vrot.slane %v6242_v20, 1  ;;  %v1392_v20 = vrot.slane %v6244_v21, 2 }
 0x142   :  { %v1315_v23 = vsel %vm1273_vm1, %v1313_v60, %v1314_v0  ;;  %v1394_v48 = vsel %vm1352_vm2, %v1392_v20, %v1393_v18 }
 0x143   :  { %v6246_v22 = vpop.f32.mrf.mxu0  ;;  %v6248_v31 = vpop.f32.mrf.mxu1  ;;  %v1336_v25 = vadd.f32 %v1315_v23, %v6214_v38 }
 0x144   :  { %v1318_v2 = vrot.slane %v6246_v22, 1  ;;  %v1397_v37 = vrot.slane %v6248_v31, 2 }
 0x145   :  { %v6251_v45 = vpop.f32.mrf.mxu0  ;;  %v6253_v49 = vpop.f32.mrf.mxu1 }
 0x146   :  { %v1316_v3 = vrot.slane %v6251_v45, 1  ;;  %v1603_v45 = vmax.f32 %v6313_v63, 0.0  ;;  %v1534_v63 = vadd.f32 %v6299_v8, %v6189_v57 }
 0x148   :  { %v6263_v58 = vpop.f32.mrf.mxu0  ;;  %v1317_v19 = vsel %vm1273_vm1, %v1314_v0, %v1316_v3  ;;  %v1319_v21 = vsel %vm1273_vm1, %v1316_v3, %v1318_v2  ;;  %v1588_v8 = vadd.f32 %v6304_v9, %v1534_v63 }
 0x149   :  { %v1322_v6 = vrot.slane %v6263_v58, 1  ;;  %v1395_v58 = vrot.slane %v6253_v49, 2  ;;  %v1337_v53 = vadd.f32 %v6210_v36, %v1317_v19  ;;  %v1338_v13 = vadd.f32 %v1319_v21, %v6220_v11 }
 0x14a   :  { %v892_v33 = vpop.f32.mrf.mxu0 }
 0x14b   :  { %v1320_v7 = vrot.slane %v892_v33, 1  ;;  %v1396_v32 = vsel %vm1352_vm2, %v1393_v18, %v1395_v58  ;;  %v1398_v54 = vsel %vm1352_vm2, %v1395_v58, %v1397_v37 }
 0x14c   :  { %v6265_v62 = vpop.f32.mrf.mxu1 }
 0x14d   :  { %v1321_v43 = vsel %vm1273_vm1, %v1318_v2, %v1320_v7  ;;  %v1323_v46 = vsel %vm1273_vm1, %v1320_v7, %v1322_v6  ;;  %v1401_v51 = vrot.slane %v6265_v62, 2  ;;  %v1417_v7 = vadd.f32 %v1398_v54, %v1338_v13 }
 0x14e   :  { %v6281_v30 = vpop.f32.mrf.mxu1  ;;  %v6293_v50 = vpop.f32.mrf.mxu0  ;;  %v1339_v62 = vadd.f32 %v6218_v10, %v1321_v43  ;;  %v1340_v55 = vadd.f32 %v1323_v46, %v6228_v14  ;;  %v6373_v10 = vadd.f32 %v6304_v9, %v1540_v34  ;;  %v1415_v14 = vadd.f32 %v1394_v48, %v1336_v25 }
 0x14f   :  { %v1326_v15 = vrot.slane %v6293_v50, 1  ;;  %v1399_v49 = vrot.slane %v6281_v30, 2 }
 0x150   :  { %v902_v29 = vpop.f32.mrf.mxu0 }
 0x151   :  { %v1324_v22 = vrot.slane %v902_v29, 1  ;;  %v1343_v39 = vadd.f32 %v6232_v44, %v1326_v15  ;;  %v1400_v38 = vsel %vm1352_vm2, %v1397_v37, %v1399_v49  ;;  %v1402_v0 = vsel %vm1352_vm2, %v1399_v49, %v1401_v51 }
 0x152   :  { %v6295_v16 = vpop.f32.mrf.mxu1  ;;  %v1416_v44 = vadd.f32 %v1396_v32, %v1337_v53  ;;  %v1419_v58 = vadd.f32 %v1402_v0, %v1340_v55 }
 0x153   :  { %v1325_v31 = vsel %vm1273_vm1, %v1322_v6, %v1324_v22  ;;  %v1327_v50 = vsel %vm1273_vm1, %v1324_v22, %v1326_v15  ;;  %v1405_v28 = vrot.slane %v6295_v16, 2  ;;  %v1418_v22 = vadd.f32 %v1400_v38, %v1339_v62 }
 0x154   :  { %v1020_v56 = vpop.f32.mrf.mxu1  ;;  %v1341_v36 = vadd.f32 %v6224_v42, %v1325_v31  ;;  %v1342_v11 = vadd.f32 %v1327_v50, %v6236_v17 }
 0x155   :  { %v1403_v52 = vrot.slane %v1020_v56, 2  ;;  %v1422_v23 = vadd.f32 %v1405_v28, %v1343_v39 }
 0x157   :  { %v1404_v60 = vsel %vm1352_vm2, %v1401_v51, %v1403_v52  ;;  %v1406_v3 = vsel %vm1352_vm2, %v1403_v52, %v1405_v28 }
 0x158   :  { %v1420_v17 = vadd.f32 %v1404_v60, %v1341_v36  ;;  %v1421_v21 = vadd.f32 %v1406_v3, %v1342_v11 }
 0x15d   :  { %v6325_v41 = vpop.f32.mrf.mxu0  ;;  %v6327_v24 = vpop.f32.mrf.mxu1 }
 0x15e   :  { %v1472_v34 = vrot.slane %v6325_v41, 3  ;;  %v1551_v3 = vrot.slane %v6327_v24, 4  ;;  %v1592_v24 = vadd.f32 %v6304_v9, %v6329_v27 }
 0x15f   :  { %v6338_v33 = vpop.f32.mrf.mxu0  ;;  %v6340_v61 = vpop.f32.mrf.mxu1 }
 0x160   :  { %v1471_v50 = vrot.slane %v6338_v33, 3 }
 0x161   :  { %v4931_v47 = vpop.f32.mrf.mxu0  ;;  %v6350_v35 = vpop.f32.mrf.mxu1 }
 0x162   :  { %v1476_v16 = vrot.slane %v4931_v47, 3  ;;  %v1473_v11 = vsel %vm1431_vm3, %v1471_v50, %v1472_v34 }
 0x163   :  { %v1118_v26 = vpop.f32.mrf.mxu0  ;;  %v6359_v30 = vpop.f32.mrf.mxu1 }
 0x164   :  { %v1474_v2 = vrot.slane %v1118_v26, 3  ;;  %v1555_v26 = vrot.slane %v6350_v35, 4  ;;  %v1553_v13 = vrot.slane %v6359_v30, 4 }
 0x165   :  { %v4934_v29 = vpop.f32.mrf.mxu0  ;;  %v4970_v56 = vpop.f32.mrf.mxu1 }
 0x166   :  { %v1480_v18 = vrot.slane %v4934_v29, 3  ;;  %v1477_v43 = vsel %vm1431_vm3, %v1474_v2, %v1476_v16  ;;  %v1559_v15 = vrot.slane %v4970_v56, 4  ;;  %v1475_v41 = vsel %vm1431_vm3, %v1472_v34, %v1474_v2 }
 0x167   :  { %v1128_v6 = vpop.f32.mrf.mxu0  ;;  %v1246_v42 = vpop.f32.mrf.mxu1  ;;  %v1496_v38 = vadd.f32 %v1477_v43, %v1417_v7 }
 0x168   :  { %v1478_v20 = vrot.slane %v1128_v6, 3  ;;  %v1557_v47 = vrot.slane %v1246_v42, 4  ;;  %v1495_v6 = vadd.f32 %v1475_v41, %v1416_v44  ;;  %v1602_v44 = vmax.f32 %v6373_v10, 0.0 }
 0x169   :  { %v4937_v37 = vpop.f32.mrf.mxu0  ;;  %v4973_v19 = vpop.f32.mrf.mxu1  ;;  %v1601_v10 = vmax.f32 %v6335_v59, 0.0 }
 0x16a   :  { %v1481_v46 = vsel %vm1431_vm3, %v1478_v20, %v1480_v18  ;;  %v1479_v49 = vsel %vm1431_vm3, %v1476_v16, %v1478_v20  ;;  %v1484_v52 = vrot.slane %v4937_v37, 3  ;;  %v1563_v25 = vrot.slane %v4973_v19, 4 }
 0x16b   :  { %v1498_v48 = vadd.f32 %v1481_v46, %v1419_v58  ;;  %v1138_v51 = vpop.f32.mrf.mxu0  ;;  %v1256_v31 = vpop.f32.mrf.mxu1  ;;  %v1497_v54 = vadd.f32 %v1479_v49, %v1418_v22  ;;  %v1560_v36 = vsel %vm1510_vm5, %v1557_v47, %v1559_v15  ;;  %v1558_v30 = vsel %vm1510_vm5, %v1555_v26, %v1557_v47 }
 0x16c   :  { %v1482_v53 = vrot.slane %v1138_v51, 3  ;;  %v1561_v32 = vrot.slane %v1256_v31, 4  ;;  %v1501_v62 = vadd.f32 %v1484_v52, %v1422_v23  ;;  %v1550_v16 = vrot.slane %v6340_v61, 4 }
 0x16d   :  { %v1577_v56 = vadd.f32 %v1560_v36, %v1498_v48  ;;  %v1576_v42 = vadd.f32 %v1558_v30, %v1497_v54  ;;  %v1494_v58 = vadd.f32 %v1473_v11, %v1415_v14  ;;  %v1554_v19 = vsel %vm1510_vm5, %v1551_v3, %v1553_v13  ;;  %v1631_v36 = vld [vmem:[%s7325_s4 + $0x18] sm:$0xff]  ;;  %v3974_v11 = vld [vmem:[%s7326_s5 + $0xa0] sm:$0xff] }
 0x16e   :  { %v1483_v55 = vsel %vm1431_vm3, %v1480_v18, %v1482_v53  ;;  %v1485_v39 = vsel %vm1431_vm3, %v1482_v53, %v1484_v52  ;;  %v1580_v0 = vadd.f32 %v1563_v25, %v1501_v62  ;;  %v1562_v33 = vsel %vm1510_vm5, %v1559_v15, %v1561_v32  ;;  %v1787_v30 = vld [vmem:[%s7326_s5 + $0x40] sm:$0xff] }
 0x16f   :  { %v1499_v28 = vadd.f32 %v1483_v55, %v1420_v17  ;;  %v1500_v29 = vadd.f32 %v1485_v39, %v1421_v21  ;;  %v1564_v35 = vsel %vm1510_vm5, %v1561_v32, %v1563_v25  ;;  %v1556_v18 = vsel %vm1510_vm5, %v1553_v13, %v1555_v26  ;;  %v1629_v39 = vld [vmem:[%s7325_s4 + $0x8] sm:$0xff] }
 0x170   :  { %v1611_v7 = vadd.f32 %v6304_v9, %v1580_v0  ;;  %v1575_v23 = vadd.f32 %v1556_v18, %v1496_v38  ;;  %v1608_v17 = vadd.f32 %v6304_v9, %v1577_v56  ;;  %v1574_v61 = vadd.f32 %v1554_v19, %v1495_v6  ;;  %v1630_v38 = vld [vmem:[%s7325_s4 + $0x10] sm:$0xff]  ;;  %v1783_v18 = vld [vmem:[%s7326_s5 + $0x20] sm:$0xff]  ;;  %v3965_v19 = vld [vmem:[%s7326_s5 + $0x58] sm:$0xff] }
 0x171   :  { %v1578_v60 = vadd.f32 %v1562_v33, %v1499_v28  ;;  %v1579_v2 = vadd.f32 %v1564_v35, %v1500_v29  ;;  %v1607_v34 = vadd.f32 %v6304_v9, %v1576_v42  ;;  %v1535_v14 = vadd.f32 %v6307_v12, %v6200_v1  ;;  %v1632_v28 = vld [vmem:[%s7325_s4 + $0x20] sm:$0xff]  ;;  %v1633_v29 = vld [vmem:[%s7325_s4 + $0x28] sm:$0xff]  ;;  %v1634_v56 = vld [vmem:[%s7325_s4 + $0x30] sm:$0xff] }
 0x172   :  { %v1619_v37 = vmax.f32 %v1611_v7, 0.0  ;;  %v1591_v15 = vadd.f32 %v6304_v9, %v6322_v5  ;;  %v1552_v27 = vsel %vm1510_vm5, %v1550_v16, %v1551_v3  ;;  %v1606_v47 = vadd.f32 %v6304_v9, %v1575_v23  ;;  %v1789_v0 = vld [vmem:[%s7326_s5 + $0x50] sm:$0xf]  ;;  %v3975_v33 = vld [vmem:[%s7326_s5 + $0xa8] sm:$0xf]  ;;  %v3970_v16 = vld [vmem:[%s7326_s5 + $0x80] sm:$0xff] }
 0x173   :  { %v1609_v20 = vadd.f32 %v6304_v9, %v1578_v60  ;;  %v1610_v22 = vadd.f32 %v6304_v9, %v1579_v2  ;;  %v1573_v48 = vadd.f32 %v1552_v27, %v1494_v58  ;;  %v1616_v51 = vmax.f32 %v1608_v17, 0.0  ;;  %5011 = vmatprep.subr.msk.mxu1 %vm1510_vm5, %v1789_v0  ;;  %v1788_v35 = vld [vmem:[%s7326_s5 + $0x48] sm:$0xff]  ;;  %v3973_v60 = vld [vmem:[%s7326_s5 + $0x98] sm:$0xff]  ;;  %v3972_v3 = vld [vmem:[%s7326_s5 + $0x90] sm:$0xff] }
 0x174   :  { %v1627_v43 = vmax.f32 %v1603_v45, %v1619_v37  ;;  %v1590_v1 = vadd.f32 %v6304_v9, %v6320_v4  ;;  %v1600_v12 = vmax.f32 %v1592_v24, 0.0  ;;  %v1605_v5 = vadd.f32 %v6304_v9, %v1574_v61  ;;  %5012 = vmatpush3.msk.msra.mxu1 %vm1510_vm5, %v1789_v0  ;;  %v1786_v2 = vld [vmem:[%s7326_s5 + $0x38] sm:$0xff]  ;;  %v1785_v6 = vld [vmem:[%s7326_s5 + $0x30] sm:$0xff]  ;;  %v3971_v42 = vld [vmem:[%s7326_s5 + $0x88] sm:$0xff] }
 0x175   :  { %v1618_v21 = vmax.f32 %v1610_v22, 0.0  ;;  %v1617_v46 = vmax.f32 %v1609_v20, 0.0  ;;  %v1615_v45 = vmax.f32 %v1607_v34, 0.0  ;;  %v1589_v31 = vadd.f32 %v6304_v9, %v1535_v14  ;;  %5013 = vmatprep.subr.mxu1 %v1788_v35  ;;  %v1784_v7 = vld [vmem:[%s7326_s5 + $0x28] sm:$0xff]  ;;  %v3969_v20 = vld [vmem:[%s7326_s5 + $0x78] sm:$0xff]  ;;  %v3968_v58 = vld [vmem:[%s7326_s5 + $0x70] sm:$0xff] }
 0x176   :  { %4975 = vmatpush3.msk.msra.mxu0 %vm1510_vm5, %v1627_v43  ;;  %v1599_v52 = vmax.f32 %v1591_v15, 0.0  ;;  %v1604_v25 = vadd.f32 %v6304_v9, %v1573_v48  ;;  %v1614_v53 = vmax.f32 %v1606_v47, 0.0  ;;  %v1624_v57 = vmax.f32 %v1600_v12, %v1616_v51  ;;  %v1628_v9 = vld [vmem:[%s7325_s4] sm:$0xff]  ;;  %5014 = vmatpush3.msra.mxu1 %v1788_v35  ;;  %v1782_v22 = vld [vmem:[%s7326_s5 + $0x18] sm:$0xff]  ;;  %v1781_v23 = vld [vmem:[%s7326_s5 + $0x10] sm:$0xff]  ;;  %s3767_s4 = sshll.u32 %s5513_s3, 4  ;;  %s3768_s4 = int_to_ptr.vmem [resolvable:$true] %s3767_s4 }
 0x177   :  { %v1626_v49 = vmax.f32 %v1602_v44, %v1618_v21  ;;  %4976 = vmatprep.subr.mxu0 %v5511_v40  ;;  %v1625_v59 = vmax.f32 %v1601_v10, %v1617_v46  ;;  %v1598_v4 = vmax.f32 %v1590_v1, 0.0  ;;  %v1613_v32 = vmax.f32 %v1605_v5, 0.0  ;;  %5015 = vmatprep.subr.mxu1 %v1787_v30  ;;  %v3967_v17 = vld [vmem:[%s7326_s5 + $0x68] sm:$0xff]  ;;  %v3966_v24 = vld [vmem:[%s7326_s5 + $0x60] sm:$0xff]  ;;  %v4007_v61 = vld [vmem:[%s7326_s5 + $0x158] sm:$0xf]  ;;  %p5494_p1 = scmp.lt.s32.totalorder %s3768_s4, %s3768_s4 }
 0x178   :  { %v1623_v50 = vmax.f32 %v1599_v52, %v1615_v45  ;;  %v1597_v26 = vmax.f32 %v1589_v31, 0.0  ;;  %v1612_v41 = vmax.f32 %v1604_v25, 0.0  ;;  %v1596_v54 = vmax.f32 %v1588_v8, 0.0  ;;  %5016 = vmatpush3.msra.mxu1 %v1787_v30  ;;  %v1780_v37 = vld [vmem:[%s7326_s5 + $0x8] sm:$0xff]  ;;  %v1779_v44 = vld [vmem:[%s7326_s5] sm:$0xff]  ;;  %v4006_v8 = vld [vmem:[%s7326_s5 + $0x150] sm:$0xff] }
 0x179   :  { %4977 = vmatpush3.msra.mxu0 %v1626_v49  ;;  %v1622_v13 = vmax.f32 %v1598_v4, %v1614_v53  ;;  %5017 = vmatprep.subr.mxu1 %v1786_v2  ;;  %v3991_v21 = vld [vmem:[%s7326_s5 + $0x100] sm:$0xf]  ;;  %v3982_v35 = vld [vmem:[%s7326_s5 + $0xb8] sm:$0xff]  ;;  %v3981_v30 = vld [vmem:[%s7326_s5 + $0xb0] sm:$0xff] }
 0x17a   :  { %4978 = vmatprep.subr.mxu0 %v5511_v40  ;;  %v1621_v62 = vmax.f32 %v1597_v26, %v1613_v32  ;;  %v1620_v55 = vmax.f32 %v1596_v54, %v1612_v41  ;;  %5018 = vmatpush3.msra.mxu1 %v1786_v2  ;;  %v4005_v26 = vld [vmem:[%s7326_s5 + $0x148] sm:$0xff]  ;;  %v3983_v0 = vld [vmem:[%s7326_s5 + $0xc0] sm:$0xff]  ;;  %v4023_v2 = vld [vmem:[%s7326_s5 + $0x1b0] sm:$0xf] }
 0x17b   :  { %4979 = vmatpush3.msra.mxu0 %v1625_v59  ;;  %5019 = vmatprep.subr.mxu1 %v1785_v6  ;;  %v3988_v54 = vld [vmem:[%s7326_s5 + $0xe8] sm:$0xff] }
 0x17c   :  { %4980 = vmatprep.subr.mxu0 %v5511_v40  ;;  %5020 = vmatpush3.msra.mxu1 %v1785_v6  ;;  %v4022_v6 = vld [vmem:[%s7326_s5 + $0x1a8] sm:$0xff] }
 0x17d   :  { %4981 = vmatpush3.msra.mxu0 %v1624_v57  ;;  %5021 = vmatprep.subr.mxu1 %v1784_v7  ;;  %v3990_v57 = vld [vmem:[%s7326_s5 + $0xf8] sm:$0xff] }
 0x17e   :  { %4982 = vmatprep.subr.mxu0 %v5511_v40  ;;  %5022 = vmatpush3.msra.mxu1 %v1784_v7  ;;  %v4021_v7 = vld [vmem:[%s7326_s5 + $0x1a0] sm:$0xff] }
 0x17f   :  { %4983 = vmatpush3.msra.mxu0 %v1623_v50  ;;  %5023 = vmatprep.subr.mxu1 %v1783_v18  ;;  %v3989_v50 = vld [vmem:[%s7326_s5 + $0xf0] sm:$0xff] }
 0x180   :  { %4984 = vmatprep.subr.mxu0 %v5511_v40  ;;  %5024 = vmatpush3.msra.mxu1 %v1783_v18  ;;  %v4020_v18 = vld [vmem:[%s7326_s5 + $0x198] sm:$0xff] }
 0x181   :  { %4985 = vmatpush3.msra.mxu0 %v1622_v13  ;;  %5025 = vmatprep.subr.mxu1 %v1782_v22 }
 0x182   :  { %4986 = vmatprep.subr.mxu0 %v5511_v40  ;;  %5026 = vmatpush3.msra.mxu1 %v1782_v22  ;;  %v4019_v22 = vld [vmem:[%s7326_s5 + $0x190] sm:$0xff] }
 0x183   :  { %4987 = vmatpush3.msra.mxu0 %v1621_v62  ;;  %5027 = vmatprep.subr.mxu1 %v1781_v23  ;;  %v4004_v62 = vld [vmem:[%s7326_s5 + $0x140] sm:$0xff] }
 0x184   :  { %4988 = vmatprep.subr.mxu0 %v5511_v40  ;;  %5028 = vmatpush3.msra.mxu1 %v1781_v23  ;;  %v4018_v23 = vld [vmem:[%s7326_s5 + $0x188] sm:$0xff] }
 0x185   :  { %4989 = vmatpush3.msra.mxu0 %v1620_v55  ;;  %5029 = vmatprep.subr.mxu1 %v1780_v37  ;;  %v3987_v55 = vld [vmem:[%s7326_s5 + $0xe0] sm:$0xff] }
 0x186   :  { %4991 = vmatmul.mubr.msk.f32.vlgmr.msra.gmra.mxu0 %vm1635_vm6, %v1628_v9  ;;  %5039 = vmatprep.subr.msk.mxu0 %vm1510_vm5, %v3975_v33  ;;  %v4003_v9 = vld [vmem:[%s7326_s5 + $0x138] sm:$0xff] }
 0x187   :  { %4993 = vmatprep.mubr.msk.f32.mxu0 %vm5512_vm4, %v5511_v40  ;;  %5040 = vmatpush3.msk.msra.mxu0 %vm1510_vm5, %v3975_v33  ;;  %v3999_v33 = vld [vmem:[%s7326_s5 + $0x118] sm:$0xff] }
 0x188   :  { %5041 = vmatprep.subr.mxu0 %v3974_v11  ;;  %5030 = vmatpush3.msra.mxu1 %v1780_v37  ;;  %v4017_v37 = vld [vmem:[%s7326_s5 + $0x180] sm:$0xff] }
 0x189   :  { %5042 = vmatpush3.msra.mxu0 %v3974_v11  ;;  %5031 = vmatprep.subr.mxu1 %v1779_v44  ;;  %v3998_v11 = vld [vmem:[%s7326_s5 + $0x110] sm:$0xff] }
 0x18a   :  { %4994 = vmatmul.mubr.msk.f32.gmra.mxu0 %vm1635_vm6, %v1629_v39  ;;  %5043 = vmatprep.subr.mxu0 %v3973_v60  ;;  %v3986_v39 = vld [vmem:[%s7326_s5 + $0xd8] sm:$0xff] }
 0x18b   :  { %4996 = vmatprep.mubr.msk.f32.mxu0 %vm5512_vm4, %v5511_v40  ;;  %5044 = vmatpush3.msra.mxu0 %v3973_v60  ;;  %v3997_v60 = vld [vmem:[%s7326_s5 + $0x108] sm:$0xff] }
 0x18c   :  { %5045 = vmatprep.subr.mxu0 %v3972_v3  ;;  %5032 = vmatpush3.msra.mxu1 %v1779_v44  ;;  %v4016_v44 = vld [vmem:[%s7326_s5 + $0x178] sm:$0xff] }
 0x18d   :  { %5046 = vmatpush3.msra.mxu0 %v3972_v3  ;;  %5067 = vmatprep.subr.msk.mxu1 %vm1510_vm5, %v3991_v21  ;;  %v2300_v3 = vld [vmem:[%s7327_s6 + $0x50] sm:$0xf] }
 0x18e   :  { %4997 = vmatmul.mubr.msk.f32.gmra.mxu0 %vm1635_vm6, %v1630_v38  ;;  %5047 = vmatprep.subr.mxu0 %v3971_v42  ;;  %v4002_v38 = vld [vmem:[%s7326_s5 + $0x130] sm:$0xff] }
 0x18f   :  { %4999 = vmatprep.mubr.msk.f32.mxu0 %vm5512_vm4, %v5511_v40  ;;  %5048 = vmatpush3.msra.mxu0 %v3971_v42  ;;  %v2299_v42 = vld [vmem:[%s7327_s6 + $0x48] sm:$0xff] }
 0x190   :  { %5049 = vmatprep.subr.mxu0 %v3970_v16 }
 0x191   :  { %5050 = vmatpush3.msra.mxu0 %v3970_v16  ;;  %v2298_v16 = vld [vmem:[%s7327_s6 + $0x40] sm:$0xff] }
 0x192   :  { %5000 = vmatmul.mubr.msk.f32.gmra.mxu0 %vm1635_vm6, %v1631_v36  ;;  %5051 = vmatprep.subr.mxu0 %v3969_v20  ;;  %v3985_v36 = vld [vmem:[%s7326_s5 + $0xd0] sm:$0xff] }
 0x193   :  { %5002 = vmatprep.mubr.msk.f32.mxu0 %vm5512_vm4, %v5511_v40  ;;  %5052 = vmatpush3.msra.mxu0 %v3969_v20  ;;  %v2297_v20 = vld [vmem:[%s7327_s6 + $0x38] sm:$0xff] }
 0x194   :  { %5053 = vmatprep.subr.mxu0 %v3968_v58 }
 0x195   :  { %5054 = vmatpush3.msra.mxu0 %v3968_v58  ;;  %v2296_v58 = vld [vmem:[%s7327_s6 + $0x30] sm:$0xff] }
 0x196   :  { %5003 = vmatmul.mubr.msk.f32.gmra.mxu0 %vm1635_vm6, %v1632_v28  ;;  %5055 = vmatprep.subr.mxu0 %v3967_v17  ;;  %v4001_v28 = vld [vmem:[%s7326_s5 + $0x128] sm:$0xff] }
 0x197   :  { %5005 = vmatprep.mubr.msk.f32.mxu0 %vm5512_vm4, %v5511_v40  ;;  %5056 = vmatpush3.msra.mxu0 %v3967_v17  ;;  %v2295_v17 = vld [vmem:[%s7327_s6 + $0x28] sm:$0xff] }
 0x198   :  { %5057 = vmatprep.subr.mxu0 %v3966_v24 }
 0x199   :  { %5058 = vmatpush3.msra.mxu0 %v3966_v24  ;;  %v2294_v24 = vld [vmem:[%s7327_s6 + $0x20] sm:$0xff] }
 0x19a   :  { %5006 = vmatmul.mubr.msk.f32.gmra.mxu0 %vm1635_vm6, %v1633_v29  ;;  %5059 = vmatprep.subr.mxu0 %v3965_v19  ;;  %v3984_v29 = vld [vmem:[%s7326_s5 + $0xc8] sm:$0xff] }
 0x19b   :  { %5008 = vmatprep.mubr.msk.f32.mxu0 %vm5512_vm4, %v5511_v40  ;;  %5060 = vmatpush3.msra.mxu0 %v3965_v19  ;;  %v2293_v19 = vld [vmem:[%s7327_s6 + $0x18] sm:$0xff] }
 0x19c   :  { %5095 = vmatprep.subr.msk.mxu0 %vm1510_vm5, %v4007_v61 }
 0x19e   :  { %5009 = vmatmul.mubr.msk.f32.gmra.mxu0 %vm1635_vm6, %v1634_v56  ;;  %v4000_v56 = vld [vmem:[%s7326_s5 + $0x120] sm:$0xff] }
 0x246   :  { %v1726_v34 = vpop.f32.mrf.mxu0 }
 0x248   :  { %v4992_v43 = vpop.f32.mrf.mxu0 }
 0x249   :  { %v2291_v43 = vld [vmem:[%s7327_s6 + $0x8] sm:$0xff] }
 0x24a   :  { %v1731_v46 = vpop.f32.mrf.mxu0 }
 0x24c   :  { %v4995_v14 = vpop.f32.mrf.mxu0 }
 0x24d   :  { %v2290_v14 = vld [vmem:[%s7327_s6] sm:$0xff] }
 0x24e   :  { %v1736_v15 = vpop.f32.mrf.mxu0 }
 0x250   :  { %v4998_v27 = vpop.f32.mrf.mxu0 }
 0x251   :  { %v4060_v27 = vld [vmem:[%s7327_s6 + $0x100] sm:$0xf] }
 0x252   :  { %v1741_v49 = vpop.f32.mrf.mxu0 }
 0x253   :  { %v1764_v47 = vrot.slane %v1741_v49, 4 }
 0x254   :  { %v5001_v10 = vpop.f32.mrf.mxu0 }
 0x255   :  { %v4059_v10 = vld [vmem:[%s7327_s6 + $0xf8] sm:$0xff] }
 0x256   :  { %v1746_v48 = vpop.f32.mrf.mxu0 }
 0x257   :  { %v1765_v51 = vrot.slane %v1746_v48, 4  ;;  %v4042_v48 = vld [vmem:[%s7327_s6 + $0x98] sm:$0xff] }
 0x258   :  { %v5004_v63 = vpop.f32.mrf.mxu0 }
 0x259   :  { %v1766_v1 = vsel %vm1510_vm5, %v1764_v47, %v1765_v51  ;;  %v4058_v47 = vld [vmem:[%s7327_s6 + $0xf0] sm:$0xff]  ;;  %v4057_v63 = vld [vmem:[%s7327_s6 + $0xe8] sm:$0xff] }
 0x25a   :  { %v6547_v12 = vmax.f32 %v1726_v34, %v1766_v1  ;;  %v1751_v5 = vpop.f32.mrf.mxu0  ;;  %v4014_v34 = vld [vmem:[%s7326_s5 + $0x168] sm:$0xff] }
 0x25b   :  { %v1767_v45 = vrot.slane %v1751_v5, 4  ;;  %v4040_v1 = vld [vmem:[%s7327_s6 + $0x88] sm:$0xff]  ;;  %v4056_v5 = vld [vmem:[%s7327_s6 + $0xe0] sm:$0xff] }
 0x25c   :  { %v5007_v59 = vpop.f32.mrf.mxu0  ;;  %5033 = vmatprep.mubr.msk.f32.mxu1 %vm1790_vm7, %v6547_v12  ;;  %5061 = vmatprep.mubr.msk.f32.mxu0 %vm1790_vm7, %v6547_v12 }
 0x25d   :  { %v1768_v31 = vsel %vm1510_vm5, %v1765_v51, %v1767_v45  ;;  %v4041_v51 = vld [vmem:[%s7327_s6 + $0x90] sm:$0xff]  ;;  %v4055_v59 = vld [vmem:[%s7327_s6 + $0xd8] sm:$0xff] }
 0x25e   :  { %v6554_v52 = vmax.f32 %v1731_v46, %v1768_v31  ;;  %v1756_v25 = vpop.f32.mrf.mxu0  ;;  %v4013_v46 = vld [vmem:[%s7326_s5 + $0x160] sm:$0xff]  ;;  %v4038_v31 = vld [vmem:[%s7327_s6 + $0x78] sm:$0xff] }
 0x25f   :  { %v1769_v53 = vrot.slane %v1756_v25, 4  ;;  %v4054_v25 = vld [vmem:[%s7327_s6 + $0xd0] sm:$0xff] }
 0x260   :  { %5034 = vmatmul.mubr.msk.f32.vlgmr.msra.gmra.mxu1 %vm1790_vm7, %v6554_v52  ;;  %5062 = vmatmul.mubr.msk.f32.vlgmr.msra.gmra.mxu0 %vm1790_vm7, %v6554_v52  ;;  %v5010_v4 = vpop.f32.mrf.mxu0 }
 0x261   :  { %v1770_v32 = vsel %vm1510_vm5, %v1767_v45, %v1769_v53  ;;  %5068 = vmatpush3.msk.msra.mxu1 %vm1510_vm5, %v3991_v21  ;;  %5096 = vmatpush3.msk.msra.mxu0 %vm1510_vm5, %v4007_v61  ;;  %v6577_v13 = vmax.f32 %v1741_v49, %v1769_v53  ;;  %v4015_v21 = vld [vmem:[%s7326_s5 + $0x170] sm:$0xff]  ;;  %v4043_v49 = vld [vmem:[%s7327_s6 + $0xa0] sm:$0xff] }
 0x262   :  { %v6575_v41 = vmax.f32 %v1736_v15, %v1770_v32  ;;  %5069 = vmatprep.subr.mxu1 %v3990_v57  ;;  %5097 = vmatprep.subr.mxu0 %v4006_v8  ;;  %v2292_v61 = vld [vmem:[%s7327_s6 + $0x10] sm:$0xff]  ;;  %v4044_v15 = vld [vmem:[%s7327_s6 + $0xa8] sm:$0xf]  ;;  %v4039_v45 = vld [vmem:[%s7327_s6 + $0x80] sm:$0xff] }
 0x263   :  { %5070 = vmatpush3.msra.mxu1 %v3990_v57  ;;  %5098 = vmatpush3.msra.mxu0 %v4006_v8  ;;  %v4037_v53 = vld [vmem:[%s7327_s6 + $0x70] sm:$0xff]  ;;  %v4053_v57 = vld [vmem:[%s7327_s6 + $0xc8] sm:$0xff]  ;;  %v4052_v4 = vld [vmem:[%s7327_s6 + $0xc0] sm:$0xff] }
 0x264   :  { %5071 = vmatprep.subr.mxu1 %v3989_v50  ;;  %5099 = vmatprep.subr.mxu0 %v4005_v26  ;;  %v4036_v8 = vld [vmem:[%s7327_s6 + $0x68] sm:$0xff]  ;;  %v4035_v32 = vld [vmem:[%s7327_s6 + $0x60] sm:$0xff] }
 0x265   :  { %5036 = vmatprep.mubr.msk.f32.mxu1 %vm1790_vm7, %v6575_v41  ;;  %5064 = vmatprep.mubr.msk.f32.mxu0 %vm1790_vm7, %v6575_v41 }
 0x266   :  { %5072 = vmatpush3.msra.mxu1 %v3989_v50  ;;  %5100 = vmatpush3.msra.mxu0 %v4005_v26  ;;  %v4051_v50 = vld [vmem:[%s7327_s6 + $0xb8] sm:$0xff] }
 0x267   :  { %5037 = vmatmul.mubr.msk.f32.gmra.mxu1 %vm1790_vm7, %v6577_v13  ;;  %5065 = vmatmul.mubr.msk.f32.gmra.mxu0 %vm1790_vm7, %v6577_v13  ;;  %v4034_v26 = vld [vmem:[%s7327_s6 + $0x58] sm:$0xff] }
 0x268   :  { %5073 = vmatprep.subr.mxu1 %v3988_v54  ;;  %5101 = vmatprep.subr.mxu0 %v4004_v62 }
 0x269   :  { %5074 = vmatpush3.msra.mxu1 %v3988_v54  ;;  %5089 = vmatprep.mubr.msk.f32.mxu1 %vm1790_vm7, %v6547_v12  ;;  %v4050_v54 = vld [vmem:[%s7327_s6 + $0xb0] sm:$0xff] }
 0x26a   :  { %5102 = vmatpush3.msra.mxu0 %v4004_v62  ;;  %5117 = vmatprep.mubr.msk.f32.mxu0 %vm1790_vm7, %v6547_v12  ;;  %v4076_v62 = vld [vmem:[%s7327_s6 + $0x158] sm:$0xf] }
 0x26b   :  { %5075 = vmatprep.subr.mxu1 %v3987_v55  ;;  %5103 = vmatprep.subr.mxu0 %v4003_v9 }
 0x26c   :  { %5076 = vmatpush3.msra.mxu1 %v3987_v55  ;;  %5104 = vmatpush3.msra.mxu0 %v4003_v9  ;;  %v4092_v55 = vld [vmem:[%s7327_s6 + $0x1b0] sm:$0xf] }
 0x26d   :  { %5077 = vmatprep.subr.mxu1 %v3986_v39  ;;  %5105 = vmatprep.subr.mxu0 %v4002_v38  ;;  %v4075_v9 = vld [vmem:[%s7327_s6 + $0x150] sm:$0xff] }
 0x26e   :  { %5078 = vmatpush3.msra.mxu1 %v3986_v39  ;;  %5106 = vmatpush3.msra.mxu0 %v4002_v38  ;;  %v4091_v39 = vld [vmem:[%s7327_s6 + $0x1a8] sm:$0xff] }
 0x26f   :  { %5079 = vmatprep.subr.mxu1 %v3985_v36  ;;  %5107 = vmatprep.subr.mxu0 %v4001_v28  ;;  %v4074_v38 = vld [vmem:[%s7327_s6 + $0x148] sm:$0xff] }
 0x270   :  { %5080 = vmatpush3.msra.mxu1 %v3985_v36  ;;  %5108 = vmatpush3.msra.mxu0 %v4001_v28  ;;  %v4090_v36 = vld [vmem:[%s7327_s6 + $0x1a0] sm:$0xff] }
 0x271   :  { %5081 = vmatprep.subr.mxu1 %v3984_v29  ;;  %5109 = vmatprep.subr.mxu0 %v4000_v56  ;;  %v4073_v28 = vld [vmem:[%s7327_s6 + $0x140] sm:$0xff] }
 0x272   :  { %5082 = vmatpush3.msra.mxu1 %v3984_v29  ;;  %5110 = vmatpush3.msra.mxu0 %v4000_v56  ;;  %v4089_v29 = vld [vmem:[%s7327_s6 + $0x198] sm:$0xff] }
 0x273   :  { %5083 = vmatprep.subr.mxu1 %v3983_v0  ;;  %5111 = vmatprep.subr.mxu0 %v3999_v33  ;;  %v4072_v56 = vld [vmem:[%s7327_s6 + $0x138] sm:$0xff] }
 0x274   :  { %5084 = vmatpush3.msra.mxu1 %v3983_v0  ;;  %5112 = vmatpush3.msra.mxu0 %v3999_v33  ;;  %v4088_v0 = vld [vmem:[%s7327_s6 + $0x190] sm:$0xff] }
 0x275   :  { %5085 = vmatprep.subr.mxu1 %v3982_v35  ;;  %5113 = vmatprep.subr.mxu0 %v3998_v11  ;;  %v4071_v33 = vld [vmem:[%s7327_s6 + $0x130] sm:$0xff] }
 0x276   :  { %5086 = vmatpush3.msra.mxu1 %v3982_v35  ;;  %5114 = vmatpush3.msra.mxu0 %v3998_v11  ;;  %v4070_v35 = vld [vmem:[%s7327_s6 + $0x128] sm:$0xff]  ;;  %v4086_v11 = vld [vmem:[%s7327_s6 + $0x180] sm:$0xff] }
 0x277   :  { %5087 = vmatprep.subr.mxu1 %v3981_v30  ;;  %5115 = vmatprep.subr.mxu0 %v3997_v60 }
 0x278   :  { %5088 = vmatpush3.msra.mxu1 %v3981_v30  ;;  %5116 = vmatpush3.msra.mxu0 %v3997_v60  ;;  %v4069_v30 = vld [vmem:[%s7327_s6 + $0x120] sm:$0xff]  ;;  %v4085_v60 = vld [vmem:[%s7327_s6 + $0x178] sm:$0xff] }
 0x279   :  { %5090 = vmatmul.mubr.msk.f32.vlgmr.msra.gmra.mxu1 %vm1790_vm7, %v6554_v52  ;;  %5118 = vmatmul.mubr.msk.f32.vlgmr.msra.gmra.mxu0 %vm1790_vm7, %v6554_v52 }
 0x27a   :  { %5123 = vmatprep.subr.msk.mxu1 %vm1510_vm5, %v4023_v2  ;;  %5151 = vmatprep.subr.msk.mxu0 %vm1510_vm5, %v2300_v3 }
 0x27b   :  { %5092 = vmatprep.mubr.msk.f32.mxu1 %vm1790_vm7, %v6575_v41  ;;  %5120 = vmatprep.mubr.msk.f32.mxu0 %vm1790_vm7, %v6575_v41 }
 0x27c   :  { %5124 = vmatpush3.msk.msra.mxu1 %vm1510_vm5, %v4023_v2  ;;  %5152 = vmatpush3.msk.msra.mxu0 %vm1510_vm5, %v2300_v3  ;;  %v4068_v2 = vld [vmem:[%s7327_s6 + $0x118] sm:$0xff]  ;;  %v4084_v3 = vld [vmem:[%s7327_s6 + $0x170] sm:$0xff] }
 0x27d   :  { %5125 = vmatprep.subr.mxu1 %v4022_v6  ;;  %5153 = vmatprep.subr.mxu0 %v2299_v42 }
 0x27e   :  { %5126 = vmatpush3.msra.mxu1 %v4022_v6  ;;  %5154 = vmatpush3.msra.mxu0 %v2299_v42  ;;  %v4067_v6 = vld [vmem:[%s7327_s6 + $0x110] sm:$0xff]  ;;  %v4083_v42 = vld [vmem:[%s7327_s6 + $0x168] sm:$0xff] }
 0x27f   :  { %5093 = vmatmul.mubr.msk.f32.gmra.mxu1 %vm1790_vm7, %v6577_v13  ;;  %5121 = vmatmul.mubr.msk.f32.gmra.mxu0 %vm1790_vm7, %v6577_v13 }
 0x280   :  { %5127 = vmatprep.subr.mxu1 %v4021_v7  ;;  %5155 = vmatprep.subr.mxu0 %v2298_v16 }
 0x281   :  { %5128 = vmatpush3.msra.mxu1 %v4021_v7  ;;  %5145 = vmatprep.mubr.msk.f32.mxu1 %vm1790_vm7, %v6547_v12  ;;  %v4066_v7 = vld [vmem:[%s7327_s6 + $0x108] sm:$0xff] }
 0x282   :  { %5156 = vmatpush3.msra.mxu0 %v2298_v16  ;;  %5173 = vmatprep.mubr.msk.f32.mxu0 %vm1790_vm7, %v6547_v12  ;;  %v4082_v16 = vld [vmem:[%s7327_s6 + $0x160] sm:$0xff] }
 0x283   :  { %5129 = vmatprep.subr.mxu1 %v4020_v18  ;;  %5157 = vmatprep.subr.mxu0 %v2297_v20 }
 0x284   :  { %5130 = vmatpush3.msra.mxu1 %v4020_v18  ;;  %5158 = vmatpush3.msra.mxu0 %v2297_v20 }
 0x285   :  { %5131 = vmatprep.subr.mxu1 %v4019_v22  ;;  %5159 = vmatprep.subr.mxu0 %v2296_v58 }
 0x286   :  { %5132 = vmatpush3.msra.mxu1 %v4019_v22  ;;  %5160 = vmatpush3.msra.mxu0 %v2296_v58 }
 0x287   :  { %5133 = vmatprep.subr.mxu1 %v4018_v23  ;;  %5161 = vmatprep.subr.mxu0 %v2295_v17 }
 0x288   :  { %5134 = vmatpush3.msra.mxu1 %v4018_v23  ;;  %5162 = vmatpush3.msra.mxu0 %v2295_v17 }
 0x289   :  { %5135 = vmatprep.subr.mxu1 %v4017_v37  ;;  %5163 = vmatprep.subr.mxu0 %v2294_v24 }
 0x28a   :  { %5136 = vmatpush3.msra.mxu1 %v4017_v37  ;;  %5164 = vmatpush3.msra.mxu0 %v2294_v24 }
 0x28b   :  { %5137 = vmatprep.subr.mxu1 %v4016_v44  ;;  %5165 = vmatprep.subr.mxu0 %v2293_v19 }
 0x28c   :  { %5138 = vmatpush3.msra.mxu1 %v4016_v44  ;;  %5166 = vmatpush3.msra.mxu0 %v2293_v19 }
 0x28d   :  { %5139 = vmatprep.subr.mxu1 %v4015_v21  ;;  %5167 = vmatprep.subr.mxu0 %v2292_v61 }
 0x28e   :  { %5140 = vmatpush3.msra.mxu1 %v4015_v21  ;;  %5168 = vmatpush3.msra.mxu0 %v2292_v61 }
 0x28f   :  { %5141 = vmatprep.subr.mxu1 %v4014_v34  ;;  %5169 = vmatprep.subr.mxu0 %v2291_v43 }
 0x290   :  { %5142 = vmatpush3.msra.mxu1 %v4014_v34  ;;  %5170 = vmatpush3.msra.mxu0 %v2291_v43 }
 0x291   :  { %5143 = vmatprep.subr.mxu1 %v4013_v46  ;;  %5171 = vmatprep.subr.mxu0 %v2290_v14 }
 0x292   :  { %5144 = vmatpush3.msra.mxu1 %v4013_v46  ;;  %5172 = vmatpush3.msra.mxu0 %v2290_v14 }
 0x293   :  { %5146 = vmatmul.mubr.msk.f32.vlgmr.msra.gmra.mxu1 %vm1790_vm7, %v6554_v52  ;;  %5174 = vmatmul.mubr.msk.f32.vlgmr.msra.gmra.mxu0 %vm1790_vm7, %v6554_v52 }
 0x294   :  { %5179 = vmatprep.subr.msk.mxu1 %vm1510_vm5, %v4044_v15  ;;  %5207 = vmatprep.subr.msk.mxu0 %vm1510_vm5, %v4060_v27 }
 0x295   :  { %5148 = vmatprep.mubr.msk.f32.mxu1 %vm1790_vm7, %v6575_v41  ;;  %5176 = vmatprep.mubr.msk.f32.mxu0 %vm1790_vm7, %v6575_v41 }
 0x296   :  { %5180 = vmatpush3.msk.msra.mxu1 %vm1510_vm5, %v4044_v15  ;;  %5208 = vmatpush3.msk.msra.mxu0 %vm1510_vm5, %v4060_v27 }
 0x297   :  { %5181 = vmatprep.subr.mxu1 %v4043_v49  ;;  %5209 = vmatprep.subr.mxu0 %v4059_v10 }
 0x298   :  { %5182 = vmatpush3.msra.mxu1 %v4043_v49  ;;  %5210 = vmatpush3.msra.mxu0 %v4059_v10 }
 0x299   :  { %5149 = vmatmul.mubr.msk.f32.gmra.mxu1 %vm1790_vm7, %v6577_v13  ;;  %5177 = vmatmul.mubr.msk.f32.gmra.mxu0 %vm1790_vm7, %v6577_v13 }
 0x29a   :  { %5183 = vmatprep.subr.mxu1 %v4042_v48  ;;  %5211 = vmatprep.subr.mxu0 %v4058_v47 }
 0x29b   :  { %5184 = vmatpush3.msra.mxu1 %v4042_v48  ;;  %5201 = vmatprep.mubr.msk.f32.mxu1 %vm1790_vm7, %v6547_v12 }
 0x29c   :  { %5212 = vmatpush3.msra.mxu0 %v4058_v47  ;;  %5229 = vmatprep.mubr.msk.f32.mxu0 %vm1790_vm7, %v6547_v12 }
 0x29d   :  { %5185 = vmatprep.subr.mxu1 %v4041_v51  ;;  %5213 = vmatprep.subr.mxu0 %v4057_v63 }
 0x29e   :  { %5186 = vmatpush3.msra.mxu1 %v4041_v51  ;;  %5214 = vmatpush3.msra.mxu0 %v4057_v63 }
 0x29f   :  { %5187 = vmatprep.subr.mxu1 %v4040_v1  ;;  %5215 = vmatprep.subr.mxu0 %v4056_v5 }
 0x2a0   :  { %5188 = vmatpush3.msra.mxu1 %v4040_v1  ;;  %5216 = vmatpush3.msra.mxu0 %v4056_v5 }
 0x2a1   :  { %5189 = vmatprep.subr.mxu1 %v4039_v45  ;;  %5217 = vmatprep.subr.mxu0 %v4055_v59 }
 0x2a2   :  { %5190 = vmatpush3.msra.mxu1 %v4039_v45  ;;  %5218 = vmatpush3.msra.mxu0 %v4055_v59 }
 0x2a3   :  { %5191 = vmatprep.subr.mxu1 %v4038_v31  ;;  %5219 = vmatprep.subr.mxu0 %v4054_v25 }
 0x2a4   :  { %5192 = vmatpush3.msra.mxu1 %v4038_v31  ;;  %5220 = vmatpush3.msra.mxu0 %v4054_v25 }
 0x2a5   :  { %5193 = vmatprep.subr.mxu1 %v4037_v53  ;;  %5221 = vmatprep.subr.mxu0 %v4053_v57 }
 0x2a6   :  { %5194 = vmatpush3.msra.mxu1 %v4037_v53  ;;  %5222 = vmatpush3.msra.mxu0 %v4053_v57 }
 0x2a7   :  { %5195 = vmatprep.subr.mxu1 %v4036_v8  ;;  %5223 = vmatprep.subr.mxu0 %v4052_v4 }
 0x2a8   :  { %5196 = vmatpush3.msra.mxu1 %v4036_v8  ;;  %5224 = vmatpush3.msra.mxu0 %v4052_v4 }
 0x2a9   :  { %5197 = vmatprep.subr.mxu1 %v4035_v32  ;;  %5225 = vmatprep.subr.mxu0 %v4051_v50 }
 0x2aa   :  { %5198 = vmatpush3.msra.mxu1 %v4035_v32  ;;  %5226 = vmatpush3.msra.mxu0 %v4051_v50 }
 0x2ab   :  { %5199 = vmatprep.subr.mxu1 %v4034_v26  ;;  %5227 = vmatprep.subr.mxu0 %v4050_v54 }
 0x2ac   :  { %5200 = vmatpush3.msra.mxu1 %v4034_v26  ;;  %5228 = vmatpush3.msra.mxu0 %v4050_v54 }
 0x2ad   :  { %5202 = vmatmul.mubr.msk.f32.vlgmr.msra.gmra.mxu1 %vm1790_vm7, %v6554_v52  ;;  %5230 = vmatmul.mubr.msk.f32.vlgmr.msra.gmra.mxu0 %vm1790_vm7, %v6554_v52 }
 0x2ae   :  { %5235 = vmatprep.subr.msk.mxu1 %vm1510_vm5, %v4076_v62  ;;  %5263 = vmatprep.subr.msk.mxu0 %vm1510_vm5, %v4092_v55 }
 0x2af   :  { %5204 = vmatprep.mubr.msk.f32.mxu1 %vm1790_vm7, %v6575_v41  ;;  %5232 = vmatprep.mubr.msk.f32.mxu0 %vm1790_vm7, %v6575_v41 }
 0x2b0   :  { %5236 = vmatpush3.msk.msra.mxu1 %vm1510_vm5, %v4076_v62  ;;  %5264 = vmatpush3.msk.msra.mxu0 %vm1510_vm5, %v4092_v55 }
 0x2b1   :  { %5237 = vmatprep.subr.mxu1 %v4075_v9  ;;  %5265 = vmatprep.subr.mxu0 %v4091_v39 }
 0x2b2   :  { %5238 = vmatpush3.msra.mxu1 %v4075_v9  ;;  %5266 = vmatpush3.msra.mxu0 %v4091_v39 }
 0x2b3   :  { %5205 = vmatmul.mubr.msk.f32.gmra.mxu1 %vm1790_vm7, %v6577_v13  ;;  %5233 = vmatmul.mubr.msk.f32.gmra.mxu0 %vm1790_vm7, %v6577_v13 }
 0x2b4   :  { %5239 = vmatprep.subr.mxu1 %v4074_v38  ;;  %5267 = vmatprep.subr.mxu0 %v4090_v36 }
 0x2b5   :  { %5240 = vmatpush3.msra.mxu1 %v4074_v38  ;;  %5257 = vmatprep.mubr.msk.f32.mxu1 %vm1790_vm7, %v6547_v12 }
 0x2b6   :  { %5268 = vmatpush3.msra.mxu0 %v4090_v36  ;;  %5285 = vmatprep.mubr.msk.f32.mxu0 %vm1790_vm7, %v6547_v12  ;;  %v4087_v12 = vld [vmem:[%s7327_s6 + $0x188] sm:$0xff] }
 0x2b7   :  { %5241 = vmatprep.subr.mxu1 %v4073_v28  ;;  %5269 = vmatprep.subr.mxu0 %v4089_v29 }
 0x2b8   :  { %5242 = vmatpush3.msra.mxu1 %v4073_v28  ;;  %5270 = vmatpush3.msra.mxu0 %v4089_v29 }
 0x2b9   :  { %5243 = vmatprep.subr.mxu1 %v4072_v56  ;;  %5271 = vmatprep.subr.mxu0 %v4088_v0 }
 0x2ba   :  { %5244 = vmatpush3.msra.mxu1 %v4072_v56  ;;  %5272 = vmatpush3.msra.mxu0 %v4088_v0 }
 0x2bb   :  { %5245 = vmatprep.subr.mxu1 %v4071_v33  ;;  %5273 = vmatprep.subr.mxu0 %v4087_v12 }
 0x2bc   :  { %5246 = vmatpush3.msra.mxu1 %v4071_v33  ;;  %5274 = vmatpush3.msra.mxu0 %v4087_v12 }
 0x2bd   :  { %5247 = vmatprep.subr.mxu1 %v4070_v35  ;;  %5275 = vmatprep.subr.mxu0 %v4086_v11 }
 0x2be   :  { %5248 = vmatpush3.msra.mxu1 %v4070_v35  ;;  %5276 = vmatpush3.msra.mxu0 %v4086_v11 }
 0x2bf   :  { %5249 = vmatprep.subr.mxu1 %v4069_v30  ;;  %5277 = vmatprep.subr.mxu0 %v4085_v60 }
 0x2c0   :  { %5250 = vmatpush3.msra.mxu1 %v4069_v30  ;;  %5278 = vmatpush3.msra.mxu0 %v4085_v60 }
 0x2c1   :  { %5251 = vmatprep.subr.mxu1 %v4068_v2  ;;  %5279 = vmatprep.subr.mxu0 %v4084_v3 }
 0x2c2   :  { %5252 = vmatpush3.msra.mxu1 %v4068_v2  ;;  %5280 = vmatpush3.msra.mxu0 %v4084_v3 }
 0x2c3   :  { %5253 = vmatprep.subr.mxu1 %v4067_v6  ;;  %5281 = vmatprep.subr.mxu0 %v4083_v42 }
 0x2c4   :  { %5254 = vmatpush3.msra.mxu1 %v4067_v6  ;;  %5282 = vmatpush3.msra.mxu0 %v4083_v42 }
 0x2c5   :  { %5255 = vmatprep.subr.mxu1 %v4066_v7  ;;  %5283 = vmatprep.subr.mxu0 %v4082_v16 }
 0x2c6   :  { %5256 = vmatpush3.msra.mxu1 %v4066_v7  ;;  %5284 = vmatpush3.msra.mxu0 %v4082_v16 }
 0x2c7   :  { %5258 = vmatmul.mubr.msk.f32.vlgmr.msra.gmra.mxu1 %vm1790_vm7, %v6554_v52  ;;  %5286 = vmatmul.mubr.msk.f32.vlgmr.msra.gmra.mxu0 %vm1790_vm7, %v6554_v52 }
 0x2c8   :  { %5260 = vmatprep.mubr.msk.f32.mxu1 %vm1790_vm7, %v6575_v41  ;;  %5288 = vmatprep.mubr.msk.f32.mxu0 %vm1790_vm7, %v6575_v41 }
 0x2c9   :  { %5291 = vmatprep.subr.mxu0 %v5511_v40 }
 0x2cb   :  { %5261 = vmatmul.mubr.msk.f32.gmra.mxu1 %vm1790_vm7, %v6577_v13  ;;  %5289 = vmatmul.mubr.msk.f32.gmra.mxu0 %vm1790_vm7, %v6577_v13 }
 0x2cc   :  { %5297 = vmatprep.mubr.msk.f32.mxu0 %vm5512_vm4, %v5511_v40 }
 0x320   :  { %v5035_v18 = vpop.f32.mrf.mxu1  ;;  %v5063_v20 = vpop.f32.mrf.mxu0 }
 0x321   :  { %v2793_v22 = vrot.slane %v5063_v20, 1 }
 0x322   :  { %v1971_v52 = vpop.f32.mrf.mxu0  ;;  %v1872_v58 = vpop.f32.mrf.mxu1 }
 0x323   :  { %v2792_v23 = vrot.slane %v1971_v52, 1 }
 0x325   :  { %v2794_v17 = vsel %vm1273_vm1, %v2792_v23, %v2793_v22 }
 0x326   :  { %v2802_v41 = vadd.f32 %v2794_v17, %v1872_v58 }
 0x327   :  { %v5038_v37 = vpop.f32.mrf.mxu1  ;;  %v5066_v24 = vpop.f32.mrf.mxu0 }
 0x328   :  { %v2797_v0 = vrot.slane %v5066_v24, 1 }
 0x329   :  { %v1981_v44 = vpop.f32.mrf.mxu0  ;;  %v1882_v13 = vpop.f32.mrf.mxu1 }
 0x32a   :  { %v2795_v19 = vrot.slane %v1981_v44, 1 }
 0x32c   :  { %v2796_v21 = vsel %vm1273_vm1, %v2793_v22, %v2795_v19  ;;  %v2798_v11 = vsel %vm1273_vm1, %v2795_v19, %v2797_v0 }
 0x32d   :  { %v2803_v61 = vadd.f32 %v5035_v18, %v2796_v21  ;;  %v2804_v42 = vadd.f32 %v2798_v11, %v1882_v13  ;;  %v4098_v11 = vld [vmem:[%s7328_s7] ss:$0 sm:$0xff] }
 0x339   :  { %v5091_v34 = vpop.f32.mrf.mxu1  ;;  %v5119_v43 = vpop.f32.mrf.mxu0 }
 0x33a   :  { %v2827_v15 = vrot.slane %v5091_v34, 2  ;;  %v2861_v27 = vrot.slane %v5119_v43, 3 }
 0x33b   :  { %v2071_v46 = vpop.f32.mrf.mxu1  ;;  %v2171_v14 = vpop.f32.mrf.mxu0 }
 0x33c   :  { %v2826_v49 = vrot.slane %v2071_v46, 2  ;;  %v2860_v10 = vrot.slane %v2171_v14, 3 }
 0x33e   :  { %v2828_v48 = vsel %vm1352_vm2, %v2826_v49, %v2827_v15  ;;  %v2862_v47 = vsel %vm1431_vm3, %v2860_v10, %v2861_v27 }
 0x33f   :  { %v2836_v51 = vadd.f32 %v2828_v48, %v2802_v41  ;;  %v5094_v63 = vpop.f32.mrf.mxu1  ;;  %v5122_v1 = vpop.f32.mrf.mxu0 }
 0x340   :  { %v2831_v30 = vrot.slane %v5094_v63, 2  ;;  %v2865_v20 = vrot.slane %v5122_v1, 3 }
 0x341   :  { %v6916_v5 = vadd.f32 %v2862_v47, %v2836_v51  ;;  %v2081_v45 = vpop.f32.mrf.mxu1  ;;  %v2181_v59 = vpop.f32.mrf.mxu0 }
 0x342   :  { %v2829_v31 = vrot.slane %v2081_v45, 2  ;;  %v2863_v25 = vrot.slane %v2181_v59, 3 }
 0x344   :  { %v2830_v53 = vsel %vm1352_vm2, %v2827_v15, %v2829_v31  ;;  %v2864_v8 = vsel %vm1431_vm3, %v2861_v27, %v2863_v25  ;;  %v2832_v2 = vsel %vm1352_vm2, %v2829_v31, %v2831_v30  ;;  %v2866_v44 = vsel %vm1431_vm3, %v2863_v25, %v2865_v20 }
 0x345   :  { %v2837_v57 = vadd.f32 %v2830_v53, %v2803_v61  ;;  %v2838_v52 = vadd.f32 %v2832_v2, %v2804_v42 }
 0x347   :  { %v6920_v4 = vadd.f32 %v2864_v8, %v2837_v57  ;;  %v2872_v63 = vadd.f32 %v2866_v44, %v2838_v52  ;;  %v2946_v44 = vld [vmem:[%s7329_s8] sm:$0xff] }
 0x353   :  { %v5175_v32 = vpop.f32.mrf.mxu0  ;;  %v6922_v54 = vpop.f32.mrf.mxu1 }
 0x354   :  { %v2895_v19 = vrot.slane %v6922_v54, 4 }
 0x355   :  { %v2370_v50 = vpop.f32.mrf.mxu0  ;;  %v6924_v62 = vpop.f32.mrf.mxu1 }
 0x356   :  { %v2894_v21 = vrot.slane %v6924_v62, 4 }
 0x359   :  { %v5178_v26 = vpop.f32.mrf.mxu0  ;;  %v5150_v55 = vpop.f32.mrf.mxu1 }
 0x35a   :  { %v2899_v43 = vrot.slane %v5150_v55, 4  ;;  %v2896_v55 = vsel %vm1510_vm5, %v2894_v21, %v2895_v19  ;;  %v2948_v21 = vld [vmem:[%s7329_s8 + $0x10] sm:$0xf] }
 0x35b   :  { %v2281_v9 = vpop.f32.mrf.mxu1  ;;  %v2380_v38 = vpop.f32.mrf.mxu0  ;;  %v2904_v2 = vadd.f32 %v2896_v55, %v6916_v5  ;;  %v4109_v55 = vld [vmem:[%s7331_s10 + $0x70] sm:$0xff] }
 0x35c   :  { %v2897_v17 = vrot.slane %v2281_v9, 4 }
 0x35d   :  { %v2931_v20 = vadd.f32 %v4098_v11, %v2904_v2  ;;  %v4134_v2 = vld [vmem:[%s7331_s10 + $0x120] sm:$0xff] }
 0x35e   :  { %v2900_v1 = vsel %vm1510_vm5, %v2897_v17, %v2899_v43  ;;  %v2898_v31 = vsel %vm1510_vm5, %v2895_v19, %v2897_v17  ;;  %v2947_v19 = vld [vmem:[%s7329_s8 + $0x8] sm:$0xff]  ;;  %v3143_v43 = vld [vmem:[%s7331_s10 + $0x38] sm:$0xff] }
 0x35f   :  { %v2906_v9 = vadd.f32 %v2900_v1, %v2872_v63  ;;  %v2905_v0 = vadd.f32 %v2898_v31, %v6920_v4 }
 0x36d   :  { %v5203_v39 = vpop.f32.mrf.mxu1  ;;  %v5231_v36 = vpop.f32.mrf.mxu0 }
 0x36e   :  { %v2810_v60 = vrot.slane %v5203_v39, 1  ;;  %v2844_v41 = vrot.slane %v5231_v36, 2 }
 0x36f   :  { %v2469_v28 = vpop.f32.mrf.mxu1  ;;  %v2569_v29 = vpop.f32.mrf.mxu0 }
 0x370   :  { %v2809_v33 = vrot.slane %v2469_v28, 1  ;;  %v2843_v16 = vrot.slane %v2569_v29, 2 }
 0x372   :  { %v2811_v3 = vsel %vm1273_vm1, %v2809_v33, %v2810_v60  ;;  %v2845_v46 = vsel %vm1352_vm2, %v2843_v16, %v2844_v41 }
 0x373   :  { %v5206_v56 = vpop.f32.mrf.mxu1  ;;  %v5234_v12 = vpop.f32.mrf.mxu0  ;;  %v2819_v22 = vadd.f32 %v2811_v3, %v2370_v50  ;;  %v2933_v3 = vadd.f32 %v4098_v11, %v2906_v9  ;;  %v4108_v9 = vld [vmem:[%s7331_s10 + $0x68] sm:$0xff] }
 0x374   :  { %v2814_v18 = vrot.slane %v5206_v56, 1  ;;  %v2848_v49 = vrot.slane %v5234_v12, 2 }
 0x375   :  { %v2479_v35 = vpop.f32.mrf.mxu1  ;;  %v2579_v7 = vpop.f32.mrf.mxu0  ;;  %v2853_v27 = vadd.f32 %v2845_v46, %v2819_v22  ;;  %v2936_v52 = vmax.f32 %v2933_v3, 0.0  ;;  %v3142_v46 = vld [vmem:[%s7331_s10 + $0x30] sm:$0xff] }
 0x376   :  { %v2812_v6 = vrot.slane %v2479_v35, 1  ;;  %v2846_v61 = vrot.slane %v2579_v7, 2  ;;  %v2932_v7 = vadd.f32 %v4098_v11, %v2905_v0  ;;  %v4123_v3 = vld [vmem:[%s7331_s10 + $0xd0] sm:$0xff] }
 0x378   :  { %v2813_v37 = vsel %vm1273_vm1, %v2810_v60, %v2812_v6  ;;  %v2815_v24 = vsel %vm1273_vm1, %v2812_v6, %v2814_v18  ;;  %v2847_v25 = vsel %vm1352_vm2, %v2844_v41, %v2846_v61  ;;  %v2849_v53 = vsel %vm1352_vm2, %v2846_v61, %v2848_v49  ;;  %v3048_v61 = vld [vmem:[%s7330_s9] sm:$0xff]  ;;  %v3138_v49 = vld [vmem:[%s7331_s10 + $0x10] sm:$0xff] }
 0x379   :  { %v2820_v10 = vadd.f32 %v5175_v32, %v2813_v37  ;;  %v2821_v48 = vadd.f32 %v2815_v24, %v2380_v38  ;;  %v2934_v37 = vmax.f32 %v2931_v20, 0.0  ;;  %5310 = vmatprep.mubr.msk.f32.mxu1 %vm3050_vm9, %v3048_v61  ;;  %v4130_v20 = vld [vmem:[%s7331_s10 + $0x100] sm:$0xff] }
 0x37a   :  { %v4143_v61 = vld [vmem:[%s7331_s10 + $0x160] sm:$0xff] }
 0x37b   :  { %v2854_v39 = vadd.f32 %v2847_v25, %v2820_v10  ;;  %v2855_v38 = vadd.f32 %v2849_v53, %v2821_v48  ;;  %v3137_v10 = vld [vmem:[%s7331_s10 + $0x8] sm:$0xff] }
 0x387   :  { %v5259_v58 = vpop.f32.mrf.mxu1  ;;  %v5287_v23 = vpop.f32.mrf.mxu0 }
 0x388   :  { %v2878_v14 = vrot.slane %v5259_v58, 3  ;;  %v2912_v26 = vrot.slane %v5287_v23, 4  ;;  %v2935_v23 = vmax.f32 %v2932_v7, 0.0  ;;  %v4132_v7 = vld [vmem:[%s7331_s10 + $0x110] sm:$0xff] }
 0x389   :  { %v2669_v13 = vpop.f32.mrf.mxu1  ;;  %v2769_v34 = vpop.f32.mrf.mxu0 }
 0x38a   :  { %v2877_v15 = vrot.slane %v2669_v13, 3  ;;  %v2911_v59 = vrot.slane %v2769_v34, 4  ;;  %v3145_v13 = vld [vmem:[%s7331_s10 + $0x48] sm:$0xff]  ;;  %v3144_v34 = vld [vmem:[%s7331_s10 + $0x40] sm:$0xff] }
 0x38b   :  { %v5262_v47 = vpop.f32.mrf.mxu1  ;;  %v5290_v51 = vpop.f32.mrf.mxu0 }
 0x38c   :  { %v2879_v45 = vsel %vm1431_vm3, %v2877_v15, %v2878_v14  ;;  %v2882_v32 = vrot.slane %v5262_v47, 3  ;;  %v2913_v36 = vsel %vm1510_vm5, %v2911_v59, %v2912_v26  ;;  %v2916_v28 = vrot.slane %v5290_v51, 4  ;;  %v3140_v15 = vld [vmem:[%s7331_s10 + $0x20] sm:$0xff] }
 0x38d   :  { %v2887_v57 = vadd.f32 %v2879_v45, %v2853_v27  ;;  %v2679_v8 = vpop.f32.mrf.mxu1  ;;  %v2779_v50 = vpop.f32.mrf.mxu0  ;;  %v3139_v27 = vld [vmem:[%s7331_s10 + $0x18] sm:$0xff] }
 0x38e   :  { %v2880_v54 = vrot.slane %v2679_v8, 3  ;;  %v2914_v62 = vrot.slane %v2779_v50, 4  ;;  %v3049_v8 = vld [vmem:[%s7330_s9 + $0x8] sm:$0x3]  ;;  %v4114_v50 = vld [vmem:[%s7331_s10 + $0x98] sm:$0xff] }
 0x38f   :  { %v2921_v33 = vadd.f32 %v2913_v36, %v2887_v57  ;;  %v3136_v36 = vld [vmem:[%s7331_s10] sm:$0xff] }
 0x390   :  { %v2881_v29 = vsel %vm1431_vm3, %v2878_v14, %v2880_v54  ;;  %v2883_v56 = vsel %vm1431_vm3, %v2880_v54, %v2882_v32  ;;  %v2915_v30 = vsel %vm1510_vm5, %v2912_v26, %v2914_v62  ;;  %v2917_v60 = vsel %vm1510_vm5, %v2914_v62, %v2916_v28  ;;  %v3141_v14 = vld [vmem:[%s7331_s10 + $0x28] sm:$0xff]  ;;  %v4113_v26 = vld [vmem:[%s7331_s10 + $0x90] sm:$0xff]  ;;  %v4111_v54 = vld [vmem:[%s7331_s10 + $0x80] sm:$0xff] }
 0x391   :  { %v2888_v12 = vadd.f32 %v2881_v29, %v2854_v39  ;;  %v2889_v35 = vadd.f32 %v2883_v56, %v2855_v38  ;;  %v2937_v16 = vadd.f32 %v4098_v11, %v2921_v33  ;;  %v4112_v32 = vld [vmem:[%s7331_s10 + $0x88] sm:$0xff]  ;;  %v4110_v62 = vld [vmem:[%s7331_s10 + $0x78] sm:$0xff]  ;;  %v4107_v39 = vld [vmem:[%s7331_s10 + $0x60] sm:$0xff] }
 0x392   :  { %v4106_v38 = vld [vmem:[%s7331_s10 + $0x58] sm:$0xff]  ;;  %v4105_v28 = vld [vmem:[%s7331_s10 + $0x50] sm:$0xff] }
 0x393   :  { %v2922_v6 = vadd.f32 %v2915_v30, %v2888_v12  ;;  %v2923_v42 = vadd.f32 %v2917_v60, %v2889_v35  ;;  %v2940_v17 = vmax.f32 %v2937_v16, 0.0  ;;  %v4137_v56 = vld [vmem:[%s7331_s10 + $0x138] sm:$0xff]  ;;  %v4126_v12 = vld [vmem:[%s7331_s10 + $0xe8] sm:$0xff]  ;;  %v4136_v35 = vld [vmem:[%s7331_s10 + $0x130] sm:$0xff] }
 0x394   :  { %v4135_v30 = vld [vmem:[%s7331_s10 + $0x128] sm:$0xff]  ;;  %v4124_v60 = vld [vmem:[%s7331_s10 + $0xd8] sm:$0xff]  ;;  %v4121_v16 = vld [vmem:[%s7331_s10 + $0xc0] sm:$0xff] }
 0x395   :  { %v2938_v18 = vadd.f32 %v4098_v11, %v2922_v6  ;;  %v2939_v4 = vadd.f32 %v4098_v11, %v2923_v42  ;;  %v2943_v5 = vmax.f32 %v2934_v37, %v2940_v17  ;;  %v4125_v11 = vld [vmem:[%s7331_s10 + $0xe0] sm:$0xff]  ;;  %v4133_v6 = vld [vmem:[%s7331_s10 + $0x118] sm:$0xff]  ;;  %v4122_v42 = vld [vmem:[%s7331_s10 + $0xc8] sm:$0xff] }
 0x397   :  { %v2941_v22 = vmax.f32 %v2938_v18, 0.0  ;;  %v2942_v58 = vmax.f32 %v2939_v4, 0.0  ;;  %v4131_v18 = vld [vmem:[%s7331_s10 + $0x108] sm:$0xff]  ;;  %v4120_v4 = vld [vmem:[%s7331_s10 + $0xb8] sm:$0xff] }
 0x399   :  { %v2945_v41 = vmax.f32 %v2936_v52, %v2942_v58  ;;  %v2944_v24 = vmax.f32 %v2935_v23, %v2941_v22  ;;  %v4119_v52 = vld [vmem:[%s7331_s10 + $0xb0] sm:$0xff]  ;;  %v4129_v22 = vld [vmem:[%s7331_s10 + $0xf8] sm:$0xff]  ;;  %v4118_v58 = vld [vmem:[%s7331_s10 + $0xa8] sm:$0xff] }
 0x39a   :  { %v4128_v23 = vld [vmem:[%s7331_s10 + $0xf0] sm:$0xff] }
 0x39b   :  { %5292 = vmatpush3.msra.mxu0 %v2945_v41  ;;  %v4117_v41 = vld [vmem:[%s7331_s10 + $0xa0] sm:$0xff] }
 0x39c   :  { %5293 = vmatprep.subr.mxu0 %v5511_v40 }
 0x39d   :  { %5294 = vmatpush3.msra.mxu0 %v2944_v24  ;;  %v4148_v24 = vld [vmem:[%s7331_s10 + $0x188] sm:$0xff] }
 0x39e   :  { %5295 = vmatprep.subr.mxu0 %v5511_v40 }
 0x39f   :  { %5296 = vmatpush3.msra.mxu0 %v2943_v5  ;;  %v4147_v5 = vld [vmem:[%s7331_s10 + $0x180] sm:$0xff] }
 0x3a0   :  { %5298 = vmatmul.mubr.msk.f32.vlgmr.msra.gmra.mxu0 %vm2949_vm8, %v2946_v44  ;;  %5336 = vmatprep.subr.mxu0 %v5511_v40  ;;  %v4146_v44 = vld [vmem:[%s7331_s10 + $0x178] sm:$0xff] }
 0x3a1   :  { %5300 = vmatprep.mubr.msk.f32.mxu0 %vm5512_vm4, %v5511_v40  ;;  %5337 = vmatpush3.msra.mxu0 %v3145_v13  ;;  %v4142_v13 = vld [vmem:[%s7331_s10 + $0x158] sm:$0xff] }
 0x3a2   :  { %5338 = vmatprep.subr.mxu0 %v5511_v40 }
 0x3a3   :  { %5339 = vmatpush3.msra.mxu0 %v3144_v34  ;;  %v4141_v34 = vld [vmem:[%s7331_s10 + $0x150] sm:$0xff] }
 0x3a4   :  { %5301 = vmatmul.mubr.msk.f32.gmra.mxu0 %vm2949_vm8, %v2947_v19  ;;  %5340 = vmatprep.subr.mxu0 %v5511_v40  ;;  %v4145_v19 = vld [vmem:[%s7331_s10 + $0x170] sm:$0xff] }
 0x3a5   :  { %5303 = vmatprep.mubr.msk.f32.mxu0 %vm5512_vm4, %v5511_v40  ;;  %5341 = vmatpush3.msra.mxu0 %v3143_v43  ;;  %v4140_v43 = vld [vmem:[%s7331_s10 + $0x148] sm:$0xff] }
 0x3a6   :  { %5342 = vmatprep.subr.mxu0 %v5511_v40 }
 0x3a7   :  { %5343 = vmatpush3.msra.mxu0 %v3142_v46  ;;  %v4139_v46 = vld [vmem:[%s7331_s10 + $0x140] sm:$0xff] }
 0x3a8   :  { %5304 = vmatmul.mubr.msk.f32.gmra.mxu0 %vm2949_vm8, %v2948_v21  ;;  %5344 = vmatprep.subr.mxu0 %v5511_v40  ;;  %v4144_v21 = vld [vmem:[%s7331_s10 + $0x168] sm:$0xff] }
 0x3a9   :  { %5356 = vmatprep.mubr.msk.f32.mxu0 %vm5512_vm4, %v5511_v40  ;;  %5345 = vmatpush3.msra.mxu0 %v3141_v14  ;;  %v3582_v14 = vld [vmem:[%s7333_s12 + $0x70] sm:$0xff] }
 0x3aa   :  { %5346 = vmatprep.subr.mxu0 %v5511_v40 }
 0x3ab   :  { %5347 = vmatpush3.msra.mxu0 %v3140_v15  ;;  %v3581_v15 = vld [vmem:[%s7333_s12 + $0x68] sm:$0xff] }
 0x3ac   :  { %5348 = vmatprep.subr.mxu0 %v5511_v40 }
 0x3ad   :  { %5349 = vmatpush3.msra.mxu0 %v3139_v27  ;;  %v3580_v27 = vld [vmem:[%s7333_s12 + $0x60] sm:$0xff] }
 0x3ae   :  { %5350 = vmatprep.subr.mxu0 %v5511_v40 }
 0x3af   :  { %5351 = vmatpush3.msra.mxu0 %v3138_v49  ;;  %v3579_v49 = vld [vmem:[%s7333_s12 + $0x58] sm:$0xff] }
 0x3b0   :  { %5352 = vmatprep.subr.mxu0 %v5511_v40 }
 0x3b1   :  { %5353 = vmatpush3.msra.mxu0 %v3137_v10  ;;  %v3578_v10 = vld [vmem:[%s7333_s12 + $0x50] sm:$0xff] }
 0x3b2   :  { %5354 = vmatprep.subr.mxu0 %v5511_v40 }
 0x3b3   :  { %5355 = vmatpush3.msra.mxu0 %v3136_v36 }
 0x3b4   :  { %5382 = vmatprep.subr.mxu0 %v5511_v40 }
 0x460   :  { %v3025_v48 = vpop.f32.mrf.mxu0 }
 0x462   :  { %v5299_v47 = vpop.f32.mrf.mxu0 }
 0x463   :  { %v3576_v47 = vld [vmem:[%s7333_s12 + $0x40] sm:$0xff] }
 0x464   :  { %v3030_v51 = vpop.f32.mrf.mxu0 }
 0x465   :  { %v3041_v45 = vrot.slane %v3030_v51, 2 }
 0x466   :  { %v5302_v63 = vpop.f32.mrf.mxu0 }
 0x467   :  { %v3574_v63 = vld [vmem:[%s7333_s12 + $0x30] sm:$0xff] }
 0x468   :  { %v3035_v1 = vpop.f32.mrf.mxu0 }
 0x469   :  { %v3042_v59 = vrot.slane %v3035_v1, 2  ;;  %v3573_v1 = vld [vmem:[%s7333_s12 + $0x28] sm:$0xff] }
 0x46a   :  { %v5305_v31 = vpop.f32.mrf.mxu0 }
 0x46b   :  { %v3047_v25 = vmax.f32 %v3030_v51, %v3042_v59  ;;  %v3043_v53 = vsel %vm1352_vm2, %v3041_v45, %v3042_v59  ;;  %v3575_v51 = vld [vmem:[%s7333_s12 + $0x38] sm:$0xff]  ;;  %v3572_v45 = vld [vmem:[%s7333_s12 + $0x20] sm:$0xff]  ;;  %v3570_v31 = vld [vmem:[%s7333_s12 + $0x10] sm:$0xff] }
 0x46c   :  { %v3046_v57 = vmax.f32 %v3025_v48, %v3043_v53  ;;  %v3577_v48 = vld [vmem:[%s7333_s12 + $0x48] sm:$0xff]  ;;  %v3571_v59 = vld [vmem:[%s7333_s12 + $0x18] sm:$0xff]  ;;  %v3568_v53 = vld [vmem:[%s7333_s12] sm:$0xff] }
 0x46d   :  { %5306 = vmatprep.subr.msk.mxu1 %vm3057_vm10, %v3047_v25 }
 0x46e   :  { %5307 = vmatpush3.msk.msra.mxu1 %vm3057_vm10, %v3047_v25  ;;  %v3569_v25 = vld [vmem:[%s7333_s12 + $0x8] sm:$0xff] }
 0x46f   :  { %5308 = vmatprep.subr.mxu1 %v3046_v57 }
 0x470   :  { %5309 = vmatpush3.msra.mxu1 %v3046_v57  ;;  %v3675_v57 = vld [vmem:[%s7335_s14 + $0x50] sm:$0xf] }
 0x471   :  { %5311 = vmatmul.mubr.msk.f32.vlgmr.msra.gmra.mxu1 %vm3050_vm9, %v3049_v8  ;;  %5313 = vmatprep.subr.mxu1 %v5511_v40  ;;  %v3674_v8 = vld [vmem:[%s7335_s14 + $0x48] sm:$0xff] }
 0x472   :  { %5314 = vmatpush3.msra.mxu1 %v4114_v50  ;;  %5333 = vmatprep.mubr.msk.f32.mxu1 %vm5512_vm4, %v5511_v40  ;;  %v3673_v50 = vld [vmem:[%s7335_s14 + $0x40] sm:$0xff] }
 0x473   :  { %5315 = vmatprep.subr.mxu1 %v5511_v40 }
 0x474   :  { %5316 = vmatpush3.msra.mxu1 %v4113_v26  ;;  %v3672_v26 = vld [vmem:[%s7335_s14 + $0x38] sm:$0xff] }
 0x475   :  { %5317 = vmatprep.subr.mxu1 %v5511_v40 }
 0x476   :  { %5318 = vmatpush3.msra.mxu1 %v4112_v32  ;;  %v3671_v32 = vld [vmem:[%s7335_s14 + $0x30] sm:$0xff] }
 0x477   :  { %5319 = vmatprep.subr.mxu1 %v5511_v40 }
 0x478   :  { %5320 = vmatpush3.msra.mxu1 %v4111_v54  ;;  %v3670_v54 = vld [vmem:[%s7335_s14 + $0x28] sm:$0xff] }
 0x479   :  { %5321 = vmatprep.subr.mxu1 %v5511_v40 }
 0x47a   :  { %5322 = vmatpush3.msra.mxu1 %v4110_v62  ;;  %v3669_v62 = vld [vmem:[%s7335_s14 + $0x20] sm:$0xff] }
 0x47b   :  { %5323 = vmatprep.subr.mxu1 %v5511_v40 }
 0x47c   :  { %5324 = vmatpush3.msra.mxu1 %v4109_v55  ;;  %v3668_v55 = vld [vmem:[%s7335_s14 + $0x18] sm:$0xff] }
 0x47d   :  { %5325 = vmatprep.subr.mxu1 %v5511_v40 }
 0x47e   :  { %5326 = vmatpush3.msra.mxu1 %v4108_v9 }
 0x47f   :  { %5327 = vmatprep.subr.mxu1 %v5511_v40 }
 0x480   :  { %5328 = vmatpush3.msra.mxu1 %v4107_v39 }
 0x481   :  { %5329 = vmatprep.subr.mxu1 %v5511_v40 }
 0x482   :  { %5330 = vmatpush3.msra.mxu1 %v4106_v38 }
 0x483   :  { %5331 = vmatprep.subr.mxu1 %v5511_v40 }
 0x484   :  { %5332 = vmatpush3.msra.mxu1 %v4105_v28 }
 0x485   :  { %5359 = vmatprep.subr.mxu1 %v5511_v40 }
 0x531   :  { %v7061_v29 = vpop.f32.mrf.mxu1 }
 0x533   :  { %v7066_v0 = vpop.f32.mrf.mxu1 }
 0x534   :  { %v3158_v33 = vrot.slane %v7066_v0, 2  ;;  %5357 = vmatmul.mubr.msk.f32.vlgmr.msra.gmra.mxu0 %vm3159_vm11, %v7066_v0  ;;  %v3400_v17 = vrot.slane %v7066_v0, 6  ;;  %v3315_v37 = vrot.slane %v7066_v0, 4 }
 0x535   :  { %5383 = vmatpush3.msra.mxu0 %v4137_v56  ;;  %5402 = vmatprep.mubr.msk.f32.mxu0 %vm5512_vm4, %v5511_v40 }
 0x536   :  { %5384 = vmatprep.subr.mxu0 %v5511_v40  ;;  %5334 = vmatmul.mubr.msk.f32.vlgmr.msra.gmra.mxu1 %vm3159_vm11, %v3158_v33 }
 0x537   :  { %5360 = vmatpush3.msra.mxu1 %v4126_v12  ;;  %5385 = vmatpush3.msra.mxu0 %v4136_v35 }
 0x538   :  { %5361 = vmatprep.subr.mxu1 %v5511_v40  ;;  %5386 = vmatprep.subr.mxu0 %v5511_v40 }
 0x539   :  { %5362 = vmatpush3.msra.mxu1 %v4125_v11  ;;  %5387 = vmatpush3.msra.mxu0 %v4135_v30  ;;  %v4150_v30 = vld [vmem:[%s7332_s11] ss:$0 sm:$0xff] }
 0x53a   :  { %5363 = vmatprep.subr.mxu1 %v5511_v40  ;;  %5388 = vmatprep.subr.mxu0 %v5511_v40 }
 0x53b   :  { %5364 = vmatpush3.msra.mxu1 %v4124_v60  ;;  %5389 = vmatpush3.msra.mxu0 %v4134_v2 }
 0x53c   :  { %5365 = vmatprep.subr.mxu1 %v5511_v40  ;;  %5390 = vmatprep.subr.mxu0 %v5511_v40 }
 0x53d   :  { %5366 = vmatpush3.msra.mxu1 %v4123_v3  ;;  %5391 = vmatpush3.msra.mxu0 %v4133_v6 }
 0x53e   :  { %5367 = vmatprep.subr.mxu1 %v5511_v40  ;;  %5392 = vmatprep.subr.mxu0 %v5511_v40 }
 0x53f   :  { %5368 = vmatpush3.msra.mxu1 %v4122_v42  ;;  %5393 = vmatpush3.msra.mxu0 %v4132_v7  ;;  %v3667_v42 = vld [vmem:[%s7335_s14 + $0x10] sm:$0xff]  ;;  %v3666_v7 = vld [vmem:[%s7335_s14 + $0x8] sm:$0xff] }
 0x540   :  { %5369 = vmatprep.subr.mxu1 %v5511_v40  ;;  %5394 = vmatprep.subr.mxu0 %v5511_v40 }
 0x541   :  { %5370 = vmatpush3.msra.mxu1 %v4121_v16  ;;  %5395 = vmatpush3.msra.mxu0 %v4131_v18  ;;  %v3665_v16 = vld [vmem:[%s7335_s14] sm:$0xff]  ;;  %s5489_s14 = scalar_lea.vmem %s3768_s4, 32 }
 0x542   :  { %5371 = vmatprep.subr.mxu1 %v5511_v40  ;;  %5396 = vmatprep.subr.mxu0 %v5511_v40  ;;  %v4151_v18 = vld [vmem:[%s7334_s13] ss:$0 sm:$0xff]  ;;  %p5490_p0 = scmp.ne.s32.totalorder %s3768_s4, %s5489_s14  ;;  %p5495_p2 = scmp.lt.s32.totalorder %s5489_s14, %s5489_s14 }
 0x543   :  { %5372 = vmatpush3.msra.mxu1 %v4120_v4  ;;  %5397 = vmatpush3.msra.mxu0 %v4130_v20 }
 0x544   :  { %5373 = vmatprep.subr.mxu1 %v5511_v40  ;;  %5398 = vmatprep.subr.mxu0 %v5511_v40  ;;  %p5496_p3 = por %p5495_p2, %p5494_p1 }
 0x545   :  { %5374 = vmatpush3.msra.mxu1 %v4119_v52  ;;  %5399 = vmatpush3.msra.mxu0 %v4129_v22 }
 0x546   :  { %5375 = vmatprep.subr.mxu1 %v5511_v40  ;;  %5400 = vmatprep.subr.mxu0 %v5511_v40  ;;  %p5497_p4 = pnand %p5496_p3, %p5490_p0 }
 0x547   :  { %5376 = vmatpush3.msra.mxu1 %v4118_v58  ;;  %5401 = vmatpush3.msra.mxu0 %v4128_v23  ;;  %v4153_v58 = vld [vmem:[%s7336_s15] ss:$0 sm:$0xff] }
 0x548   :  { %5377 = vmatprep.subr.mxu1 %v5511_v40  ;;  %5403 = vmatmul.mubr.msk.f32.vlgmr.msra.gmra.mxu0 %vm3159_vm11, %v3400_v17 }
 0x549   :  { %5378 = vmatpush3.msra.mxu1 %v4117_v41  ;;  %5379 = vmatprep.mubr.msk.f32.mxu1 %vm5512_vm4, %v5511_v40 }
 0x54a   :  { %5380 = vmatmul.mubr.msk.f32.vlgmr.msra.gmra.mxu1 %vm3159_vm11, %v3315_v37  ;;  %5405 = vmatprep.subr.mxu1 %v5511_v40 }
 0x54b   :  { %5406 = vmatpush3.msra.mxu1 %v4148_v24  ;;  %5425 = vmatprep.mubr.msk.f32.mxu1 %vm5512_vm4, %v5511_v40 }
 0x54c   :  { %5407 = vmatprep.subr.mxu1 %v5511_v40  ;;  %5428 = vmatprep.subr.mxu0 %v5511_v40 }
 0x54d   :  { %5408 = vmatpush3.msra.mxu1 %v4147_v5  ;;  %5458 = vmatprep.mubr.msk.f32.mxu0 %vm5512_vm4, %v5511_v40 }
 0x54e   :  { %5409 = vmatprep.subr.mxu1 %v5511_v40  ;;  %5429 = vmatpush3.msra.mxu0 %v3582_v14 }
 0x54f   :  { %5410 = vmatpush3.msra.mxu1 %v4146_v44  ;;  %5430 = vmatprep.subr.mxu0 %v5511_v40 }
 0x550   :  { %5411 = vmatprep.subr.mxu1 %v5511_v40  ;;  %5431 = vmatpush3.msra.mxu0 %v3581_v15 }
 0x551   :  { %5412 = vmatpush3.msra.mxu1 %v4145_v19  ;;  %5432 = vmatprep.subr.mxu0 %v5511_v40 }
 0x552   :  { %5413 = vmatprep.subr.mxu1 %v5511_v40  ;;  %5433 = vmatpush3.msra.mxu0 %v3580_v27 }
 0x553   :  { %5414 = vmatpush3.msra.mxu1 %v4144_v21  ;;  %5434 = vmatprep.subr.mxu0 %v5511_v40 }
 0x554   :  { %5415 = vmatprep.subr.mxu1 %v5511_v40  ;;  %5435 = vmatpush3.msra.mxu0 %v3579_v49 }
 0x555   :  { %5416 = vmatpush3.msra.mxu1 %v4143_v61  ;;  %5436 = vmatprep.subr.mxu0 %v5511_v40 }
 0x556   :  { %5417 = vmatprep.subr.mxu1 %v5511_v40  ;;  %5437 = vmatpush3.msra.mxu0 %v3578_v10 }
 0x557   :  { %5418 = vmatpush3.msra.mxu1 %v4142_v13  ;;  %5438 = vmatprep.subr.mxu0 %v5511_v40 }
 0x558   :  { %5419 = vmatprep.subr.mxu1 %v5511_v40  ;;  %5439 = vmatpush3.msra.mxu0 %v3577_v48 }
 0x559   :  { %5420 = vmatpush3.msra.mxu1 %v4141_v34  ;;  %5440 = vmatprep.subr.mxu0 %v5511_v40 }
 0x55a   :  { %5421 = vmatprep.subr.mxu1 %v5511_v40  ;;  %5441 = vmatpush3.msra.mxu0 %v3576_v47 }
 0x55b   :  { %5422 = vmatpush3.msra.mxu1 %v4140_v43  ;;  %5442 = vmatprep.subr.mxu0 %v5511_v40 }
 0x55c   :  { %5423 = vmatprep.subr.mxu1 %v5511_v40  ;;  %5443 = vmatpush3.msra.mxu0 %v3575_v51 }
 0x55d   :  { %5424 = vmatpush3.msra.mxu1 %v4139_v46  ;;  %5444 = vmatprep.subr.mxu0 %v5511_v40 }
 0x55e   :  { %5426 = vmatmul.mubr.msk.f32.vlgmr.msra.gmra.mxu1 %vm3159_vm11, %v7061_v29  ;;  %5461 = vmatprep.subr.mxu1 %v5511_v40 }
 0x55f   :  { %5483 = vmatprep.mubr.msk.f32.mxu1 %vm5512_vm4, %v5511_v40  ;;  %5445 = vmatpush3.msra.mxu0 %v3574_v63 }
 0x560   :  { %5446 = vmatprep.subr.mxu0 %v5511_v40  ;;  %5462 = vmatpush3.msk.msra.mxu1 %vm1510_vm5, %v3675_v57 }
 0x561   :  { %5447 = vmatpush3.msra.mxu0 %v3573_v1  ;;  %5463 = vmatprep.subr.mxu1 %v5511_v40 }
 0x562   :  { %5448 = vmatprep.subr.mxu0 %v5511_v40  ;;  %5464 = vmatpush3.msra.mxu1 %v3674_v8 }
 0x563   :  { %5449 = vmatpush3.msra.mxu0 %v3572_v45  ;;  %5465 = vmatprep.subr.mxu1 %v5511_v40 }
 0x564   :  { %5450 = vmatprep.subr.mxu0 %v5511_v40  ;;  %5466 = vmatpush3.msra.mxu1 %v3673_v50 }
 0x565   :  { %5451 = vmatpush3.msra.mxu0 %v3571_v59  ;;  %5467 = vmatprep.subr.mxu1 %v5511_v40 }
 0x566   :  { %5452 = vmatprep.subr.mxu0 %v5511_v40  ;;  %5468 = vmatpush3.msra.mxu1 %v3672_v26 }
 0x567   :  { %5453 = vmatpush3.msra.mxu0 %v3570_v31  ;;  %5469 = vmatprep.subr.mxu1 %v5511_v40 }
 0x568   :  { %5454 = vmatprep.subr.mxu0 %v5511_v40  ;;  %5470 = vmatpush3.msra.mxu1 %v3671_v32 }
 0x569   :  { %5455 = vmatpush3.msra.mxu0 %v3569_v25  ;;  %5471 = vmatprep.subr.mxu1 %v5511_v40 }
 0x56a   :  { %5456 = vmatprep.subr.mxu0 %v5511_v40  ;;  %5472 = vmatpush3.msra.mxu1 %v3670_v54 }
 0x56b   :  { %5457 = vmatpush3.msra.mxu0 %v3568_v53  ;;  %5473 = vmatprep.subr.mxu1 %v5511_v40 }
 0x56c   :  { %5474 = vmatpush3.msra.mxu1 %v3669_v62 }
 0x56d   :  { %5475 = vmatprep.subr.mxu1 %v5511_v40 }
 0x56e   :  { %5476 = vmatpush3.msra.mxu1 %v3668_v55 }
 0x56f   :  { %5477 = vmatprep.subr.mxu1 %v5511_v40 }
 0x570   :  { %5478 = vmatpush3.msra.mxu1 %v3667_v42 }
 0x571   :  { %5479 = vmatprep.subr.mxu1 %v5511_v40 }
 0x572   :  { %5480 = vmatpush3.msra.mxu1 %v3666_v7 }
 0x573   :  { %5481 = vmatprep.subr.mxu1 %v5511_v40 }
 0x574   :  { %5482 = vmatpush3.msra.mxu1 %v3665_v16 }
 0x5f4   :  { %v3300_v9 = vpop.f32.mrf.mxu0 }
 0x5f6   :  { %v3228_v39 = vpop.f32.mrf.mxu1  ;;  %v5358_v38 = vpop.f32.mrf.mxu0 }
 0x5f7   :  { %v3301_v33 = vadd.f32 %v3300_v9, %v3228_v39 }
 0x5f8   :  { %v5335_v36 = vpop.f32.mrf.mxu1 }
 0x608   :  { %v3469_v28 = vpop.f32.mrf.mxu0 }
 0x60a   :  { %v3384_v29 = vpop.f32.mrf.mxu1  ;;  %v5404_v56 = vpop.f32.mrf.mxu0 }
 0x60b   :  { %v3388_v12 = vadd.f32 %v3384_v29, %v3301_v33 }
 0x60c   :  { %v5381_v0 = vpop.f32.mrf.mxu1 }
 0x60d   :  { %v3473_v35 = vadd.f32 %v3469_v28, %v3388_v12 }
 0x61e   :  { %v3554_v11 = vpop.f32.mrf.mxu1 }
 0x61f   :  { %v3558_v60 = vadd.f32 %v3554_v11, %v3473_v35 }
 0x620   :  { %v5427_v2 = vpop.f32.mrf.mxu1 }
 0x621   :  { %v3566_v3 = vadd.f32 %v4150_v30, %v3558_v60 }
 0x623   :  { %v3567_v6 = vmax.f32 %v3566_v3, 0.0 }
 0x625   :  { %5459 = vmatmul.mubr.msk.f32.vlgmr.msra.gmra.mxu0 %vm3590_vm12, %v3567_v6 }
 0x6e5   :  { %v3660_v4 = vpop.f32.mrf.mxu0 }
 0x6e6   :  { %v3661_v20 = vadd.f32 %v4151_v18, %v3660_v4 }
 0x6e7   :  { %v5460_v52 = vpop.f32.mrf.mxu0 }
 0x6e8   :  { %v3664_v22 = vmax.f32 %v3661_v20, 0.0 }
 0x6ea   :  { %5484 = vmatmul.mubr.msk.f32.vlgmr.msra.gmra.mxu1 %vm1790_vm7, %v3664_v22 }
 0x7aa   :  { %v3755_v40 = vpop.f32.mrf.mxu1 }
 0x7ab   :  { %v3756_v23 = vadd.f32 %v4153_v58, %v3755_v40 }
 0x7ac   :  { %v5485_v17 = vpop.f32.mrf.mxu1 }
 0x7ad   :  { %3760 = vst.msk [vmem:[#allocation2] sm:$0x3] %vm3759_vm13, %v3756_v23 }
 0x7ae   :  { %5500 = shalt.err (!%p5497_p4)
}
 0x7af   :  { %3770 = dma.vmem_to_hbm [thread:$0]  %s3768_s4, 32, %s7337_s16, [#allocation3]  }
 0x7b0   :  { %5509 = dma.done.wait [#allocation3], 32  }
 0x7b1   :  { %5510 = vsyncadd [#allocation3], 4294967264 }
 0x7b2   :  { %3774 = vsyncpa [#allocation3], 1 }

</bundles_post_ra>
